<compile_context>
chip_gen: v7x
topology: tpu7x:2x2x1
jax: 0.10.0
libtpu: 0.0.40
codegen_flags: <defaults>
</compile_context>

<pallas_src>
import jax
import jax.numpy as jnp
import numpy as np
from jax.experimental import pallas as pl
from jax.experimental.pallas import tpu as pltpu

NEG_SLOPE = 0.01  # F.leaky_relu default
LANES = 128       # vreg lane width; feature buffer / weight-K padding target


def _leaky(v):
    return jnp.where(v > 0, v, NEG_SLOPE * v)


# --------------------------------------------------------------------------
# Fused Pallas kernel: whole GNN forward in one invocation
# --------------------------------------------------------------------------

def _make_fused_kernel(B, N, F0, half, n_way, layouts):
    """layouts: per-stage list of 13 (row_offset, rows, cols) tuples into the slab."""
    n_stage = len(layouts)
    BN = B * N

    def kernel(x0_ref, slab_ref, out_ref, xbuf_ref):
        def rd(entry):
            off, r, c = entry                       # static ints -> zero-cost ref view
            return slab_ref[off:off + r, 0:c]

        # Feature buffer lives in VMEM scratch for the whole forward; lanes
        # [0:F0] hold the input, each layer appends `half` new lanes.
        xbuf_ref[...] = x0_ref[...]                 # (BN, 128), zero-padded lanes
        out_ref[...] = jnp.zeros_like(out_ref)      # lane-dense output slab

        # Diagonal mask for the (B*N, N) logits, hoisted once (broadcast_in_dim
        # is not CSE'd by JAX).  Row p = b*N + i, column j; mask j == i.
        row = jax.lax.broadcasted_iota(jnp.int32, (BN, N), 0) % N
        col = jax.lax.broadcasted_iota(jnp.int32, (BN, N), 1)
        diag = row == col

        for s in range(n_stage):
            (w1, b1, w2, b2, w3, b3, w4, b4,
             w5, b5, wa, wb, bg) = [rd(e) for e in layouts[s]]

            xfull = xbuf_ref[...]                   # (BN, 128), zero beyond F_s
            x3 = xfull.reshape(B, N, LANES)

            # ---------- Wcompute: pairwise |xi - xj| -> 1x1-conv MLP ----------
            # Built once for the whole batch (no per-batch slice/concat); the
            # padded lanes give |0-0| = 0, and w1 has zero rows there -> exact.
            d = jnp.abs(x3[:, :, None, :] - x3[:, None, :, :])       # (B, N, N, 128)
            dk = d.reshape(B * N * N, LANES)                          # lane dim unchanged

            h = _leaky(jnp.dot(dk, w1, preferred_element_type=jnp.float32) + b1)
            h = _leaky(jnp.dot(h, w2, preferred_element_type=jnp.float32) + b2)
            h = _leaky(jnp.dot(h, w3, preferred_element_type=jnp.float32) + b3)
            h = _leaky(jnp.dot(h, w4, preferred_element_type=jnp.float32) + b4)
            nf_l = h.shape[-1]

            # conv2d_last (nf -> 1): broadcast-mul + lane reduction.
            logits = jnp.sum(h.reshape(BN, N, nf_l) * w5, axis=-1) + b5   # (BN, N)

            # W_new = W_new - W_id * 1e8, then row softmax over j.
            logits = jnp.where(diag, logits - 1e8, logits)
            m = jnp.max(logits, axis=-1, keepdims=True)
            e = jnp.exp(logits - m)
            ssum = jnp.sum(e, axis=-1, keepdims=True)
            inv = pl.reciprocal(ssum, approx=True)       # EUP slot
            inv = inv * (2.0 - ssum * inv)               # one Newton step -> full f32
            adj = e * inv                                # (BN, N); rows = (b, i), cols = j

            out_ref[:, s * N:(s + 1) * N] = adj          # adjacency s in its lane range

            # ---------- Gconv 'J2': y = x @ Wa + (A @ x) @ Wb + b ----------
            adj3 = adj.reshape(B, N, N)
            ax = jnp.einsum("bij,bjf->bif", adj3, x3,
                            preferred_element_type=jnp.float32).reshape(BN, LANES)
            y = (jnp.dot(xfull, wa, preferred_element_type=jnp.float32)
                 + jnp.dot(ax, wb, preferred_element_type=jnp.float32) + bg)

            if s < n_stage - 1:
                F_cur = F0 + half * s
                xbuf_ref[:, F_cur:F_cur + half] = _leaky(y)   # feature growth in VMEM
            else:
                out_ref[:, n_stage * N:n_stage * N + n_way] = y   # final logits

    return kernel


# --------------------------------------------------------------------------
# Wrapper: pack all parameters into one lane-padded slab (done once) + pallas_call
# --------------------------------------------------------------------------

def _pack_slab(arrays):
    """Pack 2D arrays (cols <= 128) into one (rows, 128) f32 slab.

    Each array's row block starts at an 8-sublane-aligned offset so in-kernel
    static slices never cross unaligned tile boundaries.
    Returns (slab, layout) with layout = [(offset, rows, cols), ...].
    """
    layout, off = [], 0
    for a in arrays:
        r, c = int(a.shape[0]), int(a.shape[1])
        assert c <= LANES
        layout.append((off, r, c))
        off += -(-r // 8) * 8
    slab = np.zeros((max(off, 8), LANES), np.float32)
    for (o, r, c), a in zip(layout, arrays):
        slab[o:o + r, :c] = np.asarray(a, np.float32)
    return jnp.asarray(slab), layout


def _estimate_cost(B, N, w_stages, g_stages, F0, half):
    Mw, Mg = B * N * N, B * N
    flops = trans = 0
    byts = Mg * LANES * 4
    for s, (wp, gp) in enumerate(zip(w_stages, g_stages)):
        F = F0 + half * s
        w1, b1, w2, b2, w3, b3, w4, b4, w5, b5 = wp
        Wg, bg = gp
        for w in (w1, w2, w3, w4):
            flops += 2 * Mw * int(w.shape[0]) * int(w.shape[1])
        flops += 2 * Mw * int(w5.shape[1])          # conv2d_last
        flops += 12 * Mw                            # abs / leaky / softmax elementwise
        flops += 2 * Mg * N * F                     # A @ x
        flops += 2 * Mg * int(Wg.shape[0]) * int(Wg.shape[1])
        trans += Mw + Mg                            # exp + reciprocal
        byts += 4 * sum(int(a.size) for a in list(wp) + list(gp))
    byts += Mg * LANES * 4                          # output slab
    return int(flops), int(trans), int(byts)


def make_forward(model):
    """Build a jitted fused forward: one pallas_call for the whole GNN."""
    L = model["num_layers"]
    w_stages = list(model["w"]) + [model["w_last"]]
    g_stages = list(model["l"]) + [model["l_last"]]
    F0 = int(w_stages[0][0].shape[0])
    half = int(model["l"][0][0].shape[1]) if L else 0
    n_way = int(model["l_last"][0].shape[1])
    n_stage = L + 1

    # ---- pack every parameter into one lane-padded slab (layout plumbing, once) ----
    flat_arrays = []
    for s in range(n_stage):
        F = F0 + half * s
        w1, b1, w2, b2, w3, b3, w4, b4, w5t, b5 = w_stages[s]
        Wg, bg = g_stages[s]
        gout = int(Wg.shape[1])
        # K-pad the matmuls whose K is the (growing) feature width to 128 rows
        # of zeros; padded feature lanes are zero so this is exact.
        w1p = np.zeros((LANES, int(w1.shape[1])), np.float32)
        w1p[:F] = np.asarray(w1, np.float32)
        wap = np.zeros((LANES, gout), np.float32)
        wap[:F] = np.asarray(Wg[:F], np.float32)     # Wa: rows multiplying x
        wbp = np.zeros((LANES, gout), np.float32)
        wbp[:F] = np.asarray(Wg[F:], np.float32)     # Wb: rows multiplying A @ x
        flat_arrays += [w1p, np.asarray(b1), np.asarray(w2), np.asarray(b2),
                        np.asarray(w3), np.asarray(b3), np.asarray(w4), np.asarray(b4),
                        np.asarray(w5t), np.asarray(b5), wap, wbp, np.asarray(bg)]
    slab, flat_layout = _pack_slab(flat_arrays)
    layouts = [flat_layout[13 * s:13 * (s + 1)] for s in range(n_stage)]

    def forward(x):
        B, N, _ = x.shape
        BN = B * N
        x_flat = jnp.pad(x.reshape(BN, F0).astype(jnp.float32),
                         ((0, 0), (0, LANES - F0)))
        fl, tr, by = _estimate_cost(B, N, w_stages, g_stages, F0, half)
        res = pl.pallas_call(
            _make_fused_kernel(B, N, F0, half, n_way, layouts),
            out_shape=jax.ShapeDtypeStruct((BN, LANES), jnp.float32),
            scratch_shapes=[pltpu.VMEM((BN, LANES), jnp.float32)],
            cost_estimate=pl.CostEstimate(flops=fl, transcendentals=tr,
                                          bytes_accessed=by),
        )(x_flat, slab)
        adjs = [res[:, s * N:(s + 1) * N].reshape(B, N, N) for s in range(n_stage)]
        out = res[:, n_stage * N:n_stage * N + n_way].reshape(B, N, n_way)[:, 0, :]
        return adjs, out

    return jax.jit(forward)


# --------------------------------------------------------------------------
# Deterministic parameter construction (shapes per module __init__)
# --------------------------------------------------------------------------

def _init_linear(key, n_in, n_out):
    k1, k2 = jax.random.split(key)
    bound = 1.0 / np.sqrt(n_in)
    W = jax.random.uniform(k1, (n_in, n_out), minval=-bound, maxval=bound, dtype=jnp.float32)
    b = jax.random.uniform(k2, (n_out,), minval=-bound, maxval=bound, dtype=jnp.float32)
    return W, b


def _init_bn(key, n):
    k1, k2 = jax.random.split(key)
    gamma = 1.0 + 0.1 * jax.random.normal(k1, (n,), dtype=jnp.float32)
    beta = 0.1 * jax.random.normal(k2, (n,), dtype=jnp.float32)
    mean = jnp.zeros((n,), jnp.float32)
    var = jnp.ones((n,), jnp.float32)
    return gamma, beta, mean, var


def _fold_bn(W, b, gamma, beta, mean, var, eps=1e-5):
    scale = gamma / jnp.sqrt(var + eps)
    return W * scale[None, :], (b - mean) * scale + beta


def make_wcompute_params(key, c_in, nf):
    # conv dims: c_in -> 2nf -> 2nf -> nf -> nf -> 1   (ratio=[2,2,1,1], num_operators=1)
    dims = [(c_in, 2 * nf), (2 * nf, 2 * nf), (2 * nf, nf), (nf, nf)]
    keys = jax.random.split(key, 9)
    params = []
    for idx, (ci, co) in enumerate(dims):
        W, b = _init_linear(keys[2 * idx], ci, co)
        g, be, m, v = _init_bn(keys[2 * idx + 1], co)
        W, b = _fold_bn(W, b, g, be, m, v)
        params += [W, b.reshape(1, co)]
    W5, b5 = _init_linear(keys[8], nf, 1)       # conv2d_last, no BN
    params += [W5.T.reshape(1, nf), b5.reshape(1, 1)]
    return params


def make_gconv_params(key, c_in, c_out, bn):
    # Gconv(nf_input=c_in, nf_output=c_out, J=2): fc in_features = 2*c_in
    k1, k2 = jax.random.split(key)
    W, b = _init_linear(k1, 2 * c_in, c_out)
    if bn:
        g, be, m, v = _init_bn(k2, c_out)
        W, b = _fold_bn(W, b, g, be, m, v)
    return W, b.reshape(1, c_out)


def build_model(key, input_features, nf, n_way, num_layers=2):
    keys = jax.random.split(key, 2 * num_layers + 2)
    w_params, l_params = [], []
    for i in range(num_layers):
        c_in = input_features + (nf // 2) * i
        w_params.append(make_wcompute_params(keys[2 * i], c_in, nf))
        l_params.append(make_gconv_params(keys[2 * i + 1], c_in, nf // 2, bn=True))
    c_last = input_features + (nf // 2) * num_layers
    w_last = make_wcompute_params(keys[-2], c_last, nf)
    l_last = make_gconv_params(keys[-1], c_last, n_way, bn=False)
    return {"num_layers": num_layers, "w": w_params, "l": l_params,
            "w_last": w_last, "l_last": l_last}


# --------------------------------------------------------------------------
# Pure-JAX reference (for correctness check)
# --------------------------------------------------------------------------

def ref_wcompute(x, params):
    w1, b1, w2, b2, w3, b3, w4, b4, w5t, b5 = params
    diff = jnp.abs(x[:, :, None, :] - x[:, None, :, :])
    h = _leaky(diff @ w1 + b1[0])
    h = _leaky(h @ w2 + b2[0])
    h = _leaky(h @ w3 + b3[0])
    h = _leaky(h @ w4 + b4[0])
    logits = jnp.sum(h * w5t[0], axis=-1) + b5[0, 0]
    N = x.shape[1]
    logits = logits - jnp.eye(N, dtype=x.dtype) * 1e8
    return jax.nn.softmax(logits, axis=-1)


def ref_gconv(adj, x, params, apply_leaky):
    W, b = params
    ax = jnp.einsum("bij,bjf->bif", adj, x)
    xcat = jnp.concatenate([x, ax], axis=-1)
    y = xcat @ W + b[0]
    return _leaky(y) if apply_leaky else y


def gnn_nl_forward_ref(x, model):
    W_all = []
    for i in range(model["num_layers"]):
        adj = ref_wcompute(x, model["w"][i])           # == Wi[:, :, :, 1]
        W_all.append(adj)
        x_new = ref_gconv(adj, x, model["l"][i], True)
        x = jnp.concatenate([x, x_new], axis=2)
    adj_last = ref_wcompute(x, model["w_last"])
    W_all.append(adj_last)
    out = ref_gconv(adj_last, x, model["l_last"], False)
    return W_all, out[:, 0, :]


# --------------------------------------------------------------------------

if __name__ == "__main__":
    key = jax.random.PRNGKey(0)
    k_x, k_m = jax.random.split(key)

    # args.train_N_way = 5, input_features = 16, nf = 32, J = 2, num_layers = 2
    B, N, F0, nf, n_way = 2, 8, 16, 32, 5
    x = jax.random.normal(k_x, (B, N, F0), dtype=jnp.float32)
    model = build_model(k_m, F0, nf, n_way)

    forward = make_forward(model)
    W_all, out = forward(x)
    out = jax.block_until_ready(out)
    W_all = [jax.block_until_ready(w) for w in W_all]

    W_ref, out_ref = gnn_nl_forward_ref(x, model)
    np.testing.assert_allclose(np.asarray(out), np.asarray(out_ref), rtol=3e-4, atol=3e-4)
    for wp, wr in zip(W_all, W_ref):
        np.testing.assert_allclose(np.asarray(wp), np.asarray(wr), rtol=3e-4, atol=3e-4)

    print("KERNEL_OK")
</pallas_src>

<mosaic_0001>
module attributes {stable_mosaic.version = 11 : i64} {
  func.func @kernel(%arg0: memref<16x128xf32, #tpu.memory_space<vmem>>, %arg1: memref<1800x128xf32, #tpu.memory_space<vmem>>, %arg2: memref<16x128xf32, #tpu.memory_space<vmem>>, %arg3: memref<16x128xf32, #tpu.memory_space<vmem>>) attributes {dimension_semantics = [], scalar_prefetch = 0 : i64, scratch_operands = 1 : i64, tpu.core_type = #tpu.core_type<tc>} {
    %c0 = arith.constant 0 : index
    %c0_0 = arith.constant 0 : index
    %0 = vector.load %arg0[%c0, %c0_0] : memref<16x128xf32, #tpu.memory_space<vmem>>, vector<16x128xf32>
    %c0_1 = arith.constant 0 : index
    %c0_2 = arith.constant 0 : index
    %1 = vector.load %arg3[%c0_1, %c0_2] : memref<16x128xf32, #tpu.memory_space<vmem>>, vector<16x128xf32>
    tpu.vector_store %arg3[%c0_1, %c0_2], %0 {strides = array<i32>} : memref<16x128xf32, #tpu.memory_space<vmem>>, vector<16x128xf32>,
    %cst = arith.constant 0.000000e+00 : f32
    %2 = vector.broadcast %cst : f32 to vector<16x128xf32>
    %c0_3 = arith.constant 0 : index
    %c0_4 = arith.constant 0 : index
    %3 = vector.load %arg2[%c0_3, %c0_4] : memref<16x128xf32, #tpu.memory_space<vmem>>, vector<16x128xf32>
    tpu.vector_store %arg2[%c0_3, %c0_4], %2 {strides = array<i32>} : memref<16x128xf32, #tpu.memory_space<vmem>>, vector<16x128xf32>,
    %4 = tpu.iota {dimensions = array<i32: 0>} : vector<16x8xi32>
    %c8_i32 = arith.constant 8 : i32
    %c0_i32 = arith.constant 0 : i32
    %5 = arith.cmpi eq, %c8_i32, %c0_i32 : i32
    %c1_i32 = arith.constant 1 : i32
    %6 = arith.select %5, %c1_i32, %c8_i32 : i32
    %7 = vector.broadcast %6 : i32 to vector<16x8xi32>
    %8 = arith.remsi %4, %7 : vector<16x8xi32>
    %c0_i32_5 = arith.constant 0 : i32
    %9 = vector.broadcast %c0_i32_5 : i32 to vector<16x8xi32>
    %10 = arith.cmpi ne, %8, %9 : vector<16x8xi32>
    %c0_i32_6 = arith.constant 0 : i32
    %11 = vector.broadcast %c0_i32_6 : i32 to vector<16x8xi32>
    %12 = arith.cmpi slt, %8, %11 : vector<16x8xi32>
    %c0_i32_7 = arith.constant 0 : i32
    %13 = arith.cmpi slt, %6, %c0_i32_7 : i32
    %14 = vector.broadcast %13 : i1 to vector<16x8xi1>
    %15 = vector.broadcast %14 : vector<16x8xi1> to vector<16x8xi1>
    %16 = arith.xori %12, %15 : vector<16x8xi1>
    %17 = arith.andi %16, %10 : vector<16x8xi1>
    %18 = vector.broadcast %6 : i32 to vector<16x8xi32>
    %19 = arith.addi %8, %18 : vector<16x8xi32>
    %20 = arith.select %17, %19, %8 : vector<16x8xi1>, vector<16x8xi32>
    %21 = tpu.iota {dimensions = array<i32: 1>} : vector<16x8xi32>
    %22 = arith.cmpi eq, %20, %21 : vector<16x8xi32>
    %c0_8 = arith.constant 0 : index
    %c0_9 = arith.constant 0 : index
    %23 = vector.load %arg1[%c0_8, %c0_9] : memref<1800x128xf32, #tpu.memory_space<vmem>>, vector<128x64xf32>
    %c128 = arith.constant 128 : index
    %c0_10 = arith.constant 0 : index
    %24 = vector.load %arg1[%c128, %c0_10] : memref<1800x128xf32, #tpu.memory_space<vmem>>, vector<1x64xf32>
    %c136 = arith.constant 136 : index
    %c0_11 = arith.constant 0 : index
    %25 = vector.load %arg1[%c136, %c0_11] : memref<1800x128xf32, #tpu.memory_space<vmem>>, vector<64x64xf32>
    %c200 = arith.constant 200 : index
    %c0_12 = arith.constant 0 : index
    %26 = vector.load %arg1[%c200, %c0_12] : memref<1800x128xf32, #tpu.memory_space<vmem>>, vector<1x64xf32>
    %c208 = arith.constant 208 : index
    %c0_13 = arith.constant 0 : index
    %27 = vector.load %arg1[%c208, %c0_13] : memref<1800x128xf32, #tpu.memory_space<vmem>>, vector<64x32xf32>
    %c272 = arith.constant 272 : index
    %c0_14 = arith.constant 0 : index
    %28 = vector.load %arg1[%c272, %c0_14] : memref<1800x128xf32, #tpu.memory_space<vmem>>, vector<1x32xf32>
    %c280 = arith.constant 280 : index
    %c0_15 = arith.constant 0 : index
    %29 = vector.load %arg1[%c280, %c0_15] : memref<1800x128xf32, #tpu.memory_space<vmem>>, vector<32x32xf32>
    %c312 = arith.constant 312 : index
    %c0_16 = arith.constant 0 : index
    %30 = vector.load %arg1[%c312, %c0_16] : memref<1800x128xf32, #tpu.memory_space<vmem>>, vector<1x32xf32>
    %c320 = arith.constant 320 : index
    %c0_17 = arith.constant 0 : index
    %31 = vector.load %arg1[%c320, %c0_17] : memref<1800x128xf32, #tpu.memory_space<vmem>>, vector<1x32xf32>
    %c328 = arith.constant 328 : index
    %c0_18 = arith.constant 0 : index
    %32 = vector.load %arg1[%c328, %c0_18] : memref<1800x128xf32, #tpu.memory_space<vmem>>, vector<1x1xf32>
    %c336 = arith.constant 336 : index
    %c0_19 = arith.constant 0 : index
    %33 = vector.load %arg1[%c336, %c0_19] : memref<1800x128xf32, #tpu.memory_space<vmem>>, vector<128x16xf32>
    %c464 = arith.constant 464 : index
    %c0_20 = arith.constant 0 : index
    %34 = vector.load %arg1[%c464, %c0_20] : memref<1800x128xf32, #tpu.memory_space<vmem>>, vector<128x16xf32>
    %c592 = arith.constant 592 : index
    %c0_21 = arith.constant 0 : index
    %35 = vector.load %arg1[%c592, %c0_21] : memref<1800x128xf32, #tpu.memory_space<vmem>>, vector<1x16xf32>
    %c0_22 = arith.constant 0 : index
    %c0_23 = arith.constant 0 : index
    %36 = vector.load %arg3[%c0_22, %c0_23] : memref<16x128xf32, #tpu.memory_space<vmem>>, vector<16x128xf32>
    %37 = vector.shape_cast %36 : vector<16x128xf32> to vector<2x8x128xf32>
    %38 = vector.shape_cast %37 : vector<2x8x128xf32> to vector<2x8x1x128xf32>
    %39 = vector.shape_cast %37 : vector<2x8x128xf32> to vector<2x1x8x128xf32>
    %40 = vector.broadcast %38 : vector<2x8x1x128xf32> to vector<2x8x8x128xf32>
    %41 = vector.broadcast %39 : vector<2x1x8x128xf32> to vector<2x8x8x128xf32>
    %42 = arith.subf %40, %41 : vector<2x8x8x128xf32>
    %43 = math.absf %42 : vector<2x8x8x128xf32>
    %44 = vector.shape_cast %43 : vector<2x8x8x128xf32> to vector<128x128xf32>
    %cst_24 = arith.constant dense<0.000000e+00> : vector<128x64xf32>
    %45 = tpu.matmul %44, %23, %cst_24 {dimension_numbers = #tpu.dot_dimension_numbers<[1], [0], [0], [1], [0, 0, 1, 1], [], []>} : vector<128x128xf32>, vector<128x64xf32>, vector<128x64xf32> -> vector<128x64xf32>
    %46 = vector.broadcast %24 : vector<1x64xf32> to vector<128x64xf32>
    %47 = arith.addf %45, %46 : vector<128x64xf32>
    %cst_25 = arith.constant 0.000000e+00 : f32
    %48 = vector.broadcast %cst_25 : f32 to vector<128x64xf32>
    %49 = arith.cmpf ogt, %47, %48 : vector<128x64xf32>
    %cst_26 = arith.constant 0.00999999977 : f32
    %50 = vector.broadcast %cst_26 : f32 to vector<128x64xf32>
    %51 = arith.mulf %50, %47 : vector<128x64xf32>
    %52 = arith.select %49, %47, %51 : vector<128x64xi1>, vector<128x64xf32>
    %cst_27 = arith.constant dense<0.000000e+00> : vector<128x64xf32>
    %53 = tpu.matmul %52, %25, %cst_27 {dimension_numbers = #tpu.dot_dimension_numbers<[1], [0], [0], [1], [0, 0, 1, 1], [], []>} : vector<128x64xf32>, vector<64x64xf32>, vector<128x64xf32> -> vector<128x64xf32>
    %54 = vector.broadcast %26 : vector<1x64xf32> to vector<128x64xf32>
    %55 = arith.addf %53, %54 : vector<128x64xf32>
    %cst_28 = arith.constant 0.000000e+00 : f32
    %56 = vector.broadcast %cst_28 : f32 to vector<128x64xf32>
    %57 = arith.cmpf ogt, %55, %56 : vector<128x64xf32>
    %cst_29 = arith.constant 0.00999999977 : f32
    %58 = vector.broadcast %cst_29 : f32 to vector<128x64xf32>
    %59 = arith.mulf %58, %55 : vector<128x64xf32>
    %60 = arith.select %57, %55, %59 : vector<128x64xi1>, vector<128x64xf32>
    %cst_30 = arith.constant dense<0.000000e+00> : vector<128x32xf32>
    %61 = tpu.matmul %60, %27, %cst_30 {dimension_numbers = #tpu.dot_dimension_numbers<[1], [0], [0], [1], [0, 0, 1, 1], [], []>} : vector<128x64xf32>, vector<64x32xf32>, vector<128x32xf32> -> vector<128x32xf32>
    %62 = vector.broadcast %28 : vector<1x32xf32> to vector<128x32xf32>
    %63 = arith.addf %61, %62 : vector<128x32xf32>
    %cst_31 = arith.constant 0.000000e+00 : f32
    %64 = vector.broadcast %cst_31 : f32 to vector<128x32xf32>
    %65 = arith.cmpf ogt, %63, %64 : vector<128x32xf32>
    %cst_32 = arith.constant 0.00999999977 : f32
    %66 = vector.broadcast %cst_32 : f32 to vector<128x32xf32>
    %67 = arith.mulf %66, %63 : vector<128x32xf32>
    %68 = arith.select %65, %63, %67 : vector<128x32xi1>, vector<128x32xf32>
    %cst_33 = arith.constant dense<0.000000e+00> : vector<128x32xf32>
    %69 = tpu.matmul %68, %29, %cst_33 {dimension_numbers = #tpu.dot_dimension_numbers<[1], [0], [0], [1], [0, 0, 1, 1], [], []>} : vector<128x32xf32>, vector<32x32xf32>, vector<128x32xf32> -> vector<128x32xf32>
    %70 = vector.broadcast %30 : vector<1x32xf32> to vector<128x32xf32>
    %71 = arith.addf %69, %70 : vector<128x32xf32>
    %cst_34 = arith.constant 0.000000e+00 : f32
    %72 = vector.broadcast %cst_34 : f32 to vector<128x32xf32>
    %73 = arith.cmpf ogt, %71, %72 : vector<128x32xf32>
    %cst_35 = arith.constant 0.00999999977 : f32
    %74 = vector.broadcast %cst_35 : f32 to vector<128x32xf32>
    %75 = arith.mulf %74, %71 : vector<128x32xf32>
    %76 = arith.select %73, %71, %75 : vector<128x32xi1>, vector<128x32xf32>
    %77 = vector.shape_cast %76 : vector<128x32xf32> to vector<16x8x32xf32>
    %78 = vector.shape_cast %31 : vector<1x32xf32> to vector<1x1x32xf32>
    %79 = vector.broadcast %78 : vector<1x1x32xf32> to vector<16x8x32xf32>
    %80 = arith.mulf %77, %79 : vector<16x8x32xf32>
    %cst_36 = arith.constant dense<0.000000e+00> : vector<16x8xf32>
    %81 = vector.multi_reduction <add>, %80, %cst_36 [2] : vector<16x8x32xf32> to vector<16x8xf32>
    %82 = vector.broadcast %32 : vector<1x1xf32> to vector<16x8xf32>
    %83 = arith.addf %81, %82 : vector<16x8xf32>
    %cst_37 = arith.constant 1.000000e+08 : f32
    %84 = vector.broadcast %cst_37 : f32 to vector<16x8xf32>
    %85 = arith.subf %83, %84 : vector<16x8xf32>
    %86 = arith.select %22, %85, %83 : vector<16x8xi1>, vector<16x8xf32>
    %cst_38 = arith.constant dense<0xFF800000> : vector<16xf32>
    %87 = vector.multi_reduction <maximumf>, %86, %cst_38 [1] : vector<16x8xf32> to vector<16xf32>
    %88 = vector.shape_cast %87 : vector<16xf32> to vector<16x1xf32>
    %89 = vector.broadcast %88 : vector<16x1xf32> to vector<16x8xf32>
    %90 = arith.subf %86, %89 : vector<16x8xf32>
    %91 = math.exp %90 : vector<16x8xf32>
    %cst_39 = arith.constant dense<0.000000e+00> : vector<16xf32>
    %92 = vector.multi_reduction <add>, %91, %cst_39 [1] : vector<16x8xf32> to vector<16xf32>
    %93 = vector.shape_cast %92 : vector<16xf32> to vector<16x1xf32>
    %94 = tpu.reciprocal %93 {approx = true} : vector<16x1xf32> -> vector<16x1xf32>
    %95 = arith.mulf %93, %94 : vector<16x1xf32>
    %cst_40 = arith.constant 2.000000e+00 : f32
    %96 = vector.broadcast %cst_40 : f32 to vector<16x1xf32>
    %97 = arith.subf %96, %95 : vector<16x1xf32>
    %98 = arith.mulf %94, %97 : vector<16x1xf32>
    %99 = vector.broadcast %98 : vector<16x1xf32> to vector<16x8xf32>
    %100 = arith.mulf %91, %99 : vector<16x8xf32>
    %c0_41 = arith.constant 0 : index
    %c0_42 = arith.constant 0 : index
    %101 = vector.load %arg2[%c0_41, %c0_42] : memref<16x128xf32, #tpu.memory_space<vmem>>, vector<16x8xf32>
    tpu.vector_store %arg2[%c0_41, %c0_42], %100 {strides = array<i32>} : memref<16x128xf32, #tpu.memory_space<vmem>>, vector<16x8xf32>,
    %102 = vector.shape_cast %100 : vector<16x8xf32> to vector<2x8x8xf32>
    "tpu.trace_start"() <{level = 10 : i32, message = "bij,bjf->bif"}> : () -> ()
    %cst_43 = arith.constant dense<0.000000e+00> : vector<2x8x128xf32>
    %103 = tpu.matmul %102, %37, %cst_43 {dimension_numbers = #tpu.dot_dimension_numbers<[2], [1], [1], [2], [0, 0, 0, 1, 1, 2], [0], [0]>} : vector<2x8x8xf32>, vector<2x8x128xf32>, vector<2x8x128xf32> -> vector<2x8x128xf32>
    "tpu.trace_stop"() : () -> ()
    %104 = vector.shape_cast %103 : vector<2x8x128xf32> to vector<16x128xf32>
    %cst_44 = arith.constant dense<0.000000e+00> : vector<16x16xf32>
    %105 = tpu.matmul %36, %33, %cst_44 {dimension_numbers = #tpu.dot_dimension_numbers<[1], [0], [0], [1], [0, 0, 1, 1], [], []>} : vector<16x128xf32>, vector<128x16xf32>, vector<16x16xf32> -> vector<16x16xf32>
    %cst_45 = arith.constant dense<0.000000e+00> : vector<16x16xf32>
    %106 = tpu.matmul %104, %34, %cst_45 {dimension_numbers = #tpu.dot_dimension_numbers<[1], [0], [0], [1], [0, 0, 1, 1], [], []>} : vector<16x128xf32>, vector<128x16xf32>, vector<16x16xf32> -> vector<16x16xf32>
    %107 = arith.addf %105, %106 : vector<16x16xf32>
    %108 = vector.broadcast %35 : vector<1x16xf32> to vector<16x16xf32>
    %109 = arith.addf %107, %108 : vector<16x16xf32>
    %cst_46 = arith.constant 0.000000e+00 : f32
    %110 = vector.broadcast %cst_46 : f32 to vector<16x16xf32>
    %111 = arith.cmpf ogt, %109, %110 : vector<16x16xf32>
    %cst_47 = arith.constant 0.00999999977 : f32
    %112 = vector.broadcast %cst_47 : f32 to vector<16x16xf32>
    %113 = arith.mulf %112, %109 : vector<16x16xf32>
    %114 = arith.select %111, %109, %113 : vector<16x16xi1>, vector<16x16xf32>
    %c0_48 = arith.constant 0 : index
    %c16 = arith.constant 16 : index
    %115 = vector.load %arg3[%c0_48, %c16] : memref<16x128xf32, #tpu.memory_space<vmem>>, vector<16x16xf32>
    tpu.vector_store %arg3[%c0_48, %c16], %114 {strides = array<i32>} : memref<16x128xf32, #tpu.memory_space<vmem>>, vector<16x16xf32>,
    %c600 = arith.constant 600 : index
    %c0_49 = arith.constant 0 : index
    %116 = vector.load %arg1[%c600, %c0_49] : memref<1800x128xf32, #tpu.memory_space<vmem>>, vector<128x64xf32>
    %c728 = arith.constant 728 : index
    %c0_50 = arith.constant 0 : index
    %117 = vector.load %arg1[%c728, %c0_50] : memref<1800x128xf32, #tpu.memory_space<vmem>>, vector<1x64xf32>
    %c736 = arith.constant 736 : index
    %c0_51 = arith.constant 0 : index
    %118 = vector.load %arg1[%c736, %c0_51] : memref<1800x128xf32, #tpu.memory_space<vmem>>, vector<64x64xf32>
    %c800 = arith.constant 800 : index
    %c0_52 = arith.constant 0 : index
    %119 = vector.load %arg1[%c800, %c0_52] : memref<1800x128xf32, #tpu.memory_space<vmem>>, vector<1x64xf32>
    %c808 = arith.constant 808 : index
    %c0_53 = arith.constant 0 : index
    %120 = vector.load %arg1[%c808, %c0_53] : memref<1800x128xf32, #tpu.memory_space<vmem>>, vector<64x32xf32>
    %c872 = arith.constant 872 : index
    %c0_54 = arith.constant 0 : index
    %121 = vector.load %arg1[%c872, %c0_54] : memref<1800x128xf32, #tpu.memory_space<vmem>>, vector<1x32xf32>
    %c880 = arith.constant 880 : index
    %c0_55 = arith.constant 0 : index
    %122 = vector.load %arg1[%c880, %c0_55] : memref<1800x128xf32, #tpu.memory_space<vmem>>, vector<32x32xf32>
    %c912 = arith.constant 912 : index
    %c0_56 = arith.constant 0 : index
    %123 = vector.load %arg1[%c912, %c0_56] : memref<1800x128xf32, #tpu.memory_space<vmem>>, vector<1x32xf32>
    %c920 = arith.constant 920 : index
    %c0_57 = arith.constant 0 : index
    %124 = vector.load %arg1[%c920, %c0_57] : memref<1800x128xf32, #tpu.memory_space<vmem>>, vector<1x32xf32>
    %c928 = arith.constant 928 : index
    %c0_58 = arith.constant 0 : index
    %125 = vector.load %arg1[%c928, %c0_58] : memref<1800x128xf32, #tpu.memory_space<vmem>>, vector<1x1xf32>
    %c936 = arith.constant 936 : index
    %c0_59 = arith.constant 0 : index
    %126 = vector.load %arg1[%c936, %c0_59] : memref<1800x128xf32, #tpu.memory_space<vmem>>, vector<128x16xf32>
    %c1064 = arith.constant 1064 : index
    %c0_60 = arith.constant 0 : index
    %127 = vector.load %arg1[%c1064, %c0_60] : memref<1800x128xf32, #tpu.memory_space<vmem>>, vector<128x16xf32>
    %c1192 = arith.constant 1192 : index
    %c0_61 = arith.constant 0 : index
    %128 = vector.load %arg1[%c1192, %c0_61] : memref<1800x128xf32, #tpu.memory_space<vmem>>, vector<1x16xf32>
    %c0_62 = arith.constant 0 : index
    %c0_63 = arith.constant 0 : index
    %129 = vector.load %arg3[%c0_62, %c0_63] : memref<16x128xf32, #tpu.memory_space<vmem>>, vector<16x128xf32>
    %130 = vector.shape_cast %129 : vector<16x128xf32> to vector<2x8x128xf32>
    %131 = vector.shape_cast %130 : vector<2x8x128xf32> to vector<2x8x1x128xf32>
    %132 = vector.shape_cast %130 : vector<2x8x128xf32> to vector<2x1x8x128xf32>
    %133 = vector.broadcast %131 : vector<2x8x1x128xf32> to vector<2x8x8x128xf32>
    %134 = vector.broadcast %132 : vector<2x1x8x128xf32> to vector<2x8x8x128xf32>
    %135 = arith.subf %133, %134 : vector<2x8x8x128xf32>
    %136 = math.absf %135 : vector<2x8x8x128xf32>
    %137 = vector.shape_cast %136 : vector<2x8x8x128xf32> to vector<128x128xf32>
    %cst_64 = arith.constant dense<0.000000e+00> : vector<128x64xf32>
    %138 = tpu.matmul %137, %116, %cst_64 {dimension_numbers = #tpu.dot_dimension_numbers<[1], [0], [0], [1], [0, 0, 1, 1], [], []>} : vector<128x128xf32>, vector<128x64xf32>, vector<128x64xf32> -> vector<128x64xf32>
    %139 = vector.broadcast %117 : vector<1x64xf32> to vector<128x64xf32>
    %140 = arith.addf %138, %139 : vector<128x64xf32>
    %cst_65 = arith.constant 0.000000e+00 : f32
    %141 = vector.broadcast %cst_65 : f32 to vector<128x64xf32>
    %142 = arith.cmpf ogt, %140, %141 : vector<128x64xf32>
    %cst_66 = arith.constant 0.00999999977 : f32
    %143 = vector.broadcast %cst_66 : f32 to vector<128x64xf32>
    %144 = arith.mulf %143, %140 : vector<128x64xf32>
    %145 = arith.select %142, %140, %144 : vector<128x64xi1>, vector<128x64xf32>
    %cst_67 = arith.constant dense<0.000000e+00> : vector<128x64xf32>
    %146 = tpu.matmul %145, %118, %cst_67 {dimension_numbers = #tpu.dot_dimension_numbers<[1], [0], [0], [1], [0, 0, 1, 1], [], []>} : vector<128x64xf32>, vector<64x64xf32>, vector<128x64xf32> -> vector<128x64xf32>
    %147 = vector.broadcast %119 : vector<1x64xf32> to vector<128x64xf32>
    %148 = arith.addf %146, %147 : vector<128x64xf32>
    %cst_68 = arith.constant 0.000000e+00 : f32
    %149 = vector.broadcast %cst_68 : f32 to vector<128x64xf32>
    %150 = arith.cmpf ogt, %148, %149 : vector<128x64xf32>
    %cst_69 = arith.constant 0.00999999977 : f32
    %151 = vector.broadcast %cst_69 : f32 to vector<128x64xf32>
    %152 = arith.mulf %151, %148 : vector<128x64xf32>
    %153 = arith.select %150, %148, %152 : vector<128x64xi1>, vector<128x64xf32>
    %cst_70 = arith.constant dense<0.000000e+00> : vector<128x32xf32>
    %154 = tpu.matmul %153, %120, %cst_70 {dimension_numbers = #tpu.dot_dimension_numbers<[1], [0], [0], [1], [0, 0, 1, 1], [], []>} : vector<128x64xf32>, vector<64x32xf32>, vector<128x32xf32> -> vector<128x32xf32>
    %155 = vector.broadcast %121 : vector<1x32xf32> to vector<128x32xf32>
    %156 = arith.addf %154, %155 : vector<128x32xf32>
    %cst_71 = arith.constant 0.000000e+00 : f32
    %157 = vector.broadcast %cst_71 : f32 to vector<128x32xf32>
    %158 = arith.cmpf ogt, %156, %157 : vector<128x32xf32>
    %cst_72 = arith.constant 0.00999999977 : f32
    %159 = vector.broadcast %cst_72 : f32 to vector<128x32xf32>
    %160 = arith.mulf %159, %156 : vector<128x32xf32>
    %161 = arith.select %158, %156, %160 : vector<128x32xi1>, vector<128x32xf32>
    %cst_73 = arith.constant dense<0.000000e+00> : vector<128x32xf32>
    %162 = tpu.matmul %161, %122, %cst_73 {dimension_numbers = #tpu.dot_dimension_numbers<[1], [0], [0], [1], [0, 0, 1, 1], [], []>} : vector<128x32xf32>, vector<32x32xf32>, vector<128x32xf32> -> vector<128x32xf32>
    %163 = vector.broadcast %123 : vector<1x32xf32> to vector<128x32xf32>
    %164 = arith.addf %162, %163 : vector<128x32xf32>
    %cst_74 = arith.constant 0.000000e+00 : f32
    %165 = vector.broadcast %cst_74 : f32 to vector<128x32xf32>
    %166 = arith.cmpf ogt, %164, %165 : vector<128x32xf32>
    %cst_75 = arith.constant 0.00999999977 : f32
    %167 = vector.broadcast %cst_75 : f32 to vector<128x32xf32>
    %168 = arith.mulf %167, %164 : vector<128x32xf32>
    %169 = arith.select %166, %164, %168 : vector<128x32xi1>, vector<128x32xf32>
    %170 = vector.shape_cast %169 : vector<128x32xf32> to vector<16x8x32xf32>
    %171 = vector.shape_cast %124 : vector<1x32xf32> to vector<1x1x32xf32>
    %172 = vector.broadcast %171 : vector<1x1x32xf32> to vector<16x8x32xf32>
    %173 = arith.mulf %170, %172 : vector<16x8x32xf32>
    %cst_76 = arith.constant dense<0.000000e+00> : vector<16x8xf32>
    %174 = vector.multi_reduction <add>, %173, %cst_76 [2] : vector<16x8x32xf32> to vector<16x8xf32>
    %175 = vector.broadcast %125 : vector<1x1xf32> to vector<16x8xf32>
    %176 = arith.addf %174, %175 : vector<16x8xf32>
    %cst_77 = arith.constant 1.000000e+08 : f32
    %177 = vector.broadcast %cst_77 : f32 to vector<16x8xf32>
    %178 = arith.subf %176, %177 : vector<16x8xf32>
    %179 = arith.select %22, %178, %176 : vector<16x8xi1>, vector<16x8xf32>
    %cst_78 = arith.constant dense<0xFF800000> : vector<16xf32>
    %180 = vector.multi_reduction <maximumf>, %179, %cst_78 [1] : vector<16x8xf32> to vector<16xf32>
    %181 = vector.shape_cast %180 : vector<16xf32> to vector<16x1xf32>
    %182 = vector.broadcast %181 : vector<16x1xf32> to vector<16x8xf32>
    %183 = arith.subf %179, %182 : vector<16x8xf32>
    %184 = math.exp %183 : vector<16x8xf32>
    %cst_79 = arith.constant dense<0.000000e+00> : vector<16xf32>
    %185 = vector.multi_reduction <add>, %184, %cst_79 [1] : vector<16x8xf32> to vector<16xf32>
    %186 = vector.shape_cast %185 : vector<16xf32> to vector<16x1xf32>
    %187 = tpu.reciprocal %186 {approx = true} : vector<16x1xf32> -> vector<16x1xf32>
    %188 = arith.mulf %186, %187 : vector<16x1xf32>
    %cst_80 = arith.constant 2.000000e+00 : f32
    %189 = vector.broadcast %cst_80 : f32 to vector<16x1xf32>
    %190 = arith.subf %189, %188 : vector<16x1xf32>
    %191 = arith.mulf %187, %190 : vector<16x1xf32>
    %192 = vector.broadcast %191 : vector<16x1xf32> to vector<16x8xf32>
    %193 = arith.mulf %184, %192 : vector<16x8xf32>
    %c0_81 = arith.constant 0 : index
    %c8 = arith.constant 8 : index
    %194 = vector.load %arg2[%c0_81, %c8] : memref<16x128xf32, #tpu.memory_space<vmem>>, vector<16x8xf32>
    tpu.vector_store %arg2[%c0_81, %c8], %193 {strides = array<i32>} : memref<16x128xf32, #tpu.memory_space<vmem>>, vector<16x8xf32>,
    %195 = vector.shape_cast %193 : vector<16x8xf32> to vector<2x8x8xf32>
    "tpu.trace_start"() <{level = 10 : i32, message = "bij,bjf->bif"}> : () -> ()
    %cst_82 = arith.constant dense<0.000000e+00> : vector<2x8x128xf32>
    %196 = tpu.matmul %195, %130, %cst_82 {dimension_numbers = #tpu.dot_dimension_numbers<[2], [1], [1], [2], [0, 0, 0, 1, 1, 2], [0], [0]>} : vector<2x8x8xf32>, vector<2x8x128xf32>, vector<2x8x128xf32> -> vector<2x8x128xf32>
    "tpu.trace_stop"() : () -> ()
    %197 = vector.shape_cast %196 : vector<2x8x128xf32> to vector<16x128xf32>
    %cst_83 = arith.constant dense<0.000000e+00> : vector<16x16xf32>
    %198 = tpu.matmul %129, %126, %cst_83 {dimension_numbers = #tpu.dot_dimension_numbers<[1], [0], [0], [1], [0, 0, 1, 1], [], []>} : vector<16x128xf32>, vector<128x16xf32>, vector<16x16xf32> -> vector<16x16xf32>
    %cst_84 = arith.constant dense<0.000000e+00> : vector<16x16xf32>
    %199 = tpu.matmul %197, %127, %cst_84 {dimension_numbers = #tpu.dot_dimension_numbers<[1], [0], [0], [1], [0, 0, 1, 1], [], []>} : vector<16x128xf32>, vector<128x16xf32>, vector<16x16xf32> -> vector<16x16xf32>
    %200 = arith.addf %198, %199 : vector<16x16xf32>
    %201 = vector.broadcast %128 : vector<1x16xf32> to vector<16x16xf32>
    %202 = arith.addf %200, %201 : vector<16x16xf32>
    %cst_85 = arith.constant 0.000000e+00 : f32
    %203 = vector.broadcast %cst_85 : f32 to vector<16x16xf32>
    %204 = arith.cmpf ogt, %202, %203 : vector<16x16xf32>
    %cst_86 = arith.constant 0.00999999977 : f32
    %205 = vector.broadcast %cst_86 : f32 to vector<16x16xf32>
    %206 = arith.mulf %205, %202 : vector<16x16xf32>
    %207 = arith.select %204, %202, %206 : vector<16x16xi1>, vector<16x16xf32>
    %c0_87 = arith.constant 0 : index
    %c32 = arith.constant 32 : index
    %208 = vector.load %arg3[%c0_87, %c32] : memref<16x128xf32, #tpu.memory_space<vmem>>, vector<16x16xf32>
    tpu.vector_store %arg3[%c0_87, %c32], %207 {strides = array<i32>} : memref<16x128xf32, #tpu.memory_space<vmem>>, vector<16x16xf32>,
    %c1200 = arith.constant 1200 : index
    %c0_88 = arith.constant 0 : index
    %209 = vector.load %arg1[%c1200, %c0_88] : memref<1800x128xf32, #tpu.memory_space<vmem>>, vector<128x64xf32>
    %c1328 = arith.constant 1328 : index
    %c0_89 = arith.constant 0 : index
    %210 = vector.load %arg1[%c1328, %c0_89] : memref<1800x128xf32, #tpu.memory_space<vmem>>, vector<1x64xf32>
    %c1336 = arith.constant 1336 : index
    %c0_90 = arith.constant 0 : index
    %211 = vector.load %arg1[%c1336, %c0_90] : memref<1800x128xf32, #tpu.memory_space<vmem>>, vector<64x64xf32>
    %c1400 = arith.constant 1400 : index
    %c0_91 = arith.constant 0 : index
    %212 = vector.load %arg1[%c1400, %c0_91] : memref<1800x128xf32, #tpu.memory_space<vmem>>, vector<1x64xf32>
    %c1408 = arith.constant 1408 : index
    %c0_92 = arith.constant 0 : index
    %213 = vector.load %arg1[%c1408, %c0_92] : memref<1800x128xf32, #tpu.memory_space<vmem>>, vector<64x32xf32>
    %c1472 = arith.constant 1472 : index
    %c0_93 = arith.constant 0 : index
    %214 = vector.load %arg1[%c1472, %c0_93] : memref<1800x128xf32, #tpu.memory_space<vmem>>, vector<1x32xf32>
    %c1480 = arith.constant 1480 : index
    %c0_94 = arith.constant 0 : index
    %215 = vector.load %arg1[%c1480, %c0_94] : memref<1800x128xf32, #tpu.memory_space<vmem>>, vector<32x32xf32>
    %c1512 = arith.constant 1512 : index
    %c0_95 = arith.constant 0 : index
    %216 = vector.load %arg1[%c1512, %c0_95] : memref<1800x128xf32, #tpu.memory_space<vmem>>, vector<1x32xf32>
    %c1520 = arith.constant 1520 : index
    %c0_96 = arith.constant 0 : index
    %217 = vector.load %arg1[%c1520, %c0_96] : memref<1800x128xf32, #tpu.memory_space<vmem>>, vector<1x32xf32>
    %c1528 = arith.constant 1528 : index
    %c0_97 = arith.constant 0 : index
    %218 = vector.load %arg1[%c1528, %c0_97] : memref<1800x128xf32, #tpu.memory_space<vmem>>, vector<1x1xf32>
    %c1536 = arith.constant 1536 : index
    %c0_98 = arith.constant 0 : index
    %219 = vector.load %arg1[%c1536, %c0_98] : memref<1800x128xf32, #tpu.memory_space<vmem>>, vector<128x5xf32>
    %c1664 = arith.constant 1664 : index
    %c0_99 = arith.constant 0 : index
    %220 = vector.load %arg1[%c1664, %c0_99] : memref<1800x128xf32, #tpu.memory_space<vmem>>, vector<128x5xf32>
    %c1792 = arith.constant 1792 : index
    %c0_100 = arith.constant 0 : index
    %221 = vector.load %arg1[%c1792, %c0_100] : memref<1800x128xf32, #tpu.memory_space<vmem>>, vector<1x5xf32>
    %c0_101 = arith.constant 0 : index
    %c0_102 = arith.constant 0 : index
    %222 = vector.load %arg3[%c0_101, %c0_102] : memref<16x128xf32, #tpu.memory_space<vmem>>, vector<16x128xf32>
    %223 = vector.shape_cast %222 : vector<16x128xf32> to vector<2x8x128xf32>
    %224 = vector.shape_cast %223 : vector<2x8x128xf32> to vector<2x8x1x128xf32>
    %225 = vector.shape_cast %223 : vector<2x8x128xf32> to vector<2x1x8x128xf32>
    %226 = vector.broadcast %224 : vector<2x8x1x128xf32> to vector<2x8x8x128xf32>
    %227 = vector.broadcast %225 : vector<2x1x8x128xf32> to vector<2x8x8x128xf32>
    %228 = arith.subf %226, %227 : vector<2x8x8x128xf32>
    %229 = math.absf %228 : vector<2x8x8x128xf32>
    %230 = vector.shape_cast %229 : vector<2x8x8x128xf32> to vector<128x128xf32>
    %cst_103 = arith.constant dense<0.000000e+00> : vector<128x64xf32>
    %231 = tpu.matmul %230, %209, %cst_103 {dimension_numbers = #tpu.dot_dimension_numbers<[1], [0], [0], [1], [0, 0, 1, 1], [], []>} : vector<128x128xf32>, vector<128x64xf32>, vector<128x64xf32> -> vector<128x64xf32>
    %232 = vector.broadcast %210 : vector<1x64xf32> to vector<128x64xf32>
    %233 = arith.addf %231, %232 : vector<128x64xf32>
    %cst_104 = arith.constant 0.000000e+00 : f32
    %234 = vector.broadcast %cst_104 : f32 to vector<128x64xf32>
    %235 = arith.cmpf ogt, %233, %234 : vector<128x64xf32>
    %cst_105 = arith.constant 0.00999999977 : f32
    %236 = vector.broadcast %cst_105 : f32 to vector<128x64xf32>
    %237 = arith.mulf %236, %233 : vector<128x64xf32>
    %238 = arith.select %235, %233, %237 : vector<128x64xi1>, vector<128x64xf32>
    %cst_106 = arith.constant dense<0.000000e+00> : vector<128x64xf32>
    %239 = tpu.matmul %238, %211, %cst_106 {dimension_numbers = #tpu.dot_dimension_numbers<[1], [0], [0], [1], [0, 0, 1, 1], [], []>} : vector<128x64xf32>, vector<64x64xf32>, vector<128x64xf32> -> vector<128x64xf32>
    %240 = vector.broadcast %212 : vector<1x64xf32> to vector<128x64xf32>
    %241 = arith.addf %239, %240 : vector<128x64xf32>
    %cst_107 = arith.constant 0.000000e+00 : f32
    %242 = vector.broadcast %cst_107 : f32 to vector<128x64xf32>
    %243 = arith.cmpf ogt, %241, %242 : vector<128x64xf32>
    %cst_108 = arith.constant 0.00999999977 : f32
    %244 = vector.broadcast %cst_108 : f32 to vector<128x64xf32>
    %245 = arith.mulf %244, %241 : vector<128x64xf32>
    %246 = arith.select %243, %241, %245 : vector<128x64xi1>, vector<128x64xf32>
    %cst_109 = arith.constant dense<0.000000e+00> : vector<128x32xf32>
    %247 = tpu.matmul %246, %213, %cst_109 {dimension_numbers = #tpu.dot_dimension_numbers<[1], [0], [0], [1], [0, 0, 1, 1], [], []>} : vector<128x64xf32>, vector<64x32xf32>, vector<128x32xf32> -> vector<128x32xf32>
    %248 = vector.broadcast %214 : vector<1x32xf32> to vector<128x32xf32>
    %249 = arith.addf %247, %248 : vector<128x32xf32>
    %cst_110 = arith.constant 0.000000e+00 : f32
    %250 = vector.broadcast %cst_110 : f32 to vector<128x32xf32>
    %251 = arith.cmpf ogt, %249, %250 : vector<128x32xf32>
    %cst_111 = arith.constant 0.00999999977 : f32
    %252 = vector.broadcast %cst_111 : f32 to vector<128x32xf32>
    %253 = arith.mulf %252, %249 : vector<128x32xf32>
    %254 = arith.select %251, %249, %253 : vector<128x32xi1>, vector<128x32xf32>
    %cst_112 = arith.constant dense<0.000000e+00> : vector<128x32xf32>
    %255 = tpu.matmul %254, %215, %cst_112 {dimension_numbers = #tpu.dot_dimension_numbers<[1], [0], [0], [1], [0, 0, 1, 1], [], []>} : vector<128x32xf32>, vector<32x32xf32>, vector<128x32xf32> -> vector<128x32xf32>
    %256 = vector.broadcast %216 : vector<1x32xf32> to vector<128x32xf32>
    %257 = arith.addf %255, %256 : vector<128x32xf32>
    %cst_113 = arith.constant 0.000000e+00 : f32
    %258 = vector.broadcast %cst_113 : f32 to vector<128x32xf32>
    %259 = arith.cmpf ogt, %257, %258 : vector<128x32xf32>
    %cst_114 = arith.constant 0.00999999977 : f32
    %260 = vector.broadcast %cst_114 : f32 to vector<128x32xf32>
    %261 = arith.mulf %260, %257 : vector<128x32xf32>
    %262 = arith.select %259, %257, %261 : vector<128x32xi1>, vector<128x32xf32>
    %263 = vector.shape_cast %262 : vector<128x32xf32> to vector<16x8x32xf32>
    %264 = vector.shape_cast %217 : vector<1x32xf32> to vector<1x1x32xf32>
    %265 = vector.broadcast %264 : vector<1x1x32xf32> to vector<16x8x32xf32>
    %266 = arith.mulf %263, %265 : vector<16x8x32xf32>
    %cst_115 = arith.constant dense<0.000000e+00> : vector<16x8xf32>
    %267 = vector.multi_reduction <add>, %266, %cst_115 [2] : vector<16x8x32xf32> to vector<16x8xf32>
    %268 = vector.broadcast %218 : vector<1x1xf32> to vector<16x8xf32>
    %269 = arith.addf %267, %268 : vector<16x8xf32>
    %cst_116 = arith.constant 1.000000e+08 : f32
    %270 = vector.broadcast %cst_116 : f32 to vector<16x8xf32>
    %271 = arith.subf %269, %270 : vector<16x8xf32>
    %272 = arith.select %22, %271, %269 : vector<16x8xi1>, vector<16x8xf32>
    %cst_117 = arith.constant dense<0xFF800000> : vector<16xf32>
    %273 = vector.multi_reduction <maximumf>, %272, %cst_117 [1] : vector<16x8xf32> to vector<16xf32>
    %274 = vector.shape_cast %273 : vector<16xf32> to vector<16x1xf32>
    %275 = vector.broadcast %274 : vector<16x1xf32> to vector<16x8xf32>
    %276 = arith.subf %272, %275 : vector<16x8xf32>
    %277 = math.exp %276 : vector<16x8xf32>
    %cst_118 = arith.constant dense<0.000000e+00> : vector<16xf32>
    %278 = vector.multi_reduction <add>, %277, %cst_118 [1] : vector<16x8xf32> to vector<16xf32>
    %279 = vector.shape_cast %278 : vector<16xf32> to vector<16x1xf32>
    %280 = tpu.reciprocal %279 {approx = true} : vector<16x1xf32> -> vector<16x1xf32>
    %281 = arith.mulf %279, %280 : vector<16x1xf32>
    %cst_119 = arith.constant 2.000000e+00 : f32
    %282 = vector.broadcast %cst_119 : f32 to vector<16x1xf32>
    %283 = arith.subf %282, %281 : vector<16x1xf32>
    %284 = arith.mulf %280, %283 : vector<16x1xf32>
    %285 = vector.broadcast %284 : vector<16x1xf32> to vector<16x8xf32>
    %286 = arith.mulf %277, %285 : vector<16x8xf32>
    %c0_120 = arith.constant 0 : index
    %c16_121 = arith.constant 16 : index
    %287 = vector.load %arg2[%c0_120, %c16_121] : memref<16x128xf32, #tpu.memory_space<vmem>>, vector<16x8xf32>
    tpu.vector_store %arg2[%c0_120, %c16_121], %286 {strides = array<i32>} : memref<16x128xf32, #tpu.memory_space<vmem>>, vector<16x8xf32>,
    %288 = vector.shape_cast %286 : vector<16x8xf32> to vector<2x8x8xf32>
    "tpu.trace_start"() <{level = 10 : i32, message = "bij,bjf->bif"}> : () -> ()
    %cst_122 = arith.constant dense<0.000000e+00> : vector<2x8x128xf32>
    %289 = tpu.matmul %288, %223, %cst_122 {dimension_numbers = #tpu.dot_dimension_numbers<[2], [1], [1], [2], [0, 0, 0, 1, 1, 2], [0], [0]>} : vector<2x8x8xf32>, vector<2x8x128xf32>, vector<2x8x128xf32> -> vector<2x8x128xf32>
    "tpu.trace_stop"() : () -> ()
    %290 = vector.shape_cast %289 : vector<2x8x128xf32> to vector<16x128xf32>
    %cst_123 = arith.constant dense<0.000000e+00> : vector<16x5xf32>
    %291 = tpu.matmul %222, %219, %cst_123 {dimension_numbers = #tpu.dot_dimension_numbers<[1], [0], [0], [1], [0, 0, 1, 1], [], []>} : vector<16x128xf32>, vector<128x5xf32>, vector<16x5xf32> -> vector<16x5xf32>
    %cst_124 = arith.constant dense<0.000000e+00> : vector<16x5xf32>
    %292 = tpu.matmul %290, %220, %cst_124 {dimension_numbers = #tpu.dot_dimension_numbers<[1], [0], [0], [1], [0, 0, 1, 1], [], []>} : vector<16x128xf32>, vector<128x5xf32>, vector<16x5xf32> -> vector<16x5xf32>
    %293 = arith.addf %291, %292 : vector<16x5xf32>
    %294 = vector.broadcast %221 : vector<1x5xf32> to vector<16x5xf32>
    %295 = arith.addf %293, %294 : vector<16x5xf32>
    %c0_125 = arith.constant 0 : index
    %c24 = arith.constant 24 : index
    %296 = vector.load %arg2[%c0_125, %c24] : memref<16x128xf32, #tpu.memory_space<vmem>>, vector<16x5xf32>
    tpu.vector_store %arg2[%c0_125, %c24], %295 {strides = array<i32>} : memref<16x128xf32, #tpu.memory_space<vmem>>, vector<16x5xf32>,
    return
  }
}

</mosaic_0001>

<bundles_post_ra>
// kernel: forward.1
= control target key start
LH: loop header
LB: loop body
LE: loop exit
PB: predicated region body
PF: predicated region fallthrough
CT: control target
= control target key end

     0   :  { %7 = vsyncpa [#allocation4], 0  ;;  %s7564_s9 = smov [#allocation3]   ;;  %s8615_s0 = inlined_call_operand.vmem [shape: f32[16,128], index: 0, kind: input, shape index: {}]   ;;  %s8616_s1 = inlined_call_operand.hbm [shape: f32[1800,128], index: 1, kind: input, shape index: {}]   ;;  %s8617_s2 = inlined_call_operand.vmem [shape: f32[16,128], index: 2, kind: output, shape index: {}]  }
   0x1   :  { %s15_s10 = sshll.u32 %s7564_s9, 4  ;;  %s7540_s13 = scalar_lea.hbm %s8616_s1, 28800  ;;  %s16_s10 = int_to_ptr.vmem [resolvable:$true] %s15_s10 }
   0x2   :  { %p7541_p0 = scmp.ne.s32.totalorder %s8616_s1, %s7540_s13  ;;  %p7544_p1 = scmp.lt.u32.totalorder %s7540_s13, %s8616_s1 }
   0x4   :  { %p7546_p2 = pnand %p7544_p1, %p7541_p0 }
   0x6   :  { %7549 = shalt.err (!%p7546_p2)
}
   0x7   :  { %s7550_s18 = scalar_lea.vmem %s16_s10, 28800  ;;  %p7555_p4 = scmp.lt.s32.totalorder %s16_s10, %s16_s10 }
   0x8   :  { %p7551_p3 = scmp.ne.s32.totalorder %s16_s10, %s7550_s18  ;;  %p7556_p5 = scmp.lt.s32.totalorder %s7550_s18, %s7550_s18 }
   0xa   :  { %p7557_p6 = por %p7556_p5, %p7555_p4 }
   0xc   :  { %p7558_p7 = pnand %p7557_p6, %p7551_p3 }
   0xe   :  { %7561 = shalt.err (!%p7558_p7)
}
   0xf   :  { %s7565_s19 = smov 128   ;;  %s7566_s20 = smov 8  }
  0x10   :  { %21 = dma.hbm_to_vmem [thread:$0]  %s8616_s1, 28800, %s16_s10, [#allocation4], %s7565_s19, %s7565_s19, %s7566_s20  }
  0x11   :  { %7562 = dma.done.wait [#allocation4], 28800  }
  0x12   :  { %7563 = vsyncadd [#allocation4], 4294938496  ;;  %v31_v0 = vlaneseq  ;;  %v7567_v1 = vmov 1966171168   ;;  %v62_v5 = vld [vmem:[#allocation3] sm:$0xff]  ;;  %v63_v6 = vld [vmem:[#allocation3 + $0x8] sm:$0xff] }
  0x13   :  { %v143_v2 = vunpack.c.l.s4 %v7567_v1  ;;  %v64_v7 = vld [vmem:[#allocation3 + $0x10] sm:$0xff]  ;;  %v7069_v8 = vpack.c.bf16 %v63_v6, %v62_v5  ;;  %v65_v9 = vld [vmem:[#allocation3 + $0x18] sm:$0xff]  ;;  %v66_v11 = vld [vmem:[#allocation3 + $0x20] sm:$0xff]  ;;  %vm552_vm2 = vcmask 523264   ;;  %s7570_s6 = smov 16   ;;  %s7571_s8 = smov 32  }
  0x14   :  { %v7602_v3 = vshrl.u32 %v31_v0, 7  ;;  %v7073_v10 = vpack.c.bf16 %v65_v9, %v64_v7  ;;  %v67_v12 = vld [vmem:[#allocation3 + $0x28] sm:$0xff]  ;;  %v68_v14 = vld [vmem:[#allocation3 + $0x30] sm:$0xff]  ;;  %v69_v16 = vld [vmem:[#allocation3 + $0x38] sm:$0xff]  ;;  %s7572_s18 = smov 24  }
  0x15   :  { %v144_v4 = vunpack.c.0.s8 %v143_v2  ;;  %7070 = vmatprep.subr.bf16.mxu0 %v7069_v8  ;;  %v7077_v15 = vpack.c.bf16 %v67_v12, %v66_v11  ;;  %v7610_v17 = vld [vmem:[%s8615_s0] sm:$0xff]  ;;  %v7615_v18 = vld [vmem:[%s8615_s0 + $0x8] sm:$0xff]  ;;  %v79_v21 = vld [vmem:[#allocation3 + $0x88] sm:$0xff]  ;;  %v7081_v27 = vpack.c.bf16 %v69_v16, %v68_v14 }
  0x16   :  { %7072 = vmatpush3.bf16.msra.mxu0 %v7069_v8  ;;  %27 = vst [vmem:[#allocation2] sm:$0xff] %v7610_v17  ;;  %v7621_v20 = vsub.s32 0, %v7602_v3  ;;  %28 = vst [vmem:[#allocation2 + $0x8] sm:$0xff] %v7615_v18  ;;  %v80_v22 = vld [vmem:[#allocation3 + $0x90] sm:$0xff]  ;;  %v81_v23 = vld [vmem:[#allocation3 + $0x98] sm:$0xff]  ;;  %v141_v38 = vcombine.high %v7610_v17, %v7610_v17  ;;  %v190_v62 = vcombine.high %v7615_v18, %v7615_v18 }
  0x17   :  { %v7605_v13 = vsub.s32 %v144_v4, %v7602_v3  ;;  %7074 = vmatprep.subr.bf16.mxu0 %v7073_v10  ;;  %v7101_v24 = vpack.c.bf16 %v80_v22, %v79_v21  ;;  %v82_v25 = vld [vmem:[#allocation3 + $0xa0] sm:$0xff]  ;;  %v71_v30 = vld [vmem:[#allocation3 + $0x48] sm:$0xff]  ;;  %v72_v34 = vld [vmem:[#allocation3 + $0x50] sm:$0xff] }
  0x18   :  { %v7105_v28 = vpack.c.bf16 %v82_v25, %v81_v23  ;;  %v70_v29 = vld [vmem:[#allocation3 + $0x40] sm:$0xff]  ;;  %v73_v35 = vld [vmem:[#allocation3 + $0x58] sm:$0xff]  ;;  %v75_v41 = vld [vmem:[#allocation3 + $0x68] sm:$0xff] }
  0x19   :  { %v148_v19 = vrot.slane %v7610_v17, %v7605_v13  ;;  %7102 = vmatprep.subr.bf16.mxu1 %v7101_v24  ;;  %v7085_v33 = vpack.c.bf16 %v71_v30, %v70_v29  ;;  %v7089_v39 = vpack.c.bf16 %v73_v35, %v72_v34  ;;  %v74_v40 = vld [vmem:[#allocation3 + $0x60] sm:$0xff]  ;;  %v155_v43 = vrot.slane %v141_v38, %v7605_v13  ;;  %v76_v46 = vld [vmem:[#allocation3 + $0x70] sm:$0xff]  ;;  %v77_v47 = vld [vmem:[#allocation3 + $0x78] sm:$0xff] }
  0x1a   :  { %7076 = vmatpush3.bf16.msra.mxu0 %v7073_v10  ;;  %7104 = vmatpush3.bf16.msra.mxu1 %v7101_v24  ;;  %v7093_v45 = vpack.c.bf16 %v75_v41, %v74_v40  ;;  %v7097_v53 = vpack.c.bf16 %v77_v47, %v76_v46  ;;  %v197_v54 = vrot.slane %v7615_v18, %v7605_v13 }
  0x1b   :  { %v164_v26 = vrot.slane %v148_v19, %v7605_v13  ;;  %7078 = vmatprep.subr.bf16.mxu0 %v7077_v15  ;;  %7106 = vmatprep.subr.bf16.mxu1 %v7105_v28  ;;  %v156_v37 = vcombine.high %v148_v19, %v148_v19  ;;  %v157_v50 = vcombine.high %v155_v43, %v155_v43 }
  0x1c   :  { %v171_v52 = vrot.slane %v155_v43, %v7605_v13  ;;  %v205_v61 = vcombine.high %v197_v54, %v197_v54  ;;  %v213_v8 = vrot.slane %v197_v54, %v7605_v13  ;;  %v204_v14 = vrot.slane %v190_v62, %v7605_v13  ;;  %v83_v54 = vld [vmem:[#allocation3 + $0xa8] sm:$0xff]  ;;  %v90_v62 = vld [vmem:[#allocation3 + $0xe0] sm:$0xff] }
  0x1d   :  { %v242_v31 = vrot.slane %v164_v26, %v7621_v20  ;;  %v178_v42 = vrot.slane %v156_v37, %v7605_v13  ;;  %v186_v44 = vcombine.high %v164_v26, %v164_v26  ;;  %v185_v57 = vrot.slane %v157_v50, %v7605_v13 }
  0x1e   :  { %7080 = vmatpush3.bf16.msra.mxu0 %v7077_v15  ;;  %7108 = vmatpush3.bf16.msra.mxu1 %v7105_v28  ;;  %v258_v59 = vrot.slane %v171_v52, %v7621_v20  ;;  %v187_v60 = vcombine.high %v171_v52, %v171_v52  ;;  %v227_v9 = vrot.slane %v205_v61, %v7605_v13  ;;  %v89_v61 = vld [vmem:[#allocation3 + $0xd8] sm:$0xff] }
  0x1f   :  { %v319_v32 = vsub.f32 %v242_v31, %v7610_v17  ;;  %7082 = vmatprep.subr.bf16.mxu0 %v7081_v27  ;;  %v246_v48 = vrot.slane %v178_v42, %v7621_v20  ;;  %v188_v49 = vcombine.high %v178_v42, %v178_v42  ;;  %v250_v51 = vrot.slane %v186_v44, %v7621_v20 }
  0x20   :  { %v262_v2 = vrot.slane %v185_v57, %v7621_v20  ;;  %v189_v4 = vcombine.high %v185_v57, %v185_v57  ;;  %v323_v6 = vsub.f32 %v258_v59, %v7610_v17  ;;  %v266_v7 = vrot.slane %v187_v60, %v7621_v20  ;;  %v85_v57 = vld [vmem:[#allocation3 + $0xb8] sm:$0xff]  ;;  %v88_v60 = vld [vmem:[#allocation3 + $0xd0] sm:$0xff] }
  0x21   :  { %v335_v36 = vand.u32 2147483647, %v319_v32  ;;  %v320_v55 = vsub.f32 %v246_v48, %v7610_v17  ;;  %v254_v56 = vrot.slane %v188_v49, %v7621_v20  ;;  %v321_v58 = vsub.f32 %v250_v51, %v7610_v17 }
  0x22   :  { %7084 = vmatpush3.bf16.msra.mxu0 %v7081_v27  ;;  %v324_v11 = vsub.f32 %v262_v2, %v7610_v17  ;;  %v270_v12 = vrot.slane %v189_v4, %v7621_v20  ;;  %v339_v15 = vand.u32 2147483647, %v323_v6  ;;  %v325_v16 = vsub.f32 %v266_v7, %v7610_v17  ;;  %v92_v2 = vld [vmem:[#allocation3 + $0xf0] sm:$0xff]  ;;  %v93_v4 = vld [vmem:[#allocation3 + $0xf8] sm:$0xff]  ;;  %v94_v6 = vld [vmem:[#allocation3 + $0x100] sm:$0xff] }
  0x23   :  { %6357 = vmatprep.mubr.f32.mxu0 %v335_v36  ;;  %7086 = vmatprep.subr.bf16.mxu0 %v7085_v33  ;;  %v336_v63 = vand.u32 2147483647, %v320_v55  ;;  %v322_v1 = vsub.f32 %v254_v56, %v7610_v17  ;;  %v337_v5 = vand.u32 2147483647, %v321_v58  ;;  %v274_v19 = vrot.slane %v213_v8, %v7621_v20  ;;  %v84_v55 = vld [vmem:[#allocation3 + $0xb0] sm:$0xff]  ;;  %v86_v58 = vld [vmem:[#allocation3 + $0xc0] sm:$0xff] }
  0x24   :  { %v235_v21 = vcombine.high %v213_v8, %v213_v8  ;;  %v278_v22 = vrot.slane %v227_v9, %v7621_v20  ;;  %v340_v23 = vand.u32 2147483647, %v324_v11  ;;  %v326_v24 = vsub.f32 %v270_v12, %v7610_v17  ;;  %v95_v7 = vld [vmem:[#allocation3 + $0x108] sm:$0xff] }
  0x25   :  { %v338_v10 = vand.u32 2147483647, %v322_v1  ;;  %v237_v25 = vcombine.high %v227_v9, %v227_v9  ;;  %v206_v26 = vcombine.high %v204_v14, %v204_v14  ;;  %v341_v27 = vand.u32 2147483647, %v325_v16  ;;  %v7676_v9 = vld [vmem:[#allocation3 + $0x80] ss:$0 sm:$0xff] }
  0x26   :  { %7088 = vmatpush3.bf16.msra.mxu0 %v7085_v33  ;;  %v327_v28 = vsub.f32 %v274_v19, %v7615_v18  ;;  %v282_v29 = vrot.slane %v235_v21, %v7621_v20  ;;  %v220_v30 = vrot.slane %v204_v14, %v7605_v13  ;;  %v342_v31 = vand.u32 2147483647, %v326_v24 }
  0x27   :  { %7090 = vmatprep.subr.bf16.mxu0 %v7089_v39  ;;  %v328_v32 = vsub.f32 %v278_v22, %v7615_v18  ;;  %v286_v33 = vrot.slane %v237_v25, %v7621_v20  ;;  %v234_v34 = vrot.slane %v206_v26, %v7605_v13  ;;  %v7109_v56 = vpack.c.bf16 %v84_v55, %v83_v54 }
  0x28   :  { %v343_v17 = vand.u32 2147483647, %v327_v28  ;;  %v329_v35 = vsub.f32 %v282_v29, %v7615_v18  ;;  %v290_v36 = vrot.slane %v220_v30, %v7621_v20  ;;  %v236_v37 = vcombine.high %v220_v30, %v220_v30 }
  0x29   :  { %v344_v38 = vand.u32 2147483647, %v328_v32  ;;  %v294_v40 = vrot.slane %v234_v34, %v7621_v20  ;;  %v238_v41 = vcombine.high %v234_v34, %v234_v34  ;;  %7110 = vmatprep.subr.bf16.mxu1 %v7109_v56  ;;  %v7113_v59 = vpack.c.bf16 %v86_v58, %v85_v57 }
  0x2a   :  { %7092 = vmatpush3.bf16.msra.mxu0 %v7089_v39  ;;  %v330_v39 = vsub.f32 %v286_v33, %v7615_v18  ;;  %v345_v42 = vand.u32 2147483647, %v329_v35  ;;  %v331_v43 = vsub.f32 %v290_v36, %v7615_v18  ;;  %v298_v44 = vrot.slane %v236_v37, %v7621_v20  ;;  %7112 = vmatpush3.bf16.msra.mxu1 %v7109_v56 }
  0x2b   :  { %7094 = vmatprep.subr.bf16.mxu0 %v7093_v45  ;;  %v332_v46 = vsub.f32 %v294_v40, %v7615_v18  ;;  %v302_v47 = vrot.slane %v238_v41, %v7621_v20  ;;  %7114 = vmatprep.subr.bf16.mxu1 %v7113_v59  ;;  %v7672_v8 = vpack.c.bf16 %v95_v7, %v94_v6 }
  0x2c   :  { %v347_v48 = vand.u32 2147483647, %v331_v43  ;;  %v333_v49 = vsub.f32 %v298_v44, %v7615_v18 }
  0x2d   :  { %v348_v50 = vand.u32 2147483647, %v332_v46  ;;  %v334_v51 = vsub.f32 %v302_v47, %v7615_v18  ;;  %v7117_v18 = vpack.c.bf16 %v89_v61, %v88_v60 }
  0x2e   :  { %7096 = vmatpush3.bf16.msra.mxu0 %v7093_v45  ;;  %v346_v45 = vand.u32 2147483647, %v330_v39  ;;  %v349_v52 = vand.u32 2147483647, %v333_v49  ;;  %7116 = vmatpush3.bf16.msra.mxu1 %v7113_v59 }
  0x2f   :  { %7098 = vmatprep.subr.bf16.mxu0 %v7097_v53  ;;  %7477 = vmatprep.subr.bf16.mxu1 %v7117_v18 }
  0x32   :  { %7100 = vmatpush3.bf16.msra.mxu0 %v7097_v53  ;;  %v350_v53 = vand.u32 2147483647, %v334_v51 }
  0x33   :  { %7118 = vmatprep.subr.bf16.mxu0 %v7117_v18 }
  0x35   :  { %6358 = vmatmul.mubr.f32.vlgmr.msra.gmra.mrb[0].mxu0 %v336_v63  ;;  %v91_v63 = vld [vmem:[#allocation3 + $0xe8] sm:$0xff] }
  0x36   :  { %6360 = vmatprep.mubr.f32.mxu0 %v337_v5  ;;  %v7121_v1 = vpack.c.bf16 %v91_v63, %v90_v62  ;;  %7120 = vmatpush3.bf16.msra.mxu0 %v7117_v18  ;;  %v7125_v5 = vpack.c.bf16 %v93_v4, %v92_v2 }
  0x38   :  { %7122 = vmatprep.subr.bf16.mxu0 %v7121_v1 }
  0x39   :  { %6361 = vmatmul.mubr.f32.gmra.mrb[2].mxu0 %v338_v10 }
  0x3a   :  { %6363 = vmatprep.mubr.f32.mxu0 %v339_v15  ;;  %7124 = vmatpush3.bf16.msra.mxu0 %v7121_v1 }
  0x3b   :  { %7126 = vmatprep.subr.bf16.mxu0 %v7125_v5 }
  0x3d   :  { %6364 = vmatmul.mubr.f32.gmra.mrb[4].mxu0 %v340_v23 }
  0x3e   :  { %6366 = vmatprep.mubr.f32.mxu0 %v341_v27  ;;  %7128 = vmatpush3.bf16.msra.mxu0 %v7125_v5 }
  0x3f   :  { %7130 = vmatprep.subr.bf16.mxu0 %v7672_v8 }
  0x41   :  { %6367 = vmatmul.mubr.f32.gmra.mrb[6].mxu0 %v342_v31 }
  0x42   :  { %6369 = vmatprep.mubr.f32.mxu0 %v343_v17  ;;  %7132 = vmatpush3.bf16.msra.mxu0 %v7672_v8 }
  0x45   :  { %6370 = vmatmul.mubr.f32.gmra.mrb[8].mxu0 %v344_v38 }
  0x46   :  { %6372 = vmatprep.mubr.f32.mxu0 %v345_v42 }
  0x49   :  { %6373 = vmatmul.mubr.f32.gmra.mrb[10].mxu0 %v346_v45 }
  0x4a   :  { %6375 = vmatprep.mubr.f32.mxu0 %v347_v48 }
  0x4d   :  { %6376 = vmatmul.mubr.f32.gmra.mrb[12].mxu0 %v348_v50 }
  0x4e   :  { %6378 = vmatprep.mubr.f32.mxu0 %v349_v52 }
  0x51   :  { %6379 = vmatmul.mubr.f32.gmra.mrb[14].mxu0 %v350_v53 }
 0x108   :  { %v6359_v10 = vpop.f32.mrb[0].mxu0 }
 0x109   :  { %v427_v11 = vadd.f32 %v6359_v10, %v7676_v9  ;;  %v421_v12 = vpop.f32.mrb[1].mxu0 }
 0x10a   :  { %v422_v14 = vadd.f32 %v7676_v9, %v421_v12 }
 0x10b   :  { %v517_v15 = vmul.f32 0.01, %v427_v11  ;;  %vm501_vm0 = vcmp.gt.f32.partialorder %v427_v11, 0.0 }
 0x10c   :  { %v6362_v16 = vpop.f32.mrb[2].mxu0  ;;  %vm500_vm1 = vcmp.gt.f32.partialorder %v422_v14, 0.0  ;;  %v516_v19 = vmul.f32 0.01, %v422_v14 }
 0x10d   :  { %v437_v21 = vadd.f32 %v6362_v16, %v7676_v9  ;;  %v431_v22 = vpop.f32.mrb[3].mxu0  ;;  %v533_v26 = vsel %vm501_vm0, %v427_v11, %v517_v15  ;;  %v97_v16 = vld [vmem:[#allocation3 + $0x118] sm:$0xff] }
 0x10e   :  { %v432_v23 = vadd.f32 %v7676_v9, %v431_v22  ;;  %v532_v24 = vsel %vm500_vm1, %v422_v14, %v516_v19  ;;  %v98_v19 = vld [vmem:[#allocation3 + $0x120] sm:$0xff] }
 0x10f   :  { %v519_v25 = vmul.f32 0.01, %v437_v21  ;;  %6397 = vmatprep.mubr.msk.f32.mxu1 %vm552_vm2, %v532_v24  ;;  %vm503_vm3 = vcmp.gt.f32.partialorder %v437_v21, 0.0 }
 0x110   :  { %vm502_vm4 = vcmp.gt.f32.partialorder %v432_v23, 0.0  ;;  %v518_v27 = vmul.f32 0.01, %v432_v23  ;;  %v6365_v28 = vpop.f32.mrb[4].mxu0  ;;  %6398 = vmatmul.mubr.msk.f32.vlgmr.msra.gmra.mrb[0].mxu1 %vm552_vm2, %v533_v26 }
 0x111   :  { %v447_v29 = vadd.f32 %v6365_v28, %v7676_v9  ;;  %v441_v30 = vpop.f32.mrb[5].mxu0  ;;  %7481 = vmatpush3.bf16.msra.mxu1 %v7117_v18  ;;  %v535_v34 = vsel %vm503_vm3, %v437_v21, %v519_v25  ;;  %v7133_v21 = vpack.c.bf16 %v98_v19, %v97_v16  ;;  %v100_v28 = vld [vmem:[#allocation3 + $0x130] sm:$0xff] }
 0x112   :  { %v442_v31 = vadd.f32 %v7676_v9, %v441_v30  ;;  %v534_v32 = vsel %vm502_vm4, %v432_v23, %v518_v27  ;;  %7478 = vmatprep.subr.bf16.mxu1 %v7121_v1  ;;  %v99_v27 = vld [vmem:[#allocation3 + $0x128] sm:$0xff] }
 0x113   :  { %v521_v33 = vmul.f32 0.01, %v447_v29  ;;  %6400 = vmatprep.mubr.msk.f32.mxu1 %vm552_vm2, %v534_v32  ;;  %vm505_vm5 = vcmp.gt.f32.partialorder %v447_v29, 0.0  ;;  %7134 = vmatprep.subr.bf16.mxu0 %v7133_v21 }
 0x114   :  { %vm504_vm6 = vcmp.gt.f32.partialorder %v442_v31, 0.0  ;;  %v520_v17 = vmul.f32 0.01, %v442_v31  ;;  %v6368_v35 = vpop.f32.mrb[6].mxu0  ;;  %6401 = vmatmul.mubr.msk.f32.gmra.mrb[2].mxu1 %vm552_vm2, %v535_v34 }
 0x115   :  { %v457_v36 = vadd.f32 %v6368_v35, %v7676_v9  ;;  %v451_v37 = vpop.f32.mrb[7].mxu0  ;;  %7482 = vmatpush3.bf16.msra.mxu1 %v7121_v1  ;;  %v537_v41 = vsel %vm505_vm5, %v447_v29, %v521_v33 }
 0x116   :  { %v452_v38 = vadd.f32 %v7676_v9, %v451_v37  ;;  %v536_v39 = vsel %vm504_vm6, %v442_v31, %v520_v17  ;;  %7479 = vmatprep.subr.bf16.mxu1 %v7125_v5  ;;  %v7137_v17 = vpack.c.bf16 %v100_v28, %v99_v27 }
 0x117   :  { %v523_v40 = vmul.f32 0.01, %v457_v36  ;;  %6403 = vmatprep.mubr.msk.f32.mxu1 %vm552_vm2, %v536_v39  ;;  %vm507_vm7 = vcmp.gt.f32.partialorder %v457_v36, 0.0 }
 0x118   :  { %vm506_vm8 = vcmp.gt.f32.partialorder %v452_v38, 0.0  ;;  %v522_v42 = vmul.f32 0.01, %v452_v38  ;;  %v6371_v43 = vpop.f32.mrb[8].mxu0  ;;  %6404 = vmatmul.mubr.msk.f32.gmra.mrb[4].mxu1 %vm552_vm2, %v537_v41 }
 0x119   :  { %v467_v44 = vadd.f32 %v6371_v43, %v7676_v9  ;;  %v461_v45 = vpop.f32.mrb[9].mxu0  ;;  %7483 = vmatpush3.bf16.msra.mxu1 %v7125_v5  ;;  %v539_v49 = vsel %vm507_vm7, %v457_v36, %v523_v40 }
 0x11a   :  { %v462_v46 = vadd.f32 %v7676_v9, %v461_v45  ;;  %v538_v47 = vsel %vm506_vm8, %v452_v38, %v522_v42  ;;  %7480 = vmatprep.subr.bf16.mxu1 %v7672_v8 }
 0x11b   :  { %v525_v48 = vmul.f32 0.01, %v467_v44  ;;  %6406 = vmatprep.mubr.msk.f32.mxu1 %vm552_vm2, %v538_v47  ;;  %vm509_vm9 = vcmp.gt.f32.partialorder %v467_v44, 0.0 }
 0x11c   :  { %vm508_vm10 = vcmp.gt.f32.partialorder %v462_v46, 0.0  ;;  %v524_v50 = vmul.f32 0.01, %v462_v46  ;;  %v6374_v51 = vpop.f32.mrb[10].mxu0  ;;  %6407 = vmatmul.mubr.msk.f32.gmra.mrb[6].mxu1 %vm552_vm2, %v539_v49 }
 0x11d   :  { %v477_v52 = vadd.f32 %v6374_v51, %v7676_v9  ;;  %v471_v53 = vpop.f32.mrb[11].mxu0  ;;  %7484 = vmatpush3.bf16.msra.mxu1 %v7672_v8  ;;  %v541_v57 = vsel %vm509_vm9, %v467_v44, %v525_v48 }
 0x11e   :  { %v472_v54 = vadd.f32 %v7676_v9, %v471_v53  ;;  %v540_v55 = vsel %vm508_vm10, %v462_v46, %v524_v50 }
 0x11f   :  { %v527_v56 = vmul.f32 0.01, %v477_v52  ;;  %6409 = vmatprep.mubr.msk.f32.mxu1 %vm552_vm2, %v540_v55  ;;  %vm511_vm11 = vcmp.gt.f32.partialorder %v477_v52, 0.0 }
 0x120   :  { %vm510_vm12 = vcmp.gt.f32.partialorder %v472_v54, 0.0  ;;  %v526_v58 = vmul.f32 0.01, %v472_v54  ;;  %v6377_v59 = vpop.f32.mrb[12].mxu0  ;;  %6410 = vmatmul.mubr.msk.f32.gmra.mrb[8].mxu1 %vm552_vm2, %v541_v57 }
 0x121   :  { %v487_v60 = vadd.f32 %v6377_v59, %v7676_v9  ;;  %v481_v61 = vpop.f32.mrb[13].mxu0  ;;  %v543_v1 = vsel %vm511_vm11, %v477_v52, %v527_v56 }
 0x122   :  { %v482_v62 = vadd.f32 %v7676_v9, %v481_v61  ;;  %v542_v18 = vsel %vm510_vm12, %v472_v54, %v526_v58 }
 0x123   :  { %v529_v63 = vmul.f32 0.01, %v487_v60  ;;  %6412 = vmatprep.mubr.msk.f32.mxu1 %vm552_vm2, %v542_v18  ;;  %vm513_vm13 = vcmp.gt.f32.partialorder %v487_v60, 0.0 }
 0x124   :  { %vm512_vm14 = vcmp.gt.f32.partialorder %v482_v62, 0.0  ;;  %v528_v2 = vmul.f32 0.01, %v482_v62  ;;  %v6380_v4 = vpop.f32.mrb[14].mxu0  ;;  %6413 = vmatmul.mubr.msk.f32.gmra.mrb[10].mxu1 %vm552_vm2, %v543_v1 }
 0x125   :  { %v497_v5 = vadd.f32 %v6380_v4, %v7676_v9  ;;  %v491_v6 = vpop.f32.mrb[15].mxu0  ;;  %v545_v11 = vsel %vm513_vm13, %v487_v60, %v529_v63 }
 0x126   :  { %v492_v7 = vadd.f32 %v7676_v9, %v491_v6  ;;  %v544_v8 = vsel %vm512_vm14, %v482_v62, %v528_v2  ;;  %v7712_v9 = vld [vmem:[#allocation3 + $0xc8] ss:$0 sm:$0xff] }
 0x127   :  { %v531_v10 = vmul.f32 0.01, %v497_v5  ;;  %6415 = vmatprep.mubr.msk.f32.mxu1 %vm552_vm2, %v544_v8  ;;  %vm515_vm15 = vcmp.gt.f32.partialorder %v497_v5, 0.0 }
 0x128   :  { %vm514_vm0 = vcmp.gt.f32.partialorder %v492_v7, 0.0  ;;  %v530_v12 = vmul.f32 0.01, %v492_v7  ;;  %6416 = vmatmul.mubr.msk.f32.gmra.mrb[12].mxu1 %vm552_vm2, %v545_v11 }
 0x129   :  { %v547_v15 = vsel %vm515_vm15, %v497_v5, %v531_v10 }
 0x12a   :  { %v546_v14 = vsel %vm514_vm0, %v492_v7, %v530_v12 }
 0x12b   :  { %6418 = vmatprep.mubr.msk.f32.mxu1 %vm552_vm2, %v546_v14 }
 0x12c   :  { %6419 = vmatmul.mubr.msk.f32.gmra.mrb[14].mxu1 %vm552_vm2, %v547_v15 }
 0x1e3   :  { %v6399_v22 = vpop.f32.mrb[0].mxu1 }
 0x1e4   :  { %v673_v23 = vadd.f32 %v6399_v22, %v7712_v9  ;;  %v667_v24 = vpop.f32.mrb[1].mxu1 }
 0x1e5   :  { %v668_v25 = vadd.f32 %v7712_v9, %v667_v24 }
 0x1e6   :  { %v763_v26 = vmul.f32 0.01, %v673_v23  ;;  %vm747_vm1 = vcmp.gt.f32.partialorder %v673_v23, 0.0 }
 0x1e7   :  { %vm746_vm3 = vcmp.gt.f32.partialorder %v668_v25, 0.0  ;;  %v762_v29 = vmul.f32 0.01, %v668_v25  ;;  %v6402_v30 = vpop.f32.mrb[2].mxu1 }
 0x1e8   :  { %v683_v31 = vadd.f32 %v6402_v30, %v7712_v9  ;;  %v677_v32 = vpop.f32.mrb[3].mxu1  ;;  %v779_v35 = vsel %vm747_vm1, %v673_v23, %v763_v26  ;;  %v7746_v30 = vld [vmem:[#allocation3 + $0x110] ss:$0 sm:$0xff] }
 0x1e9   :  { %v678_v33 = vadd.f32 %v7712_v9, %v677_v32  ;;  %v778_v34 = vsel %vm746_vm3, %v668_v25, %v762_v29 }
 0x1ea   :  { %v765_v36 = vmul.f32 0.01, %v683_v31  ;;  %6437 = vmatprep.mubr.msk.f32.mxu0 %vm552_vm2, %v778_v34  ;;  %vm749_vm4 = vcmp.gt.f32.partialorder %v683_v31, 0.0 }
 0x1eb   :  { %vm748_vm5 = vcmp.gt.f32.partialorder %v678_v33, 0.0  ;;  %v764_v37 = vmul.f32 0.01, %v678_v33  ;;  %v6405_v38 = vpop.f32.mrb[4].mxu1  ;;  %6438 = vmatmul.mubr.msk.f32.vlgmr.msra.gmra.mrb[16].mxu0 %vm552_vm2, %v779_v35 }
 0x1ec   :  { %v693_v39 = vadd.f32 %v6405_v38, %v7712_v9  ;;  %v687_v40 = vpop.f32.mrb[5].mxu1  ;;  %7136 = vmatpush3.bf16.msra.mxu0 %v7133_v21  ;;  %v781_v44 = vsel %vm749_vm4, %v683_v31, %v765_v36 }
 0x1ed   :  { %v688_v41 = vadd.f32 %v7712_v9, %v687_v40  ;;  %v780_v42 = vsel %vm748_vm5, %v678_v33, %v764_v37  ;;  %7138 = vmatprep.subr.bf16.mxu0 %v7137_v17  ;;  %vm1043_vm5 = vcmask 261120  }
 0x1ee   :  { %v767_v43 = vmul.f32 0.01, %v693_v39  ;;  %6440 = vmatprep.mubr.msk.f32.mxu0 %vm552_vm2, %v780_v42  ;;  %vm751_vm6 = vcmp.gt.f32.partialorder %v693_v39, 0.0 }
 0x1ef   :  { %vm750_vm7 = vcmp.gt.f32.partialorder %v688_v41, 0.0  ;;  %v766_v45 = vmul.f32 0.01, %v688_v41  ;;  %v6408_v46 = vpop.f32.mrb[6].mxu1  ;;  %6441 = vmatmul.mubr.msk.f32.gmra.mrb[18].mxu0 %vm552_vm2, %v781_v44 }
 0x1f0   :  { %v703_v47 = vadd.f32 %v6408_v46, %v7712_v9  ;;  %v697_v48 = vpop.f32.mrb[7].mxu1  ;;  %7140 = vmatpush3.bf16.msra.mxu0 %v7137_v17  ;;  %v783_v52 = vsel %vm751_vm6, %v693_v39, %v767_v43 }
 0x1f1   :  { %v698_v49 = vadd.f32 %v7712_v9, %v697_v48  ;;  %v782_v50 = vsel %vm750_vm7, %v688_v41, %v766_v45 }
 0x1f2   :  { %v769_v51 = vmul.f32 0.01, %v703_v47  ;;  %6443 = vmatprep.mubr.msk.f32.mxu0 %vm552_vm2, %v782_v50  ;;  %vm753_vm8 = vcmp.gt.f32.partialorder %v703_v47, 0.0 }
 0x1f3   :  { %vm752_vm9 = vcmp.gt.f32.partialorder %v698_v49, 0.0  ;;  %v768_v53 = vmul.f32 0.01, %v698_v49  ;;  %v6411_v54 = vpop.f32.mrb[8].mxu1  ;;  %6444 = vmatmul.mubr.msk.f32.gmra.mrb[20].mxu0 %vm552_vm2, %v783_v52 }
 0x1f4   :  { %v713_v55 = vadd.f32 %v6411_v54, %v7712_v9  ;;  %v707_v56 = vpop.f32.mrb[9].mxu1  ;;  %v785_v60 = vsel %vm753_vm8, %v703_v47, %v769_v51 }
 0x1f5   :  { %v708_v57 = vadd.f32 %v7712_v9, %v707_v56  ;;  %v784_v58 = vsel %vm752_vm9, %v698_v49, %v768_v53 }
 0x1f6   :  { %v771_v59 = vmul.f32 0.01, %v713_v55  ;;  %6446 = vmatprep.mubr.msk.f32.mxu0 %vm552_vm2, %v784_v58  ;;  %vm755_vm10 = vcmp.gt.f32.partialorder %v713_v55, 0.0 }
 0x1f7   :  { %vm754_vm11 = vcmp.gt.f32.partialorder %v708_v57, 0.0  ;;  %v770_v61 = vmul.f32 0.01, %v708_v57  ;;  %v6414_v62 = vpop.f32.mrb[10].mxu1  ;;  %6447 = vmatmul.mubr.msk.f32.gmra.mrb[22].mxu0 %vm552_vm2, %v785_v60 }
 0x1f8   :  { %v723_v18 = vadd.f32 %v6414_v62, %v7712_v9  ;;  %v717_v63 = vpop.f32.mrb[11].mxu1  ;;  %v787_v5 = vsel %vm755_vm10, %v713_v55, %v771_v59 }
 0x1f9   :  { %v718_v1 = vadd.f32 %v7712_v9, %v717_v63  ;;  %v786_v2 = vsel %vm754_vm11, %v708_v57, %v770_v61 }
 0x1fa   :  { %v773_v4 = vmul.f32 0.01, %v723_v18  ;;  %6449 = vmatprep.mubr.msk.f32.mxu0 %vm552_vm2, %v786_v2  ;;  %vm757_vm12 = vcmp.gt.f32.partialorder %v723_v18, 0.0 }
 0x1fb   :  { %vm756_vm13 = vcmp.gt.f32.partialorder %v718_v1, 0.0  ;;  %v772_v6 = vmul.f32 0.01, %v718_v1  ;;  %v6417_v7 = vpop.f32.mrb[12].mxu1  ;;  %6450 = vmatmul.mubr.msk.f32.gmra.mrb[24].mxu0 %vm552_vm2, %v787_v5 }
 0x1fc   :  { %v733_v8 = vadd.f32 %v6417_v7, %v7712_v9  ;;  %v727_v10 = vpop.f32.mrb[13].mxu1  ;;  %v789_v15 = vsel %vm757_vm12, %v723_v18, %v773_v4 }
 0x1fd   :  { %v728_v11 = vadd.f32 %v7712_v9, %v727_v10  ;;  %v788_v12 = vsel %vm756_vm13, %v718_v1, %v772_v6 }
 0x1fe   :  { %v775_v14 = vmul.f32 0.01, %v733_v8  ;;  %6452 = vmatprep.mubr.msk.f32.mxu0 %vm552_vm2, %v788_v12  ;;  %vm759_vm14 = vcmp.gt.f32.partialorder %v733_v8, 0.0 }
 0x1ff   :  { %vm758_vm15 = vcmp.gt.f32.partialorder %v728_v11, 0.0  ;;  %v774_v16 = vmul.f32 0.01, %v728_v11  ;;  %v6420_v19 = vpop.f32.mrb[14].mxu1  ;;  %6453 = vmatmul.mubr.msk.f32.gmra.mrb[26].mxu0 %vm552_vm2, %v789_v15 }
 0x200   :  { %v743_v21 = vadd.f32 %v6420_v19, %v7712_v9  ;;  %v737_v22 = vpop.f32.mrb[15].mxu1  ;;  %v791_v26 = vsel %vm759_vm14, %v733_v8, %v775_v14 }
 0x201   :  { %v738_v23 = vadd.f32 %v7712_v9, %v737_v22  ;;  %v790_v24 = vsel %vm758_vm15, %v728_v11, %v774_v16 }
 0x202   :  { %v777_v25 = vmul.f32 0.01, %v743_v21  ;;  %6455 = vmatprep.mubr.msk.f32.mxu0 %vm552_vm2, %v790_v24  ;;  %vm761_vm0 = vcmp.gt.f32.partialorder %v743_v21, 0.0 }
 0x203   :  { %vm760_vm1 = vcmp.gt.f32.partialorder %v738_v23, 0.0  ;;  %v776_v27 = vmul.f32 0.01, %v738_v23  ;;  %6456 = vmatmul.mubr.msk.f32.gmra.mrb[28].mxu0 %vm552_vm2, %v791_v26 }
 0x204   :  { %v793_v29 = vsel %vm761_vm0, %v743_v21, %v777_v25 }
 0x205   :  { %v792_v28 = vsel %vm760_vm1, %v738_v23, %v776_v27 }
 0x206   :  { %6458 = vmatprep.mubr.msk.f32.mxu1 %vm552_vm2, %v792_v28 }
 0x207   :  { %6459 = vmatmul.mubr.msk.f32.vlgmr.msra.gmra.mrb[16].mxu1 %vm552_vm2, %v793_v29 }
 0x2be   :  { %v6439_v31 = vpop.f32.mrb[16].mxu0 }
 0x2bf   :  { %v918_v9 = vadd.f32 %v6439_v31, %v7746_v30  ;;  %v912_v32 = vpop.f32.mrb[17].mxu0 }
 0x2c0   :  { %v913_v33 = vadd.f32 %v7746_v30, %v912_v32 }
 0x2c1   :  { %v1008_v34 = vmul.f32 0.01, %v918_v9  ;;  %vm992_vm3 = vcmp.gt.f32.partialorder %v918_v9, 0.0 }
 0x2c2   :  { %vm991_vm4 = vcmp.gt.f32.partialorder %v913_v33, 0.0  ;;  %v1007_v17 = vmul.f32 0.01, %v913_v33  ;;  %v6442_v35 = vpop.f32.mrb[18].mxu0 }
 0x2c3   :  { %v928_v36 = vadd.f32 %v6442_v35, %v7746_v30  ;;  %v922_v37 = vpop.f32.mrb[19].mxu0  ;;  %v1024_v40 = vsel %vm992_vm3, %v918_v9, %v1008_v34  ;;  %v7780_v35 = vld [vmem:[#allocation3 + $0x138] ss:$0 sm:$0xff] }
 0x2c4   :  { %v923_v38 = vadd.f32 %v7746_v30, %v922_v37  ;;  %v1023_v39 = vsel %vm991_vm4, %v913_v33, %v1007_v17  ;;  %v103_v17 = vld [vmem:[#allocation3 + $0x148] sm:$0x1] }
 0x2c5   :  { %v1010_v41 = vmul.f32 0.01, %v928_v36  ;;  %6469 = vmatprep.mubr.msk.f32.mxu0 %vm1043_vm5, %v1023_v39  ;;  %vm994_vm6 = vcmp.gt.f32.partialorder %v928_v36, 0.0  ;;  %7491 = vpush %v103_v17 }
 0x2c6   :  { %vm993_vm7 = vcmp.gt.f32.partialorder %v923_v38, 0.0  ;;  %v1009_v42 = vmul.f32 0.01, %v923_v38  ;;  %v6445_v43 = vpop.f32.mrb[20].mxu0  ;;  %6470 = vmatmul.mubr.msk.f32.vlgmr.msra.gmra.mrb[30].mxu0 %vm1043_vm5, %v1024_v40  ;;  %v7784_v40 = vld [vmem:[#allocation3 + $0x140] ss:$0 sm:$0xff] }
 0x2c7   :  { %v938_v44 = vadd.f32 %v6445_v43, %v7746_v30  ;;  %v932_v45 = vpop.f32.mrb[21].mxu0  ;;  %v1026_v49 = vsel %vm994_vm6, %v928_v36, %v1010_v41 }
 0x2c8   :  { %v933_v46 = vadd.f32 %v7746_v30, %v932_v45  ;;  %v1025_v47 = vsel %vm993_vm7, %v923_v38, %v1009_v42 }
 0x2c9   :  { %v1012_v48 = vmul.f32 0.01, %v938_v44  ;;  %6472 = vmatprep.mubr.msk.f32.mxu0 %vm1043_vm5, %v1025_v47  ;;  %vm996_vm8 = vcmp.gt.f32.partialorder %v938_v44, 0.0 }
 0x2ca   :  { %vm995_vm9 = vcmp.gt.f32.partialorder %v933_v46, 0.0  ;;  %v1011_v50 = vmul.f32 0.01, %v933_v46  ;;  %v6448_v51 = vpop.f32.mrb[22].mxu0  ;;  %6473 = vmatmul.mubr.msk.f32.gmra.mrb[32].mxu0 %vm1043_vm5, %v1026_v49 }
 0x2cb   :  { %v948_v52 = vadd.f32 %v6448_v51, %v7746_v30  ;;  %v942_v53 = vpop.f32.mrb[23].mxu0  ;;  %v1028_v57 = vsel %vm996_vm8, %v938_v44, %v1012_v48 }
 0x2cc   :  { %v943_v54 = vadd.f32 %v7746_v30, %v942_v53  ;;  %v1027_v55 = vsel %vm995_vm9, %v933_v46, %v1011_v50 }
 0x2cd   :  { %v1014_v56 = vmul.f32 0.01, %v948_v52  ;;  %6475 = vmatprep.mubr.msk.f32.mxu0 %vm1043_vm5, %v1027_v55  ;;  %vm998_vm10 = vcmp.gt.f32.partialorder %v948_v52, 0.0 }
 0x2ce   :  { %vm997_vm11 = vcmp.gt.f32.partialorder %v943_v54, 0.0  ;;  %v1013_v58 = vmul.f32 0.01, %v943_v54  ;;  %v6451_v59 = vpop.f32.mrb[24].mxu0  ;;  %6476 = vmatmul.mubr.msk.f32.gmra.mrb[34].mxu0 %vm1043_vm5, %v1028_v57 }
 0x2cf   :  { %v958_v60 = vadd.f32 %v6451_v59, %v7746_v30  ;;  %v952_v61 = vpop.f32.mrb[25].mxu0  ;;  %v1030_v1 = vsel %vm998_vm10, %v948_v52, %v1014_v56 }
 0x2d0   :  { %v953_v62 = vadd.f32 %v7746_v30, %v952_v61  ;;  %v1029_v18 = vsel %vm997_vm11, %v943_v54, %v1013_v58 }
 0x2d1   :  { %v1016_v63 = vmul.f32 0.01, %v958_v60  ;;  %6478 = vmatprep.mubr.msk.f32.mxu0 %vm1043_vm5, %v1029_v18  ;;  %vm1000_vm12 = vcmp.gt.f32.partialorder %v958_v60, 0.0 }
 0x2d2   :  { %vm999_vm13 = vcmp.gt.f32.partialorder %v953_v62, 0.0  ;;  %v1015_v2 = vmul.f32 0.01, %v953_v62  ;;  %v6454_v4 = vpop.f32.mrb[26].mxu0  ;;  %6479 = vmatmul.mubr.msk.f32.gmra.mrb[36].mxu0 %vm1043_vm5, %v1030_v1 }
 0x2d3   :  { %v968_v5 = vadd.f32 %v6454_v4, %v7746_v30  ;;  %v962_v6 = vpop.f32.mrb[27].mxu0  ;;  %v1032_v11 = vsel %vm1000_vm12, %v958_v60, %v1016_v63 }
 0x2d4   :  { %v963_v7 = vadd.f32 %v7746_v30, %v962_v6  ;;  %v1031_v8 = vsel %vm999_vm13, %v953_v62, %v1015_v2 }
 0x2d5   :  { %v1018_v10 = vmul.f32 0.01, %v968_v5  ;;  %6481 = vmatprep.mubr.msk.f32.mxu0 %vm1043_vm5, %v1031_v8  ;;  %vm1002_vm14 = vcmp.gt.f32.partialorder %v968_v5, 0.0 }
 0x2d6   :  { %vm1001_vm15 = vcmp.gt.f32.partialorder %v963_v7, 0.0  ;;  %v1017_v12 = vmul.f32 0.01, %v963_v7  ;;  %v6457_v14 = vpop.f32.mrb[28].mxu0  ;;  %6482 = vmatmul.mubr.msk.f32.gmra.mrb[38].mxu0 %vm1043_vm5, %v1032_v11 }
 0x2d7   :  { %v978_v15 = vadd.f32 %v6457_v14, %v7746_v30  ;;  %v972_v16 = vpop.f32.mrb[29].mxu0  ;;  %v1034_v23 = vsel %vm1002_vm14, %v968_v5, %v1018_v10 }
 0x2d8   :  { %v973_v19 = vadd.f32 %v7746_v30, %v972_v16  ;;  %v1033_v21 = vsel %vm1001_vm15, %v963_v7, %v1017_v12 }
 0x2d9   :  { %v1020_v22 = vmul.f32 0.01, %v978_v15  ;;  %6484 = vmatprep.mubr.msk.f32.mxu0 %vm1043_vm5, %v1033_v21  ;;  %vm1004_vm0 = vcmp.gt.f32.partialorder %v978_v15, 0.0 }
 0x2da   :  { %vm1003_vm1 = vcmp.gt.f32.partialorder %v973_v19, 0.0  ;;  %v1019_v24 = vmul.f32 0.01, %v973_v19  ;;  %v6460_v25 = vpop.f32.mrb[16].mxu1  ;;  %6485 = vmatmul.mubr.msk.f32.gmra.mrb[40].mxu0 %vm1043_vm5, %v1034_v23 }
 0x2db   :  { %v988_v26 = vadd.f32 %v6460_v25, %v7746_v30  ;;  %v982_v27 = vpop.f32.mrb[17].mxu1  ;;  %v1036_v9 = vsel %vm1004_vm0, %v978_v15, %v1020_v22 }
 0x2dc   :  { %v983_v28 = vadd.f32 %v7746_v30, %v982_v27  ;;  %v1035_v29 = vsel %vm1003_vm1, %v973_v19, %v1019_v24 }
 0x2dd   :  { %v1022_v31 = vmul.f32 0.01, %v988_v26  ;;  %6487 = vmatprep.mubr.msk.f32.mxu0 %vm1043_vm5, %v1035_v29  ;;  %vm1006_vm3 = vcmp.gt.f32.partialorder %v988_v26, 0.0 }
 0x2de   :  { %vm1005_vm4 = vcmp.gt.f32.partialorder %v983_v28, 0.0  ;;  %v1021_v32 = vmul.f32 0.01, %v983_v28  ;;  %6488 = vmatmul.mubr.msk.f32.gmra.mrb[42].mxu0 %vm1043_vm5, %v1036_v9 }
 0x2df   :  { %v1038_v34 = vsel %vm1006_vm3, %v988_v26, %v1022_v31 }
 0x2e0   :  { %v1037_v33 = vsel %vm1005_vm4, %v983_v28, %v1021_v32 }
 0x2e1   :  { %6490 = vmatprep.mubr.msk.f32.mxu0 %vm1043_vm5, %v1037_v33 }
 0x2e2   :  { %6491 = vmatmul.mubr.msk.f32.gmra.mrb[44].mxu0 %vm1043_vm5, %v1038_v34 }
 0x2f6   :  { %s7492_s0 = spop %7491 }
 0x399   :  { %v6471_v30 = vpop.f32.mrb[30].mxu0 }
 0x39a   :  { %v1164_v36 = vadd.f32 %v6471_v30, %v7780_v35  ;;  %v1158_v37 = vpop.f32.mrb[31].mxu0 }
 0x39b   :  { %v1159_v38 = vadd.f32 %v7780_v35, %v1158_v37 }
 0x39c   :  { %v1254_v39 = vmul.f32 0.01, %v1164_v36  ;;  %vm1238_vm6 = vcmp.gt.f32.partialorder %v1164_v36, 0.0 }
 0x39d   :  { %vm1237_vm7 = vcmp.gt.f32.partialorder %v1159_v38, 0.0  ;;  %v1253_v41 = vmul.f32 0.01, %v1159_v38  ;;  %v6474_v42 = vpop.f32.mrb[32].mxu0 }
 0x39e   :  { %v1174_v43 = vadd.f32 %v6474_v42, %v7780_v35  ;;  %v1168_v44 = vpop.f32.mrb[33].mxu0  ;;  %v1270_v45 = vsel %vm1238_vm6, %v1164_v36, %v1254_v39 }
 0x39f   :  { %v1169_v46 = vadd.f32 %v7780_v35, %v1168_v44  ;;  %v1290_v47 = vmul.f32 %v7784_v40, %v1270_v45  ;;  %v1269_v48 = vsel %vm1237_vm7, %v1159_v38, %v1253_v41 }
 0x3a0   :  { %v1256_v49 = vmul.f32 0.01, %v1174_v43  ;;  %vm1240_vm8 = vcmp.gt.f32.partialorder %v1174_v43, 0.0  ;;  %v1289_v50 = vmul.f32 %v7784_v40, %v1269_v48 }
 0x3a1   :  { %vm1239_vm9 = vcmp.gt.f32.partialorder %v1169_v46, 0.0  ;;  %v1255_v51 = vmul.f32 0.01, %v1169_v46  ;;  %v6477_v52 = vpop.f32.mrb[34].mxu0  ;;  %v1308_v53 = vsel %vm1043_vm5, %v1290_v47, 0.0 }
 0x3a2   :  { %v1184_v54 = vadd.f32 %v6477_v52, %v7780_v35  ;;  %1309 = vadd.xlane.f32.xlu0 %v1308_v53  ;;  %v1178_v55 = vpop.f32.mrb[35].mxu0  ;;  %v1272_v56 = vsel %vm1240_vm8, %v1174_v43, %v1256_v49  ;;  %v1305_v61 = vsel %vm1043_vm5, %v1289_v50, 0.0  ;;  %vm1469_vm8 = vcmask 1041409  }
 0x3a3   :  { %v1179_v57 = vadd.f32 %v7780_v35, %v1178_v55  ;;  %v1292_v58 = vmul.f32 %v7784_v40, %v1272_v56  ;;  %v1271_v59 = vsel %vm1239_vm9, %v1169_v46, %v1255_v51  ;;  %vm1471_vm9 = vcmask 1042434  }
 0x3a4   :  { %vm1242_vm10 = vcmp.gt.f32.partialorder %v1184_v54, 0.0  ;;  %v1258_v60 = vmul.f32 0.01, %v1184_v54  ;;  %v1291_v1 = vmul.f32 %v7784_v40, %v1271_v59 }
 0x3a5   :  { %vm1241_vm11 = vcmp.gt.f32.partialorder %v1179_v57, 0.0  ;;  %v1257_v62 = vmul.f32 0.01, %v1179_v57  ;;  %v6480_v18 = vpop.f32.mrb[36].mxu0  ;;  %v1314_v63 = vsel %vm1043_vm5, %v1292_v58, 0.0 }
 0x3a6   :  { %v1194_v2 = vadd.f32 %v6480_v18, %v7780_v35  ;;  %1315 = vadd.xlane.f32.xlu1 %v1314_v63  ;;  %1306 = vadd.xlane.f32.xlu0 %v1305_v61  ;;  %v1188_v4 = vpop.f32.mrb[37].mxu0  ;;  %v1274_v5 = vsel %vm1242_vm10, %v1184_v54, %v1258_v60  ;;  %v1311_v14 = vsel %vm1043_vm5, %v1291_v1, 0.0  ;;  %vm1473_vm10 = vcmask 1043459  }
 0x3a7   :  { %v1189_v6 = vadd.f32 %v7780_v35, %v1188_v4  ;;  %v1273_v7 = vsel %vm1241_vm11, %v1179_v57, %v1257_v62  ;;  %v1294_v15 = vmul.f32 %v7784_v40, %v1274_v5  ;;  %vm1475_vm11 = vcmask 1044484  }
 0x3a8   :  { %vm1244_vm12 = vcmp.gt.f32.partialorder %v1194_v2, 0.0  ;;  %v1260_v8 = vmul.f32 0.01, %v1194_v2  ;;  %v1293_v10 = vmul.f32 %v7784_v40, %v1273_v7 }
 0x3a9   :  { %vm1243_vm13 = vcmp.gt.f32.partialorder %v1189_v6, 0.0  ;;  %v1259_v11 = vmul.f32 0.01, %v1189_v6  ;;  %v6483_v12 = vpop.f32.mrb[38].mxu0  ;;  %v1320_v29 = vsel %vm1043_vm5, %v1294_v15, 0.0 }
 0x3aa   :  { %v1204_v16 = vadd.f32 %v6483_v12, %v7780_v35  ;;  %1312 = vadd.xlane.f32.xlu1 %v1311_v14  ;;  %v1198_v19 = vpop.f32.mrb[39].mxu0  ;;  %v1317_v21 = vsel %vm1043_vm5, %v1293_v10, 0.0  ;;  %v1276_v22 = vsel %vm1244_vm12, %v1194_v2, %v1260_v8  ;;  %v7832_v12 = vstv %s7492_s0 }
 0x3ab   :  { %v1199_v23 = vadd.f32 %v7780_v35, %v1198_v19  ;;  %1318 = vadd.xlane.f32.xlu0 %v1317_v21  ;;  %v1296_v24 = vmul.f32 %v7784_v40, %v1276_v22  ;;  %v1275_v25 = vsel %vm1243_vm13, %v1189_v6, %v1259_v11  ;;  %v7835_v14 = vand.u32 127, %v31_v0 }
 0x3ac   :  { %vm1246_vm14 = vcmp.gt.f32.partialorder %v1204_v16, 0.0  ;;  %v1262_v26 = vmul.f32 0.01, %v1204_v16  ;;  %v1295_v34 = vmul.f32 %v7784_v40, %v1275_v25  ;;  %vm1477_vm12 = vcmask 1045509  }
 0x3ad   :  { %vm1245_vm15 = vcmp.gt.f32.partialorder %v1199_v23, 0.0  ;;  %v1261_v27 = vmul.f32 0.01, %v1199_v23  ;;  %v6486_v28 = vpop.f32.mrb[40].mxu0  ;;  %v1326_v31 = vsel %vm1043_vm5, %v1296_v24, 0.0  ;;  %v7841_v21 = vsub.s32 %v7835_v14, %v7602_v3 }
 0x3ae   :  { %v1214_v9 = vadd.f32 %v6486_v28, %v7780_v35  ;;  %1321 = vadd.xlane.f32.xlu1 %v1320_v29  ;;  %v1208_v32 = vpop.f32.mrb[41].mxu0  ;;  %v1278_v33 = vsel %vm1246_vm14, %v1204_v16, %v1262_v26  ;;  %v1323_v44 = vsel %vm1043_vm5, %v1295_v34, 0.0  ;;  %vm1479_vm13 = vcmask 1046534  }
 0x3af   :  { %v1209_v17 = vadd.f32 %v7780_v35, %v1208_v32  ;;  %1327 = vadd.xlane.f32.xlu0 %v1326_v31  ;;  %v1298_v30 = vmul.f32 %v7784_v40, %v1278_v33  ;;  %v1277_v36 = vsel %vm1245_vm15, %v1199_v23, %v1261_v27  ;;  %vm8619_vm15 = vcmask 1047559  }
 0x3b0   :  { %vm1248_vm0 = vcmp.gt.f32.partialorder %v1214_v9, 0.0  ;;  %v1264_v37 = vmul.f32 0.01, %v1214_v9  ;;  %v1297_v46 = vmul.f32 %v7784_v40, %v1277_v36 }
 0x3b1   :  { %vm1247_vm1 = vcmp.gt.f32.partialorder %v1209_v17, 0.0  ;;  %v1263_v38 = vmul.f32 0.01, %v1209_v17  ;;  %v6489_v39 = vpop.f32.mrb[42].mxu0  ;;  %v1332_v41 = vsel %vm1043_vm5, %v1298_v30, 0.0 }
 0x3b2   :  { %v1224_v42 = vadd.f32 %v6489_v39, %v7780_v35  ;;  %1333 = vadd.xlane.f32.xlu1 %v1332_v41  ;;  %v1218_v43 = vpop.f32.mrb[43].mxu0  ;;  %v1280_v45 = vsel %vm1248_vm0, %v1214_v9, %v1264_v37  ;;  %v1329_v57 = vsel %vm1043_vm5, %v1297_v46, 0.0  ;;  %vm8618_vm0 = vcmask 64512  }
 0x3b3   :  { %v1219_v47 = vadd.f32 %v7780_v35, %v1218_v43  ;;  %1324 = vadd.xlane.f32.xlu0 %v1323_v44  ;;  %v1300_v48 = vmul.f32 %v7784_v40, %v1280_v45  ;;  %v1279_v49 = vsel %vm1247_vm1, %v1209_v17, %v1263_v38 }
 0x3b4   :  { %vm1250_vm3 = vcmp.gt.f32.partialorder %v1224_v42, 0.0  ;;  %v1266_v50 = vmul.f32 0.01, %v1224_v42  ;;  %v1299_v54 = vmul.f32 %v7784_v40, %v1279_v49 }
 0x3b5   :  { %vm1249_vm4 = vcmp.gt.f32.partialorder %v1219_v47, 0.0  ;;  %v1265_v51 = vmul.f32 0.01, %v1219_v47  ;;  %v6492_v52 = vpop.f32.mrb[44].mxu0  ;;  %v1338_v53 = vsel %vm1043_vm5, %v1300_v48, 0.0 }
 0x3b6   :  { %v1234_v55 = vadd.f32 %v6492_v52, %v7780_v35  ;;  %1339 = vadd.xlane.f32.xlu1 %v1338_v53  ;;  %v1228_v56 = vpop.f32.mrb[45].mxu0  ;;  %v1282_v58 = vsel %vm1250_vm3, %v1224_v42, %v1266_v50  ;;  %v1335_v63 = vsel %vm1043_vm5, %v1299_v54, 0.0  ;;  %vm7569_vm3 = vmmov 0  }
 0x3b7   :  { %v1229_v59 = vadd.f32 %v7780_v35, %v1228_v56  ;;  %1330 = vadd.xlane.f32.xlu0 %v1329_v57  ;;  %v1281_v60 = vsel %vm1249_vm4, %v1219_v47, %v1265_v51  ;;  %v1302_v1 = vmul.f32 %v7784_v40, %v1282_v58 }
 0x3b8   :  { %vm1252_vm6 = vcmp.gt.f32.partialorder %v1234_v55, 0.0  ;;  %v1268_v61 = vmul.f32 0.01, %v1234_v55  ;;  %v1301_v62 = vmul.f32 %v7784_v40, %v1281_v60 }
 0x3b9   :  { %vm1251_vm7 = vcmp.gt.f32.partialorder %v1229_v59, 0.0  ;;  %v1267_v18 = vmul.f32 0.01, %v1229_v59  ;;  %v1344_v6 = vsel %vm1043_vm5, %v1302_v1, 0.0 }
 0x3ba   :  { %1336 = vadd.xlane.f32.xlu1 %v1335_v63  ;;  %v1341_v2 = vsel %vm1043_vm5, %v1301_v62, 0.0  ;;  %v1284_v4 = vsel %vm1252_vm6, %v1234_v55, %v1268_v61  ;;  %v38_v55 = vand.u32 7, %v7602_v3 }
 0x3bb   :  { %1342 = vadd.xlane.f32.xlu0 %v1341_v2  ;;  %v1283_v5 = vsel %vm1251_vm7, %v1229_v59, %v1267_v18  ;;  %v1304_v7 = vmul.f32 %v7784_v40, %v1284_v4  ;;  %vm1937_vm7 = vcmask 261248  }
 0x3bc   :  { %v1303_v35 = vmul.f32 %v7784_v40, %v1283_v5  ;;  %vm7875_vm14 = vcmp.eq.s32.totalorder %v38_v55, %v7835_v14 }
 0x3bd   :  { %v1350_v10 = vsel %vm1043_vm5, %v1304_v7, 0.0 }
 0x3be   :  { %1345 = vadd.xlane.f32.xlu1 %v1344_v6  ;;  %v1347_v8 = vsel %vm1043_vm5, %v1303_v35, 0.0 }
 0x3bf   :  { %1348 = vadd.xlane.f32.xlu0 %v1347_v8 }
 0x3c2   :  { %1351 = vadd.xlane.f32.xlu1 %v1350_v10 }
 0x42f   :  { %v1310_v11 = vpop.xlane.xlu0 %1309 }
 0x430   :  { %v1358_v15 = vadd.f32 %v7832_v12, %v1310_v11 }
 0x432   :  { %v5743_v24 = vadd.f32 -1e+08, %v1358_v15  ;;  %v1515_v28 = vrot.slane %v1358_v15, %v7841_v21 }
 0x433   :  { %v1316_v16 = vpop.xlane.xlu1 %1315  ;;  %v1307_v19 = vpop.xlane.xlu0 %1306 }
 0x434   :  { %v1357_v40 = vadd.f32 %v7832_v12, %v1307_v19  ;;  %v1360_v22 = vadd.f32 %v7832_v12, %v1316_v16  ;;  %v1412_v34 = vrot.slane %v5743_v24, %v7841_v21 }
 0x436   :  { %v5742_v23 = vadd.f32 -1e+08, %v1357_v40  ;;  %v1511_v25 = vrot.slane %v1357_v40, %v7841_v21  ;;  %v5745_v29 = vadd.f32 -1e+08, %v1360_v22  ;;  %v1523_v37 = vrot.slane %v1360_v22, %v7841_v21 }
 0x437   :  { %v1313_v26 = vpop.xlane.xlu1 %1312 }
 0x438   :  { %v1359_v0 = vadd.f32 %v7832_v12, %v1313_v26  ;;  %v1319_v27 = vpop.xlane.xlu0 %1318  ;;  %v1408_v31 = vrot.slane %v5742_v23, %v7841_v21  ;;  %v1572_v17 = vsel %vm1469_vm8, %v1515_v28, %v1511_v25  ;;  %v1420_v43 = vrot.slane %v5745_v29, %v7841_v21 }
 0x439   :  { %v1361_v9 = vadd.f32 %v7832_v12, %v1319_v27  ;;  %v33_v23 = vadd.s32 8, %v7602_v3 }
 0x43a   :  { %v5744_v32 = vadd.f32 -1e+08, %v1359_v0  ;;  %v1519_v33 = vrot.slane %v1359_v0, %v7841_v21  ;;  %v1470_v44 = vsel %vm1469_vm8, %v1412_v34, %v1408_v31 }
 0x43b   :  { %v5746_v30 = vadd.f32 -1e+08, %v1361_v9  ;;  %v1322_v36 = vpop.xlane.xlu1 %1321  ;;  %v1527_v45 = vrot.slane %v1361_v9, %v7841_v21 }
 0x43c   :  { %v1416_v38 = vrot.slane %v5744_v32, %v7841_v21  ;;  %v1573_v39 = vsel %vm1471_vm9, %v1519_v33, %v1572_v17  ;;  %v1362_v41 = vadd.f32 %v7832_v12, %v1322_v36  ;;  %v1328_v42 = vpop.xlane.xlu0 %1327 }
 0x43d   :  { %v1574_v47 = vsel %vm1473_vm10, %v1523_v37, %v1573_v39  ;;  %v1364_v49 = vadd.f32 %v7832_v12, %v1328_v42  ;;  %v1424_v50 = vrot.slane %v5746_v30, %v7841_v21 }
 0x43e   :  { %v1472_v46 = vsel %vm1471_vm9, %v1416_v38, %v1470_v44  ;;  %v5747_v48 = vadd.f32 -1e+08, %v1362_v41  ;;  %v1531_v53 = vrot.slane %v1362_v41, %v7841_v21  ;;  %v1575_v56 = vsel %vm1475_vm11, %v1527_v45, %v1574_v47 }
 0x43f   :  { %v1334_v51 = vpop.xlane.xlu1 %1333  ;;  %v1474_v52 = vsel %vm1473_vm10, %v1420_v43, %v1472_v46  ;;  %v5749_v59 = vadd.f32 -1e+08, %v1364_v49  ;;  %v1539_v10 = vrot.slane %v1364_v49, %v7841_v21 }
 0x440   :  { %v1325_v54 = vpop.xlane.xlu0 %1324  ;;  %v1428_v58 = vrot.slane %v5747_v48, %v7841_v21  ;;  %v1366_v60 = vadd.f32 %v7832_v12, %v1334_v51  ;;  %v1476_v61 = vsel %vm1475_vm11, %v1424_v50, %v1474_v52  ;;  %v1576_v1 = vsel %vm1477_vm12, %v1531_v53, %v1575_v56 }
 0x441   :  { %v1363_v57 = vadd.f32 %v7832_v12, %v1325_v54  ;;  %v1436_v8 = vrot.slane %v5749_v59, %v7841_v21  ;;  %v45_v59 = vand.u32 7, %v33_v23 }
 0x442   :  { %v5751_v11 = vadd.f32 -1e+08, %v1366_v60  ;;  %v1478_v15 = vsel %vm1477_vm12, %v1428_v58, %v1476_v61  ;;  %v1547_v28 = vrot.slane %v1366_v60, %v7841_v21 }
 0x443   :  { %v5748_v62 = vadd.f32 -1e+08, %v1363_v57  ;;  %v1535_v18 = vrot.slane %v1363_v57, %v7841_v21  ;;  %v1340_v63 = vpop.xlane.xlu1 %1339  ;;  %vm7924_vm1 = vcmp.eq.s32.totalorder %v45_v59, %v7835_v14  ;;  %v134_v59 = vld [vmem:[#allocation3 + $0x240] sm:$0xff] }
 0x444   :  { %v1368_v2 = vadd.f32 %v7832_v12, %v1340_v63  ;;  %v1331_v4 = vpop.xlane.xlu0 %1330  ;;  %v1444_v32 = vrot.slane %v5751_v11, %v7841_v21 }
 0x445   :  { %v1432_v35 = vrot.slane %v5748_v62, %v7841_v21  ;;  %v1365_v6 = vadd.f32 %v7832_v12, %v1331_v4  ;;  %v1577_v7 = vsel %vm1479_vm13, %v1535_v18, %v1576_v1 }
 0x446   :  { %v5753_v24 = vadd.f32 -1e+08, %v1368_v2  ;;  %v1578_v27 = vsel %vm8619_vm15, %v1539_v10, %v1577_v7  ;;  %v1555_v17 = vrot.slane %v1368_v2, %v7841_v21 }
 0x447   :  { %v5750_v16 = vadd.f32 -1e+08, %v1365_v6  ;;  %v1543_v19 = vrot.slane %v1365_v6, %v7841_v21  ;;  %v1337_v40 = vpop.xlane.xlu1 %1336  ;;  %v1480_v22 = vsel %vm1479_vm13, %v1432_v35, %v1478_v15 }
 0x448   :  { %v1367_v25 = vadd.f32 %v7832_v12, %v1337_v40  ;;  %v1343_v26 = vpop.xlane.xlu0 %1342  ;;  %v1482_v0 = vsel %vm8619_vm15, %v1436_v8, %v1480_v22  ;;  %v1452_v39 = vrot.slane %v5753_v24, %v7841_v21 }
 0x449   :  { %v1440_v29 = vrot.slane %v5750_v16, %v7841_v21  ;;  %v1369_v31 = vadd.f32 %v7832_v12, %v1343_v26  ;;  %v1588_v9 = vsel %vm7875_vm14, %v1482_v0, %v1578_v27  ;;  %v1579_v30 = vsel %vm1469_vm8, %v1547_v28, %v1543_v19  ;;  %v7946_v0 = vld [vmem:[#allocation2] sm:$0xff]  ;;  %v121_v28 = vld [vmem:[#allocation3 + $0x1d8] sm:$0xff] }
 0x44a   :  { %v5752_v3 = vadd.f32 -1e+08, %v1367_v25  ;;  %v1551_v33 = vrot.slane %v1367_v25, %v7841_v21  ;;  %v1591_v34 = vsel %vm8618_vm0, %v1588_v9, -inf  ;;  %v7568_v26 = vmov 0.0   ;;  %v120_v27 = vld [vmem:[#allocation3 + $0x1d0] sm:$0xff] }
 0x44b   :  { %v5754_v36 = vadd.f32 -1e+08, %v1369_v31  ;;  %v1559_v37 = vrot.slane %v1369_v31, %v7841_v21  ;;  %v1346_v38 = vpop.xlane.xlu1 %1345  ;;  %1592 = vmax.xlane.f32.xlu0 %v1591_v34  ;;  %v1483_v45 = vsel %vm1469_vm8, %v1444_v32, %v1440_v29  ;;  %6493 = vmatprep.subr.mxu1 %v7568_v26  ;;  %29 = vst [vmem:[%s8617_s2] sm:$0xff] %v7568_v26  ;;  %30 = vst [vmem:[%s8617_s2 + $0x8] sm:$0xff] %v7568_v26  ;;  %v122_v29 = vld [vmem:[#allocation3 + $0x1e0] sm:$0xff] }
 0x44c   :  { %v1448_v41 = vrot.slane %v5752_v3, %v7841_v21  ;;  %v1580_v42 = vsel %vm1471_vm9, %v1551_v33, %v1579_v30  ;;  %v1370_v43 = vadd.f32 %v7832_v12, %v1346_v38  ;;  %v1349_v44 = vpop.xlane.xlu0 %1348  ;;  %6494 = vmatpush3.msra.mxu1 %v7946_v0  ;;  %6495 = vmatprep.mubr.msk.f32.mxu1 %vm7569_vm3, %v7568_v26  ;;  %v124_v3 = vld [vmem:[#allocation3 + $0x1f0] sm:$0xff]  ;;  %v125_v33 = vld [vmem:[#allocation3 + $0x1f8] sm:$0xff]  ;;  %v127_v30 = vld [vmem:[#allocation3 + $0x208] sm:$0xff] }
 0x44d   :  { %v1581_v46 = vsel %vm1473_vm10, %v1555_v17, %v1580_v42  ;;  %v1456_v47 = vrot.slane %v5754_v36, %v7841_v21  ;;  %v1371_v48 = vadd.f32 %v7832_v12, %v1349_v44  ;;  %6498 = vmatprep.subr.mxu1 %v7568_v26  ;;  %v7141_v31 = vpack.c.bf16 %v121_v28, %v120_v27  ;;  %v126_v17 = vld [vmem:[#allocation3 + $0x200] sm:$0xff]  ;;  %v129_v38 = vld [vmem:[#allocation3 + $0x218] sm:$0xff]  ;;  %v115_v27 = vld [vmem:[#allocation3 + $0x1a8] sm:$0xff] }
 0x44e   :  { %v1484_v49 = vsel %vm1471_vm9, %v1448_v41, %v1483_v45  ;;  %v5755_v50 = vadd.f32 -1e+08, %v1370_v43  ;;  %v1563_v51 = vrot.slane %v1370_v43, %v7841_v21  ;;  %v1582_v53 = vsel %vm1475_vm11, %v1559_v37, %v1581_v46  ;;  %v128_v37 = vld [vmem:[#allocation3 + $0x210] sm:$0xff] }
 0x44f   :  { %v1485_v52 = vsel %vm1473_vm10, %v1452_v39, %v1484_v49  ;;  %v5756_v54 = vadd.f32 -1e+08, %v1371_v48  ;;  %v1352_v55 = vpop.xlane.xlu1 %1351  ;;  %v1567_v61 = vrot.slane %v1371_v48, %v7841_v21  ;;  %7142 = vmatprep.subr.bf16.mxu0 %v7141_v31  ;;  %v7149_v34 = vpack.c.bf16 %v125_v33, %v124_v3  ;;  %v7957_v48 = vld [vmem:[#allocation2 + $0x8] sm:$0xff] }
 0x450   :  { %v1486_v56 = vsel %vm1475_vm11, %v1456_v47, %v1485_v52  ;;  %v1460_v57 = vrot.slane %v5755_v50, %v7841_v21  ;;  %v1372_v58 = vadd.f32 %v7832_v12, %v1352_v55  ;;  %v1583_v62 = vsel %vm1477_vm12, %v1563_v51, %v1582_v53  ;;  %7144 = vmatpush3.bf16.msra.mxu0 %v7141_v31  ;;  %v131_v55 = vld [vmem:[#allocation3 + $0x228] sm:$0xff]  ;;  %v117_v31 = vld [vmem:[#allocation3 + $0x1b8] sm:$0xff] }
 0x451   :  { %v1464_v60 = vrot.slane %v5756_v54, %v7841_v21  ;;  %v1584_v35 = vsel %vm1479_vm13, %v1567_v61, %v1583_v62  ;;  %v7153_v36 = vpack.c.bf16 %v127_v30, %v126_v17  ;;  %v7157_v39 = vpack.c.bf16 %v129_v38, %v128_v37  ;;  %v130_v54 = vld [vmem:[#allocation3 + $0x220] sm:$0xff]  ;;  %v135_v61 = vld [vmem:[#allocation3 + $0x248] sm:$0xff]  ;;  %v1940_v33 = vld [vmem:[#allocation3 + $0x258] sm:$0xff] }
 0x452   :  { %v5757_v18 = vadd.f32 -1e+08, %v1372_v58  ;;  %v1571_v63 = vrot.slane %v1372_v58, %v7841_v21  ;;  %v1487_v1 = vsel %vm1477_vm12, %v1460_v57, %v1486_v56  ;;  %v7161_v56 = vpack.c.bf16 %v131_v55, %v130_v54  ;;  %v132_v57 = vld [vmem:[#allocation3 + $0x230] sm:$0xff]  ;;  %v133_v58 = vld [vmem:[#allocation3 + $0x238] sm:$0xff]  ;;  %v1942_v17 = vld [vmem:[#allocation3 + $0x268] sm:$0xff] }
 0x453   :  { %v1488_v12 = vsel %vm1479_vm13, %v1464_v60, %v1487_v1  ;;  %v7165_v60 = vpack.c.bf16 %v133_v58, %v132_v57  ;;  %v7169_v62 = vpack.c.bf16 %v135_v61, %v134_v59  ;;  %v1944_v38 = vld [vmem:[#allocation3 + $0x278] sm:$0xff]  ;;  %v1954_v57 = vld [vmem:[#allocation3 + $0x2c8] sm:$0xff] }
 0x454   :  { %v1468_v2 = vrot.slane %v5757_v18, %v7841_v21  ;;  %v1585_v7 = vsel %vm8619_vm15, %v1571_v63, %v1584_v35  ;;  %v104_v18 = vld [vmem:[#allocation3 + $0x150] sm:$0xff]  ;;  %v105_v63 = vld [vmem:[#allocation3 + $0x158] sm:$0xff]  ;;  %v106_v35 = vld [vmem:[#allocation3 + $0x160] sm:$0xff] }
 0x455   :  { %v7173_v1 = vpack.c.bf16 %v105_v63, %v104_v18  ;;  %v1952_v55 = vld [vmem:[#allocation3 + $0x2b8] sm:$0xff] }
 0x456   :  { %v1489_v6 = vsel %vm8619_vm15, %v1468_v2, %v1488_v12 }
 0x457   :  { %v1589_v8 = vsel %vm7924_vm1, %v1489_v6, %v1585_v7  ;;  %v107_v6 = vld [vmem:[#allocation3 + $0x168] sm:$0xff] }
 0x458   :  { %v1594_v10 = vsel %vm8618_vm0, %v1589_v8, -inf  ;;  %v7177_v7 = vpack.c.bf16 %v107_v6, %v106_v35  ;;  %v1959_v35 = vld [vmem:[#allocation3 + $0x2f0] sm:$0xff] }
 0x459   :  { %1595 = vmax.xlane.f32.xlu1 %v1594_v10  ;;  %v108_v10 = vld [vmem:[#allocation3 + $0x170] sm:$0xff] }
 0x4d8   :  { %v1593_v11 = vpop.xlane.xlu0 %1592 }
 0x4d9   :  { %v1597_v15 = vsub.f32 %v1588_v9, %v1593_v11  ;;  %v123_v9 = vld [vmem:[#allocation3 + $0x1e8] sm:$0xff]  ;;  %v109_v11 = vld [vmem:[#allocation3 + $0x178] sm:$0xff] }
 0x4da   :  { %v7145_v32 = vpack.c.bf16 %v123_v9, %v122_v29  ;;  %v116_v29 = vld [vmem:[#allocation3 + $0x1b0] sm:$0xff]  ;;  %v118_v9 = vld [vmem:[#allocation3 + $0x1c0] sm:$0xff] }
 0x4db   :  { %v1599_v14 = vmul.f32 1.442695, %v1597_v15 }
 0x4dc   :  { %7146 = vmatprep.subr.bf16.mxu0 %v7145_v32 }
 0x4dd   :  { %7510 = vpow2.f32 %v1599_v14  ;;  %7148 = vmatpush3.bf16.msra.mxu0 %v7145_v32  ;;  %v7181_v14 = vpack.c.bf16 %v109_v11, %v108_v10  ;;  %v119_v32 = vld [vmem:[#allocation3 + $0x1c8] sm:$0xff] }
 0x4de   :  { %7150 = vmatprep.subr.bf16.mxu0 %v7149_v34  ;;  %v7201_v3 = vpack.c.bf16 %v119_v32, %v118_v9 }
 0x4e1   :  { %7152 = vmatpush3.bf16.msra.mxu0 %v7149_v34  ;;  %v1941_v34 = vld [vmem:[#allocation3 + $0x260] sm:$0xff] }
 0x4e2   :  { %7154 = vmatprep.subr.bf16.mxu0 %v7153_v36  ;;  %v7205_v30 = vpack.c.bf16 %v1941_v34, %v1940_v33 }
 0x4e5   :  { %7156 = vmatpush3.bf16.msra.mxu0 %v7153_v36  ;;  %v1943_v36 = vld [vmem:[#allocation3 + $0x270] sm:$0xff] }
 0x4e6   :  { %v1596_v16 = vpop.xlane.xlu1 %1595  ;;  %7158 = vmatprep.subr.bf16.mxu0 %v7157_v39  ;;  %v7209_v37 = vpack.c.bf16 %v1943_v36, %v1942_v17 }
 0x4e7   :  { %v7511_v19 = vpop.eup %7510  ;;  %v1598_v40 = vsub.f32 %v1589_v8, %v1596_v16  ;;  %v110_v16 = vld [vmem:[#allocation3 + $0x180] sm:$0xff] }
 0x4e8   :  { %v1603_v22 = vsel %vm8618_vm0, %v7511_v19, 0.0 }
 0x4e9   :  { %v1601_v23 = vmul.f32 1.442695, %v1598_v40  ;;  %1604 = vadd.xlane.f32.xlu0 %v1603_v22  ;;  %7160 = vmatpush3.bf16.msra.mxu0 %v7157_v39  ;;  %v112_v22 = vld [vmem:[#allocation3 + $0x190] sm:$0xff]  ;;  %v1945_v39 = vld [vmem:[#allocation3 + $0x280] sm:$0xff] }
 0x4ea   :  { %7162 = vmatprep.subr.bf16.mxu0 %v7161_v56 }
 0x4eb   :  { %7512 = vpow2.f32 %v1601_v23  ;;  %v113_v23 = vld [vmem:[#allocation3 + $0x198] sm:$0xff] }
 0x4ed   :  { %7164 = vmatpush3.bf16.msra.mxu0 %v7161_v56  ;;  %v1953_v56 = vld [vmem:[#allocation3 + $0x2c0] sm:$0xff] }
 0x4ee   :  { %7166 = vmatprep.subr.bf16.mxu0 %v7165_v60  ;;  %v7229_v59 = vpack.c.bf16 %v1953_v56, %v1952_v55 }
 0x4f1   :  { %7168 = vmatpush3.bf16.msra.mxu0 %v7165_v60  ;;  %v1955_v60 = vld [vmem:[#allocation3 + $0x2d0] sm:$0xff] }
 0x4f2   :  { %7170 = vmatprep.subr.bf16.mxu0 %v7169_v62  ;;  %v7233_v18 = vpack.c.bf16 %v1955_v60, %v1954_v57 }
 0x4f5   :  { %v7513_v24 = vpop.eup %7512  ;;  %7172 = vmatpush3.bf16.msra.mxu0 %v7169_v62 }
 0x4f6   :  { %v1606_v25 = vsel %vm8618_vm0, %v7513_v24, 0.0  ;;  %7174 = vmatprep.subr.bf16.mxu0 %v7173_v1 }
 0x4f7   :  { %1607 = vadd.xlane.f32.xlu1 %v1606_v25  ;;  %v114_v25 = vld [vmem:[#allocation3 + $0x1a0] sm:$0xff] }
 0x4f8   :  { %v7193_v28 = vpack.c.bf16 %v115_v27, %v114_v25 }
 0x576   :  { %v1605_v41 = vpop.xlane.xlu0 %1604 }
 0x577   :  { %7514 = vrcp.f32 %v1605_v41 }
 0x581   :  { %v7515_v42 = vpop.eup %7514 }
 0x582   :  { %v1611_v43 = vmul.f32 %v7515_v42, %v1605_v41  ;;  %v7213_v41 = vpack.c.bf16 %v1945_v39, %v1944_v38 }
 0x584   :  { %v1613_v44 = vsub.f32 2.0, %v1611_v43  ;;  %v1608_v45 = vpop.xlane.xlu1 %1607  ;;  %v1947_v43 = vld [vmem:[#allocation3 + $0x290] sm:$0xff] }
 0x585   :  { %7516 = vrcp.f32 %v1608_v45 }
 0x586   :  { %v1615_v46 = vmul.f32 %v7515_v42, %v1613_v44  ;;  %v1946_v42 = vld [vmem:[#allocation3 + $0x288] sm:$0xff] }
 0x587   :  { %v7217_v44 = vpack.c.bf16 %v1947_v43, %v1946_v42 }
 0x588   :  { %v1617_v47 = vmul.f32 %v7511_v19, %v1615_v46  ;;  %v111_v19 = vld [vmem:[#allocation3 + $0x188] sm:$0xff]  ;;  %v1949_v46 = vld [vmem:[#allocation3 + $0x2a0] sm:$0xff] }
 0x589   :  { %v7185_v40 = vpack.c.bf16 %v111_v19, %v110_v16 }
 0x58a   :  { %1619 = vst.msk [vmem:[%s8617_s2] sm:$0xff] %vm8618_vm0, %v1617_v47  ;;  %6496 = vmatmul.mubr.msk.f32.vlgmr.msra.gmra.mrb[18].mxu1 %vm8618_vm0, %v1617_v47 }
 0x58b   :  { %6499 = vmatpush3.msra.mxu1 %v7957_v48  ;;  %6500 = vmatprep.mubr.msk.f32.mxu1 %vm7569_vm3, %v7568_v26 }
 0x58c   :  { %7206 = vmatprep.subr.bf16.mxu1 %v7205_v30 }
 0x58f   :  { %v7517_v49 = vpop.eup %7516 }
 0x590   :  { %v1612_v50 = vmul.f32 %v7517_v49, %v1608_v45  ;;  %v1948_v45 = vld [vmem:[#allocation3 + $0x298] sm:$0xff] }
 0x591   :  { %v7221_v47 = vpack.c.bf16 %v1949_v46, %v1948_v45 }
 0x592   :  { %v1614_v51 = vsub.f32 2.0, %v1612_v50  ;;  %v1951_v50 = vld [vmem:[#allocation3 + $0x2b0] sm:$0xff] }
 0x594   :  { %v1616_v52 = vmul.f32 %v7517_v49, %v1614_v51  ;;  %v1950_v49 = vld [vmem:[#allocation3 + $0x2a8] sm:$0xff] }
 0x596   :  { %v1618_v53 = vmul.f32 %v7513_v24, %v1616_v52  ;;  %v7189_v24 = vpack.c.bf16 %v113_v23, %v112_v22  ;;  %v7225_v52 = vpack.c.bf16 %v1951_v50, %v1950_v49 }
 0x598   :  { %1620 = vst.msk [vmem:[%s8617_s2 + $0x8] sm:$0xff] %vm8618_vm0, %v1618_v53  ;;  %6501 = vmatmul.mubr.msk.f32.vlgmr.msra.gmra.mrb[20].mxu1 %vm8618_vm0, %v1618_v53 }
 0x599   :  { %7208 = vmatpush3.bf16.msra.mxu1 %v7205_v30 }
 0x59a   :  { %7210 = vmatprep.subr.bf16.mxu1 %v7209_v37 }
 0x59d   :  { %7212 = vmatpush3.bf16.msra.mxu1 %v7209_v37 }
 0x59e   :  { %7214 = vmatprep.subr.bf16.mxu1 %v7213_v41 }
 0x5a1   :  { %7216 = vmatpush3.bf16.msra.mxu1 %v7213_v41 }
 0x5a2   :  { %7218 = vmatprep.subr.bf16.mxu1 %v7217_v44 }
 0x5a5   :  { %7220 = vmatpush3.bf16.msra.mxu1 %v7217_v44 }
 0x5a6   :  { %7222 = vmatprep.subr.bf16.mxu1 %v7221_v47 }
 0x5a9   :  { %7224 = vmatpush3.bf16.msra.mxu1 %v7221_v47 }
 0x5aa   :  { %7226 = vmatprep.subr.bf16.mxu1 %v7225_v52 }
 0x5ad   :  { %7228 = vmatpush3.bf16.msra.mxu1 %v7225_v52 }
 0x5ae   :  { %7230 = vmatprep.subr.bf16.mxu1 %v7229_v59 }
 0x5b1   :  { %7232 = vmatpush3.bf16.msra.mxu1 %v7229_v59 }
 0x5b2   :  { %7234 = vmatprep.subr.bf16.mxu1 %v7233_v18 }
 0x5b5   :  { %7236 = vmatpush3.bf16.msra.mxu1 %v7233_v18 }
 0x65d   :  { %v1690_v2 = vpop.f32.mrb[18].mxu1 }
 0x65e   :  { %v6497_v12 = vpop.f32.mrb[19].mxu1  ;;  %6535 = vmatprep.mubr.f32.mxu0 %v1690_v2  ;;  %v1957_v2 = vld [vmem:[#allocation3 + $0x2e0] sm:$0xff] }
 0x65f   :  { %v1958_v12 = vld [vmem:[#allocation3 + $0x2e8] sm:$0xff] }
 0x660   :  { %v7237_v6 = vpack.c.bf16 %v1958_v12, %v1957_v2 }
 0x66b   :  { %v1763_v8 = vpop.f32.mrb[20].mxu1 }
 0x66c   :  { %v6502_v15 = vpop.f32.mrb[21].mxu1  ;;  %6536 = vmatmul.mubr.f32.vlgmr.msra.gmra.mrb[46].mxu0 %v1763_v8 }
 0x66d   :  { %7176 = vmatpush3.bf16.msra.mxu0 %v7173_v1  ;;  %6570 = vmatprep.mubr.f32.mxu0 %v7946_v0  ;;  %v7197_v0 = vpack.c.bf16 %v117_v31, %v116_v29 }
 0x66e   :  { %7178 = vmatprep.subr.bf16.mxu0 %v7177_v7 }
 0x671   :  { %7180 = vmatpush3.bf16.msra.mxu0 %v7177_v7  ;;  %v1960_v7 = vld [vmem:[#allocation3 + $0x2f8] sm:$0xff] }
 0x672   :  { %7182 = vmatprep.subr.bf16.mxu0 %v7181_v14  ;;  %v7241_v8 = vpack.c.bf16 %v1960_v7, %v1959_v35 }
 0x675   :  { %7184 = vmatpush3.bf16.msra.mxu0 %v7181_v14 }
 0x676   :  { %7186 = vmatprep.subr.bf16.mxu0 %v7185_v40 }
 0x679   :  { %7188 = vmatpush3.bf16.msra.mxu0 %v7185_v40 }
 0x67a   :  { %7190 = vmatprep.subr.bf16.mxu0 %v7189_v24 }
 0x67d   :  { %7192 = vmatpush3.bf16.msra.mxu0 %v7189_v24 }
 0x67e   :  { %7194 = vmatprep.subr.bf16.mxu0 %v7193_v28 }
 0x681   :  { %7196 = vmatpush3.bf16.msra.mxu0 %v7193_v28 }
 0x682   :  { %7198 = vmatprep.subr.bf16.mxu0 %v7197_v0 }
 0x685   :  { %7200 = vmatpush3.bf16.msra.mxu0 %v7197_v0 }
 0x686   :  { %7202 = vmatprep.subr.bf16.mxu0 %v7201_v3 }
 0x689   :  { %7204 = vmatpush3.bf16.msra.mxu0 %v7201_v3 }
 0x68a   :  { %7238 = vmatprep.subr.bf16.mxu0 %v7237_v6 }
 0x68c   :  { %6571 = vmatmul.mubr.f32.vlgmr.msra.gmra.mrb[46].mxu0 %v7957_v48  ;;  %v5760_v48 = vld [vmem:[#allocation3 + $0x250] ss:$0 sm:$0xff] }
 0x68d   :  { %7240 = vmatpush3.bf16.msra.mxu0 %v7237_v6 }
 0x68e   :  { %7242 = vmatprep.subr.bf16.mxu0 %v7241_v8 }
 0x691   :  { %7244 = vmatpush3.bf16.msra.mxu0 %v7241_v8 }
 0x75f   :  { %v6572_v51 = vpop.f32.mrb[46].mxu0 }
 0x760   :  { %v1922_v53 = vadd.f32 %v6572_v51, %v5760_v48  ;;  %v1908_v54 = vpop.f32.mrb[47].mxu0 }
 0x761   :  { %v1921_v58 = vadd.f32 %v5760_v48, %v1908_v54 }
 0x762   :  { %v1926_v61 = vmul.f32 0.01, %v1922_v53  ;;  %vm1924_vm4 = vcmp.gt.f32.partialorder %v1922_v53, 0.0 }
 0x763   :  { %v1925_v62 = vmul.f32 0.01, %v1921_v58  ;;  %vm1923_vm6 = vcmp.gt.f32.partialorder %v1921_v58, 0.0 }
 0x764   :  { %v1928_v63 = vsel %vm1924_vm4, %v1922_v53, %v1926_v61 }
 0x765   :  { %1933 = vrot.lane.b32.xlu1 %v1928_v63, %s7570_s6  ;;  %v1927_v1 = vsel %vm1923_vm6, %v1921_v58, %v1925_v62 }
 0x766   :  { %1931 = vrot.lane.b32.xlu0 %v1927_v1, %s7570_s6 }
 0x7d7   :  { %v1934_v10 = vpop.permute.xlu1 %1933 }
 0x7d8   :  { %1939 = vst.msk [vmem:[#allocation2 + $0x8] sm:$0xff] %vm1937_vm7, %v1934_v10  ;;  %v1932_v11 = vpop.permute.xlu0 %1931 }
 0x7d9   :  { %1938 = vst.msk [vmem:[#allocation2] sm:$0xff] %vm1937_vm7, %v1932_v11 }
 0x7df   :  { %v7977_v19 = vld [vmem:[#allocation2 + $0x8] sm:$0xff] }
 0x7e0   :  { %v7971_v15 = vld [vmem:[#allocation2] sm:$0xff]  ;;  %v2075_v31 = vrot.slane %v7977_v19, %v7605_v13  ;;  %v2068_v42 = vcombine.high %v7977_v19, %v7977_v19 }
 0x7e1   :  { %v2026_v14 = vrot.slane %v7971_v15, %v7605_v13  ;;  %v2019_v16 = vcombine.high %v7971_v15, %v7971_v15 }
 0x7e2   :  { %v2083_v41 = vcombine.high %v2075_v31, %v2075_v31  ;;  %v2091_v49 = vrot.slane %v2075_v31, %v7605_v13  ;;  %v2082_v54 = vrot.slane %v2068_v42, %v7605_v13  ;;  %v1966_v42 = vld [vmem:[#allocation3 + $0x328] sm:$0xff] }
 0x7e3   :  { %v2034_v40 = vcombine.high %v2026_v14, %v2026_v14  ;;  %v2042_v22 = vrot.slane %v2026_v14, %v7605_v13  ;;  %v2033_v23 = vrot.slane %v2019_v16, %v7605_v13 }
 0x7e4   :  { %v2105_v50 = vrot.slane %v2083_v41, %v7605_v13  ;;  %v2152_v57 = vrot.slane %v2091_v49, %v7621_v20  ;;  %v2113_v58 = vcombine.high %v2091_v49, %v2091_v49  ;;  %v2084_v18 = vcombine.high %v2082_v54, %v2082_v54 }
 0x7e5   :  { %v2120_v24 = vrot.slane %v2042_v22, %v7621_v20  ;;  %v2056_v25 = vrot.slane %v2034_v40, %v7605_v13  ;;  %v2064_v27 = vcombine.high %v2042_v22, %v2042_v22  ;;  %v2049_v28 = vrot.slane %v2033_v23, %v7605_v13 }
 0x7e6   :  { %v2035_v29 = vcombine.high %v2033_v23, %v2033_v23  ;;  %v2156_v59 = vrot.slane %v2105_v50, %v7621_v20  ;;  %v2115_v62 = vcombine.high %v2105_v50, %v2105_v50  ;;  %v2205_v1 = vsub.f32 %v2152_v57, %v7977_v19  ;;  %v1972_v50 = vld [vmem:[#allocation3 + $0x358] sm:$0xff] }
 0x7e7   :  { %v2197_v0 = vsub.f32 %v2120_v24, %v7971_v15  ;;  %v2124_v9 = vrot.slane %v2056_v25, %v7621_v20  ;;  %v2128_v32 = vrot.slane %v2064_v27, %v7621_v20  ;;  %v2066_v3 = vcombine.high %v2056_v25, %v2056_v25 }
 0x7e8   :  { %v2136_v33 = vrot.slane %v2049_v28, %v7621_v20  ;;  %v2063_v34 = vrot.slane %v2035_v29, %v7605_v13  ;;  %v2065_v17 = vcombine.high %v2049_v28, %v2049_v28  ;;  %v2160_v2 = vrot.slane %v2113_v58, %v7621_v20 }
 0x7e9   :  { %v2213_v30 = vand.u32 2147483647, %v2197_v0  ;;  %v2198_v36 = vsub.f32 %v2124_v9, %v7971_v15  ;;  %v2199_v37 = vsub.f32 %v2128_v32, %v7971_v15  ;;  %v2132_v38 = vrot.slane %v2066_v3, %v7621_v20 }
 0x7ea   :  { %v2140_v39 = vrot.slane %v2063_v34, %v7621_v20  ;;  %v2067_v46 = vcombine.high %v2063_v34, %v2063_v34  ;;  %v2201_v47 = vsub.f32 %v2136_v33, %v7971_v15  ;;  %v2144_v48 = vrot.slane %v2065_v17, %v7621_v20 }
 0x7eb   :  { %6605 = vmatprep.mubr.f32.mxu1 %v2213_v30  ;;  %v2214_v43 = vand.u32 2147483647, %v2198_v36  ;;  %v2215_v44 = vand.u32 2147483647, %v2199_v37  ;;  %v2200_v45 = vsub.f32 %v2132_v38, %v7971_v15  ;;  %v2098_v12 = vrot.slane %v2082_v54, %v7605_v13  ;;  %v1961_v30 = vld [vmem:[#allocation3 + $0x300] sm:$0xff]  ;;  %v1962_v36 = vld [vmem:[#allocation3 + $0x308] sm:$0xff] }
 0x7ec   :  { %v2202_v52 = vsub.f32 %v2140_v39, %v7971_v15  ;;  %v2148_v53 = vrot.slane %v2067_v46, %v7621_v20  ;;  %v2217_v55 = vand.u32 2147483647, %v2201_v47  ;;  %v2203_v56 = vsub.f32 %v2144_v48, %v7971_v15  ;;  %v1963_v38 = vld [vmem:[#allocation3 + $0x310] sm:$0xff]  ;;  %v1964_v39 = vld [vmem:[#allocation3 + $0x318] sm:$0xff]  ;;  %v1970_v47 = vld [vmem:[#allocation3 + $0x348] sm:$0xff] }
 0x7ed   :  { %6606 = vmatmul.mubr.f32.vlgmr.msra.gmra.mrb[22].mxu1 %v2214_v43  ;;  %v2216_v51 = vand.u32 2147483647, %v2200_v45  ;;  %v2206_v6 = vsub.f32 %v2156_v59, %v7977_v19  ;;  %v2164_v7 = vrot.slane %v2115_v62, %v7621_v20  ;;  %v2112_v8 = vrot.slane %v2084_v18, %v7605_v13  ;;  %v1967_v43 = vld [vmem:[#allocation3 + $0x330] sm:$0xff] }
 0x7ee   :  { %6608 = vmatprep.mubr.f32.mxu1 %v2215_v44  ;;  %v2218_v60 = vand.u32 2147483647, %v2202_v52  ;;  %v2204_v61 = vsub.f32 %v2148_v53, %v7971_v15  ;;  %v2219_v63 = vand.u32 2147483647, %v2203_v56  ;;  %v2221_v10 = vand.u32 2147483647, %v2205_v1 }
 0x7ef   :  { %v2207_v11 = vsub.f32 %v2160_v2, %v7977_v19  ;;  %v2168_v14 = vrot.slane %v2098_v12, %v7621_v20  ;;  %v2114_v16 = vcombine.high %v2098_v12, %v2098_v12  ;;  %v2222_v40 = vand.u32 2147483647, %v2206_v6  ;;  %v1968_v44 = vld [vmem:[#allocation3 + $0x338] sm:$0xff]  ;;  %v1971_v48 = vld [vmem:[#allocation3 + $0x350] sm:$0xff] }
 0x7f0   :  { %v2220_v35 = vand.u32 2147483647, %v2204_v61  ;;  %v2208_v22 = vsub.f32 %v2164_v7, %v7977_v19  ;;  %v2172_v23 = vrot.slane %v2112_v8, %v7621_v20  ;;  %v2116_v24 = vcombine.high %v2112_v8, %v2112_v8  ;;  %v8026_v53 = vld [vmem:[#allocation3 + $0x2d8] ss:$0 sm:$0xff] }
 0x7f1   :  { %6609 = vmatmul.mubr.f32.gmra.mrb[24].mxu1 %v2216_v51  ;;  %v2223_v25 = vand.u32 2147483647, %v2207_v11  ;;  %v2209_v27 = vsub.f32 %v2168_v14, %v7977_v19  ;;  %v2176_v28 = vrot.slane %v2114_v16, %v7621_v20  ;;  %v7245_v37 = vpack.c.bf16 %v1962_v36, %v1961_v30  ;;  %v1973_v51 = vld [vmem:[#allocation3 + $0x360] sm:$0xff] }
 0x7f2   :  { %6611 = vmatprep.mubr.f32.mxu1 %v2217_v55  ;;  %v2224_v29 = vand.u32 2147483647, %v2208_v22  ;;  %v2210_v31 = vsub.f32 %v2172_v23, %v7977_v19  ;;  %v2180_v0 = vrot.slane %v2116_v24, %v7621_v20  ;;  %v7249_v41 = vpack.c.bf16 %v1964_v39, %v1963_v38 }
 0x7f3   :  { %v2225_v9 = vand.u32 2147483647, %v2209_v27  ;;  %v2211_v32 = vsub.f32 %v2176_v28, %v7977_v19  ;;  %7246 = vmatprep.subr.bf16.mxu0 %v7245_v37  ;;  %v7253_v45 = vpack.c.bf16 %v1967_v43, %v1966_v42  ;;  %v7261_v49 = vpack.c.bf16 %v1971_v48, %v1970_v47 }
 0x7f4   :  { %v2226_v3 = vand.u32 2147483647, %v2210_v31  ;;  %v2212_v33 = vsub.f32 %v2180_v0, %v7977_v19  ;;  %7248 = vmatpush3.bf16.msra.mxu0 %v7245_v37  ;;  %v1969_v19 = vld [vmem:[#allocation3 + $0x340] sm:$0xff]  ;;  %v7265_v52 = vpack.c.bf16 %v1973_v51, %v1972_v50 }
 0x7f5   :  { %6612 = vmatmul.mubr.f32.gmra.mrb[26].mxu1 %v2218_v60  ;;  %v2227_v34 = vand.u32 2147483647, %v2211_v32  ;;  %7250 = vmatprep.subr.bf16.mxu0 %v7249_v41  ;;  %v7257_v46 = vpack.c.bf16 %v1969_v19, %v1968_v44 }
 0x7f6   :  { %6614 = vmatprep.mubr.f32.mxu1 %v2219_v63  ;;  %v2228_v17 = vand.u32 2147483647, %v2212_v33  ;;  %7254 = vmatprep.subr.bf16.mxu1 %v7253_v45 }
 0x7f7   :  { %7256 = vmatpush3.bf16.msra.mxu1 %v7253_v45 }
 0x7f8   :  { %7252 = vmatpush3.bf16.msra.mxu0 %v7249_v41  ;;  %7258 = vmatprep.subr.bf16.mxu1 %v7257_v46 }
 0x7f9   :  { %6615 = vmatmul.mubr.f32.gmra.mrb[28].mxu1 %v2220_v35 }
 0x7fa   :  { %6617 = vmatprep.mubr.f32.mxu1 %v2221_v10 }
 0x7fb   :  { %7260 = vmatpush3.bf16.msra.mxu1 %v7257_v46 }
 0x7fc   :  { %7262 = vmatprep.subr.bf16.mxu1 %v7261_v49 }
 0x7fd   :  { %6618 = vmatmul.mubr.f32.gmra.mrb[30].mxu1 %v2222_v40 }
 0x7fe   :  { %6620 = vmatprep.mubr.f32.mxu1 %v2223_v25 }
 0x7ff   :  { %7264 = vmatpush3.bf16.msra.mxu1 %v7261_v49 }
 0x800   :  { %7266 = vmatprep.subr.bf16.mxu1 %v7265_v52 }
 0x801   :  { %6621 = vmatmul.mubr.f32.gmra.mrb[32].mxu1 %v2224_v29 }
 0x802   :  { %6623 = vmatprep.mubr.f32.mxu1 %v2225_v9 }
 0x803   :  { %7268 = vmatpush3.bf16.msra.mxu1 %v7265_v52 }
 0x804   :  { %6741 = vmatprep.subr.mxu1 %v7568_v26 }
 0x805   :  { %6624 = vmatmul.mubr.f32.gmra.mrb[34].mxu1 %v2226_v3 }
 0x806   :  { %6626 = vmatprep.mubr.f32.mxu1 %v2227_v34 }
 0x809   :  { %6627 = vmatmul.mubr.f32.gmra.mrb[36].mxu1 %v2228_v17 }
 0x8c0   :  { %v6607_v54 = vpop.f32.mrb[22].mxu1 }
 0x8c1   :  { %v2305_v55 = vadd.f32 %v6607_v54, %v8026_v53  ;;  %v2299_v56 = vpop.f32.mrb[23].mxu1 }
 0x8c2   :  { %v2300_v57 = vadd.f32 %v8026_v53, %v2299_v56 }
 0x8c3   :  { %v2395_v58 = vmul.f32 0.01, %v2305_v55  ;;  %vm2379_vm4 = vcmp.gt.f32.partialorder %v2305_v55, 0.0 }
 0x8c4   :  { %vm2378_vm6 = vcmp.gt.f32.partialorder %v2300_v57, 0.0  ;;  %v2394_v59 = vmul.f32 0.01, %v2300_v57  ;;  %v6610_v60 = vpop.f32.mrb[24].mxu1 }
 0x8c5   :  { %v2315_v61 = vadd.f32 %v6610_v60, %v8026_v53  ;;  %v2309_v62 = vpop.f32.mrb[25].mxu1  ;;  %v2411_v1 = vsel %vm2379_vm4, %v2305_v55, %v2395_v58 }
 0x8c6   :  { %v2310_v18 = vadd.f32 %v8026_v53, %v2309_v62  ;;  %v2410_v63 = vsel %vm2378_vm6, %v2300_v57, %v2394_v59  ;;  %v1975_v62 = vld [vmem:[#allocation3 + $0x370] sm:$0xff] }
 0x8c7   :  { %v2397_v2 = vmul.f32 0.01, %v2315_v61  ;;  %6645 = vmatprep.mubr.msk.f32.mxu0 %vm552_vm2, %v2410_v63  ;;  %vm2381_vm7 = vcmp.gt.f32.partialorder %v2315_v61, 0.0  ;;  %v1977_v63 = vld [vmem:[#allocation3 + $0x380] sm:$0xff] }
 0x8c8   :  { %vm2380_vm0 = vcmp.gt.f32.partialorder %v2310_v18, 0.0  ;;  %v2396_v12 = vmul.f32 0.01, %v2310_v18  ;;  %v6613_v35 = vpop.f32.mrb[26].mxu1  ;;  %6646 = vmatmul.mubr.msk.f32.vlgmr.msra.gmra.mrb[48].mxu0 %vm552_vm2, %v2411_v1  ;;  %v1978_v1 = vld [vmem:[#allocation3 + $0x388] sm:$0xff] }
 0x8c9   :  { %v2325_v6 = vadd.f32 %v6613_v35, %v8026_v53  ;;  %v2319_v7 = vpop.f32.mrb[27].mxu1  ;;  %v2413_v14 = vsel %vm2381_vm7, %v2315_v61, %v2397_v2  ;;  %v7273_v2 = vpack.c.bf16 %v1978_v1, %v1977_v63 }
 0x8ca   :  { %v2320_v8 = vadd.f32 %v8026_v53, %v2319_v7  ;;  %v2412_v10 = vsel %vm2380_vm0, %v2310_v18, %v2396_v12  ;;  %v1976_v18 = vld [vmem:[#allocation3 + $0x378] sm:$0xff]  ;;  %v8060_v12 = vld [vmem:[#allocation3 + $0x320] ss:$0 sm:$0xff] }
 0x8cb   :  { %v2399_v11 = vmul.f32 0.01, %v2325_v6  ;;  %6648 = vmatprep.mubr.msk.f32.mxu0 %vm552_vm2, %v2412_v10  ;;  %vm2383_vm4 = vcmp.gt.f32.partialorder %v2325_v6, 0.0 }
 0x8cc   :  { %vm2382_vm6 = vcmp.gt.f32.partialorder %v2320_v8, 0.0  ;;  %v2398_v16 = vmul.f32 0.01, %v2320_v8  ;;  %v6616_v40 = vpop.f32.mrb[28].mxu1  ;;  %6649 = vmatmul.mubr.msk.f32.gmra.mrb[50].mxu0 %vm552_vm2, %v2413_v14 }
 0x8cd   :  { %v2335_v22 = vadd.f32 %v6616_v40, %v8026_v53  ;;  %v2329_v23 = vpop.f32.mrb[29].mxu1  ;;  %v2415_v28 = vsel %vm2383_vm4, %v2325_v6, %v2399_v11 }
 0x8ce   :  { %v2330_v24 = vadd.f32 %v8026_v53, %v2329_v23  ;;  %v2414_v25 = vsel %vm2382_vm6, %v2320_v8, %v2398_v16 }
 0x8cf   :  { %v2401_v27 = vmul.f32 0.01, %v2335_v22  ;;  %6651 = vmatprep.mubr.msk.f32.mxu0 %vm552_vm2, %v2414_v25  ;;  %vm2385_vm0 = vcmp.gt.f32.partialorder %v2335_v22, 0.0 }
 0x8d0   :  { %vm2384_vm15 = vcmp.gt.f32.partialorder %v2330_v24, 0.0  ;;  %v2400_v29 = vmul.f32 0.01, %v2330_v24  ;;  %v6619_v31 = vpop.f32.mrb[30].mxu1  ;;  %6652 = vmatmul.mubr.msk.f32.gmra.mrb[52].mxu0 %vm552_vm2, %v2415_v28 }
 0x8d1   :  { %v2345_v0 = vadd.f32 %v6619_v31, %v8026_v53  ;;  %v2339_v9 = vpop.f32.mrb[31].mxu1  ;;  %v2417_v34 = vsel %vm2385_vm0, %v2335_v22, %v2401_v27 }
 0x8d2   :  { %v2340_v32 = vadd.f32 %v8026_v53, %v2339_v9  ;;  %v2416_v3 = vsel %vm2384_vm15, %v2330_v24, %v2400_v29 }
 0x8d3   :  { %v2403_v33 = vmul.f32 0.01, %v2345_v0  ;;  %6654 = vmatprep.mubr.msk.f32.mxu0 %vm552_vm2, %v2416_v3  ;;  %vm2387_vm7 = vcmp.gt.f32.partialorder %v2345_v0, 0.0 }
 0x8d4   :  { %vm2386_vm6 = vcmp.gt.f32.partialorder %v2340_v32, 0.0  ;;  %v2402_v17 = vmul.f32 0.01, %v2340_v32  ;;  %v6622_v30 = vpop.f32.mrb[32].mxu1  ;;  %6655 = vmatmul.mubr.msk.f32.gmra.mrb[54].mxu0 %vm552_vm2, %v2417_v34 }
 0x8d5   :  { %v2355_v36 = vadd.f32 %v6622_v30, %v8026_v53  ;;  %v2349_v37 = vpop.f32.mrb[33].mxu1  ;;  %v2419_v42 = vsel %vm2387_vm7, %v2345_v0, %v2403_v33 }
 0x8d6   :  { %v2350_v38 = vadd.f32 %v8026_v53, %v2349_v37  ;;  %v2418_v39 = vsel %vm2386_vm6, %v2340_v32, %v2402_v17 }
 0x8d7   :  { %v2405_v41 = vmul.f32 0.01, %v2355_v36  ;;  %6657 = vmatprep.mubr.msk.f32.mxu0 %vm552_vm2, %v2418_v39  ;;  %vm2389_vm15 = vcmp.gt.f32.partialorder %v2355_v36, 0.0 }
 0x8d8   :  { %vm2388_vm4 = vcmp.gt.f32.partialorder %v2350_v38, 0.0  ;;  %v2404_v43 = vmul.f32 0.01, %v2350_v38  ;;  %v6625_v44 = vpop.f32.mrb[34].mxu1  ;;  %6658 = vmatmul.mubr.msk.f32.gmra.mrb[56].mxu0 %vm552_vm2, %v2419_v42 }
 0x8d9   :  { %v2365_v45 = vadd.f32 %v6625_v44, %v8026_v53  ;;  %v2359_v19 = vpop.f32.mrb[35].mxu1  ;;  %v2421_v49 = vsel %vm2389_vm15, %v2355_v36, %v2405_v41 }
 0x8da   :  { %v2360_v46 = vadd.f32 %v8026_v53, %v2359_v19  ;;  %v2420_v47 = vsel %vm2388_vm4, %v2350_v38, %v2404_v43 }
 0x8db   :  { %v2407_v48 = vmul.f32 0.01, %v2365_v45  ;;  %6660 = vmatprep.mubr.msk.f32.mxu0 %vm552_vm2, %v2420_v47  ;;  %vm2391_vm0 = vcmp.gt.f32.partialorder %v2365_v45, 0.0 }
 0x8dc   :  { %vm2390_vm6 = vcmp.gt.f32.partialorder %v2360_v46, 0.0  ;;  %v2406_v50 = vmul.f32 0.01, %v2360_v46  ;;  %v6628_v51 = vpop.f32.mrb[36].mxu1  ;;  %6661 = vmatmul.mubr.msk.f32.gmra.mrb[58].mxu0 %vm552_vm2, %v2421_v49 }
 0x8dd   :  { %v2375_v52 = vadd.f32 %v6628_v51, %v8026_v53  ;;  %v2369_v54 = vpop.f32.mrb[37].mxu1  ;;  %v2423_v58 = vsel %vm2391_vm0, %v2365_v45, %v2407_v48 }
 0x8de   :  { %v2370_v55 = vadd.f32 %v8026_v53, %v2369_v54  ;;  %v2422_v56 = vsel %vm2390_vm6, %v2360_v46, %v2406_v50  ;;  %v7269_v53 = vpack.c.bf16 %v1976_v18, %v1975_v62 }
 0x8df   :  { %v2409_v57 = vmul.f32 0.01, %v2375_v52  ;;  %6663 = vmatprep.mubr.msk.f32.mxu0 %vm552_vm2, %v2422_v56  ;;  %vm2393_vm7 = vcmp.gt.f32.partialorder %v2375_v52, 0.0 }
 0x8e0   :  { %vm2392_vm4 = vcmp.gt.f32.partialorder %v2370_v55, 0.0  ;;  %v2408_v59 = vmul.f32 0.01, %v2370_v55  ;;  %6664 = vmatmul.mubr.msk.f32.gmra.mrb[60].mxu0 %vm552_vm2, %v2423_v58  ;;  %7270 = vmatprep.subr.bf16.mxu0 %v7269_v53 }
 0x8e1   :  { %v2425_v61 = vsel %vm2393_vm7, %v2375_v52, %v2409_v57  ;;  %7272 = vmatpush3.bf16.msra.mxu0 %v7269_v53 }
 0x8e2   :  { %v2424_v60 = vsel %vm2392_vm4, %v2370_v55, %v2408_v59  ;;  %7274 = vmatprep.subr.bf16.mxu0 %v7273_v2 }
 0x8e3   :  { %6666 = vmatprep.mubr.msk.f32.mxu0 %vm552_vm2, %v2424_v60 }
 0x8e4   :  { %6667 = vmatmul.mubr.msk.f32.gmra.mrb[62].mxu0 %vm552_vm2, %v2425_v61 }
 0x8e5   :  { %7276 = vmatpush3.bf16.msra.mxu0 %v7273_v2 }
 0x99b   :  { %v6647_v35 = vpop.f32.mrb[48].mxu0 }
 0x99c   :  { %v2550_v6 = vadd.f32 %v6647_v35, %v8060_v12  ;;  %v2544_v7 = vpop.f32.mrb[49].mxu0 }
 0x99d   :  { %v2545_v8 = vadd.f32 %v8060_v12, %v2544_v7 }
 0x99e   :  { %v2640_v10 = vmul.f32 0.01, %v2550_v6  ;;  %vm2624_vm15 = vcmp.gt.f32.partialorder %v2550_v6, 0.0 }
 0x99f   :  { %vm2623_vm0 = vcmp.gt.f32.partialorder %v2545_v8, 0.0  ;;  %v2639_v11 = vmul.f32 0.01, %v2545_v8  ;;  %v6650_v14 = vpop.f32.mrb[50].mxu0 }
 0x9a0   :  { %v2560_v16 = vadd.f32 %v6650_v14, %v8060_v12  ;;  %v2554_v40 = vpop.f32.mrb[51].mxu0  ;;  %v2656_v24 = vsel %vm2624_vm15, %v2550_v6, %v2640_v10 }
 0x9a1   :  { %v2555_v22 = vadd.f32 %v8060_v12, %v2554_v40  ;;  %v2655_v23 = vsel %vm2623_vm0, %v2545_v8, %v2639_v11 }
 0x9a2   :  { %v2642_v25 = vmul.f32 0.01, %v2560_v16  ;;  %6685 = vmatprep.mubr.msk.f32.mxu1 %vm552_vm2, %v2655_v23  ;;  %vm2626_vm6 = vcmp.gt.f32.partialorder %v2560_v16, 0.0 }
 0x9a3   :  { %vm2625_vm7 = vcmp.gt.f32.partialorder %v2555_v22, 0.0  ;;  %v2641_v27 = vmul.f32 0.01, %v2555_v22  ;;  %v6653_v28 = vpop.f32.mrb[52].mxu0  ;;  %6686 = vmatmul.mubr.msk.f32.vlgmr.msra.gmra.mrb[38].mxu1 %vm552_vm2, %v2656_v24 }
 0x9a4   :  { %v2570_v29 = vadd.f32 %v6653_v28, %v8060_v12  ;;  %6742 = vmatpush3.msra.mxu1 %v7971_v15  ;;  %v2564_v31 = vpop.f32.mrb[53].mxu0  ;;  %v2658_v3 = vsel %vm2626_vm6, %v2560_v16, %v2642_v25 }
 0x9a5   :  { %v2565_v0 = vadd.f32 %v8060_v12, %v2564_v31  ;;  %v2657_v9 = vsel %vm2625_vm7, %v2555_v22, %v2641_v27  ;;  %6746 = vmatprep.subr.mxu1 %v7568_v26 }
 0x9a6   :  { %v2644_v32 = vmul.f32 0.01, %v2570_v29  ;;  %6688 = vmatprep.mubr.msk.f32.mxu1 %vm552_vm2, %v2657_v9  ;;  %vm2628_vm4 = vcmp.gt.f32.partialorder %v2570_v29, 0.0 }
 0x9a7   :  { %vm2627_vm15 = vcmp.gt.f32.partialorder %v2565_v0, 0.0  ;;  %v2643_v33 = vmul.f32 0.01, %v2565_v0  ;;  %v6656_v34 = vpop.f32.mrb[54].mxu0  ;;  %6689 = vmatmul.mubr.msk.f32.gmra.mrb[40].mxu1 %vm552_vm2, %v2658_v3 }
 0x9a8   :  { %v2580_v17 = vadd.f32 %v6656_v34, %v8060_v12  ;;  %v2574_v30 = vpop.f32.mrb[55].mxu0  ;;  %v2660_v38 = vsel %vm2628_vm4, %v2570_v29, %v2644_v32 }
 0x9a9   :  { %v2575_v15 = vadd.f32 %v8060_v12, %v2574_v30  ;;  %v2659_v36 = vsel %vm2627_vm15, %v2565_v0, %v2643_v33 }
 0x9aa   :  { %v2646_v37 = vmul.f32 0.01, %v2580_v17  ;;  %6691 = vmatprep.mubr.msk.f32.mxu1 %vm552_vm2, %v2659_v36  ;;  %vm2630_vm0 = vcmp.gt.f32.partialorder %v2580_v17, 0.0 }
 0x9ab   :  { %vm2629_vm7 = vcmp.gt.f32.partialorder %v2575_v15, 0.0  ;;  %v2645_v39 = vmul.f32 0.01, %v2575_v15  ;;  %v6659_v41 = vpop.f32.mrb[56].mxu0  ;;  %6692 = vmatmul.mubr.msk.f32.gmra.mrb[42].mxu1 %vm552_vm2, %v2660_v38 }
 0x9ac   :  { %v2590_v42 = vadd.f32 %v6659_v41, %v8060_v12  ;;  %v2584_v43 = vpop.f32.mrb[57].mxu0  ;;  %v2662_v46 = vsel %vm2630_vm0, %v2580_v17, %v2646_v37 }
 0x9ad   :  { %v2585_v44 = vadd.f32 %v8060_v12, %v2584_v43  ;;  %v2661_v45 = vsel %vm2629_vm7, %v2575_v15, %v2645_v39 }
 0x9ae   :  { %v2648_v19 = vmul.f32 0.01, %v2590_v42  ;;  %6694 = vmatprep.mubr.msk.f32.mxu1 %vm552_vm2, %v2661_v45  ;;  %vm2632_vm6 = vcmp.gt.f32.partialorder %v2590_v42, 0.0 }
 0x9af   :  { %vm2631_vm15 = vcmp.gt.f32.partialorder %v2585_v44, 0.0  ;;  %v2647_v47 = vmul.f32 0.01, %v2585_v44  ;;  %v6662_v48 = vpop.f32.mrb[58].mxu0  ;;  %6695 = vmatmul.mubr.msk.f32.gmra.mrb[44].mxu1 %vm552_vm2, %v2662_v46 }
 0x9b0   :  { %v2600_v49 = vadd.f32 %v6662_v48, %v8060_v12  ;;  %v2594_v50 = vpop.f32.mrb[59].mxu0  ;;  %v2664_v55 = vsel %vm2632_vm6, %v2590_v42, %v2648_v19 }
 0x9b1   :  { %v2595_v51 = vadd.f32 %v8060_v12, %v2594_v50  ;;  %v2663_v52 = vsel %vm2631_vm15, %v2585_v44, %v2647_v47 }
 0x9b2   :  { %v2650_v54 = vmul.f32 0.01, %v2600_v49  ;;  %6697 = vmatprep.mubr.msk.f32.mxu1 %vm552_vm2, %v2663_v52  ;;  %vm2634_vm4 = vcmp.gt.f32.partialorder %v2600_v49, 0.0 }
 0x9b3   :  { %vm2633_vm7 = vcmp.gt.f32.partialorder %v2595_v51, 0.0  ;;  %v2649_v56 = vmul.f32 0.01, %v2595_v51  ;;  %v6665_v57 = vpop.f32.mrb[60].mxu0  ;;  %6698 = vmatmul.mubr.msk.f32.gmra.mrb[46].mxu1 %vm552_vm2, %v2664_v55 }
 0x9b4   :  { %v2610_v58 = vadd.f32 %v6665_v57, %v8060_v12  ;;  %v2604_v59 = vpop.f32.mrb[61].mxu0  ;;  %v2666_v18 = vsel %vm2634_vm4, %v2600_v49, %v2650_v54 }
 0x9b5   :  { %v2605_v60 = vadd.f32 %v8060_v12, %v2604_v59  ;;  %v2665_v61 = vsel %vm2633_vm7, %v2595_v51, %v2649_v56 }
 0x9b6   :  { %v2652_v62 = vmul.f32 0.01, %v2610_v58  ;;  %6700 = vmatprep.mubr.msk.f32.mxu1 %vm552_vm2, %v2665_v61  ;;  %vm2636_vm0 = vcmp.gt.f32.partialorder %v2610_v58, 0.0 }
 0x9b7   :  { %vm2635_vm15 = vcmp.gt.f32.partialorder %v2605_v60, 0.0  ;;  %v2651_v63 = vmul.f32 0.01, %v2605_v60  ;;  %v6668_v53 = vpop.f32.mrb[62].mxu0  ;;  %6701 = vmatmul.mubr.msk.f32.gmra.mrb[48].mxu1 %vm552_vm2, %v2666_v18 }
 0x9b8   :  { %v2620_v1 = vadd.f32 %v6668_v53, %v8060_v12  ;;  %v2614_v2 = vpop.f32.mrb[63].mxu0  ;;  %v2668_v8 = vsel %vm2636_vm0, %v2610_v58, %v2652_v62 }
 0x9b9   :  { %v2615_v35 = vadd.f32 %v8060_v12, %v2614_v2  ;;  %v2667_v6 = vsel %vm2635_vm15, %v2605_v60, %v2651_v63  ;;  %v8098_v12 = vld [vmem:[#allocation3 + $0x368] ss:$0 sm:$0xff] }
 0x9ba   :  { %v2654_v7 = vmul.f32 0.01, %v2620_v1  ;;  %6703 = vmatprep.mubr.msk.f32.mxu1 %vm552_vm2, %v2667_v6  ;;  %vm2638_vm6 = vcmp.gt.f32.partialorder %v2620_v1, 0.0 }
 0x9bb   :  { %vm2637_vm7 = vcmp.gt.f32.partialorder %v2615_v35, 0.0  ;;  %v2653_v10 = vmul.f32 0.01, %v2615_v35  ;;  %6704 = vmatmul.mubr.msk.f32.gmra.mrb[50].mxu1 %vm552_vm2, %v2668_v8 }
 0x9bc   :  { %v2670_v14 = vsel %vm2638_vm6, %v2620_v1, %v2654_v7 }
 0x9bd   :  { %v2669_v11 = vsel %vm2637_vm7, %v2615_v35, %v2653_v10 }
 0x9be   :  { %6706 = vmatprep.mubr.msk.f32.mxu1 %vm552_vm2, %v2669_v11 }
 0x9bf   :  { %6707 = vmatmul.mubr.msk.f32.gmra.mrb[52].mxu1 %vm552_vm2, %v2670_v14 }
 0x9c0   :  { %6743 = vmatprep.mubr.msk.f32.mxu1 %vm7569_vm3, %v7568_v26 }
 0xa76   :  { %v6687_v16 = vpop.f32.mrb[38].mxu1 }
 0xa77   :  { %v2795_v40 = vadd.f32 %v6687_v16, %v8098_v12  ;;  %v2789_v22 = vpop.f32.mrb[39].mxu1 }
 0xa78   :  { %v2790_v23 = vadd.f32 %v8098_v12, %v2789_v22 }
 0xa79   :  { %v2885_v24 = vmul.f32 0.01, %v2795_v40  ;;  %vm2869_vm4 = vcmp.gt.f32.partialorder %v2795_v40, 0.0 }
 0xa7a   :  { %vm2868_vm0 = vcmp.gt.f32.partialorder %v2790_v23, 0.0  ;;  %v2884_v25 = vmul.f32 0.01, %v2790_v23  ;;  %v6690_v27 = vpop.f32.mrb[40].mxu1 }
 0xa7b   :  { %v2805_v28 = vadd.f32 %v6690_v27, %v8098_v12  ;;  %v2799_v29 = vpop.f32.mrb[41].mxu1  ;;  %v2901_v9 = vsel %vm2869_vm4, %v2795_v40, %v2885_v24 }
 0xa7c   :  { %v2800_v31 = vadd.f32 %v8098_v12, %v2799_v29  ;;  %v2900_v0 = vsel %vm2868_vm0, %v2790_v23, %v2884_v25  ;;  %v8132_v29 = vld [vmem:[#allocation3 + $0x390] ss:$0 sm:$0xff] }
 0xa7d   :  { %v2887_v32 = vmul.f32 0.01, %v2805_v28  ;;  %6717 = vmatprep.mubr.msk.f32.mxu0 %vm1043_vm5, %v2900_v0  ;;  %vm2871_vm15 = vcmp.gt.f32.partialorder %v2805_v28, 0.0 }
 0xa7e   :  { %vm2870_vm6 = vcmp.gt.f32.partialorder %v2800_v31, 0.0  ;;  %v2886_v3 = vmul.f32 0.01, %v2800_v31  ;;  %v6693_v33 = vpop.f32.mrb[42].mxu1  ;;  %6718 = vmatmul.mubr.msk.f32.vlgmr.msra.gmra.mrb[64].mxu0 %vm1043_vm5, %v2901_v9 }
 0xa7f   :  { %v2815_v34 = vadd.f32 %v6693_v33, %v8098_v12  ;;  %v2809_v17 = vpop.f32.mrb[43].mxu1  ;;  %v2903_v37 = vsel %vm2871_vm15, %v2805_v28, %v2887_v32  ;;  %v1981_v28 = vld [vmem:[#allocation3 + $0x3a0] sm:$0x1] }
 0xa80   :  { %v2810_v30 = vadd.f32 %v8098_v12, %v2809_v17  ;;  %v2902_v15 = vsel %vm2870_vm6, %v2800_v31, %v2886_v3  ;;  %7493 = vpush %v1981_v28  ;;  %v8136_v3 = vld [vmem:[#allocation3 + $0x398] ss:$0 sm:$0xff] }
 0xa81   :  { %v2889_v36 = vmul.f32 0.01, %v2815_v34  ;;  %6720 = vmatprep.mubr.msk.f32.mxu0 %vm1043_vm5, %v2902_v15  ;;  %vm2873_vm7 = vcmp.gt.f32.partialorder %v2815_v34, 0.0 }
 0xa82   :  { %vm2872_vm4 = vcmp.gt.f32.partialorder %v2810_v30, 0.0  ;;  %v2888_v38 = vmul.f32 0.01, %v2810_v30  ;;  %v6696_v39 = vpop.f32.mrb[44].mxu1  ;;  %6721 = vmatmul.mubr.msk.f32.gmra.mrb[66].mxu0 %vm1043_vm5, %v2903_v37 }
 0xa83   :  { %v2825_v41 = vadd.f32 %v6696_v39, %v8098_v12  ;;  %v2819_v42 = vpop.f32.mrb[45].mxu1  ;;  %v2905_v19 = vsel %vm2873_vm7, %v2815_v34, %v2889_v36 }
 0xa84   :  { %v2820_v43 = vadd.f32 %v8098_v12, %v2819_v42  ;;  %v2904_v44 = vsel %vm2872_vm4, %v2810_v30, %v2888_v38 }
 0xa85   :  { %v2891_v45 = vmul.f32 0.01, %v2825_v41  ;;  %6723 = vmatprep.mubr.msk.f32.mxu0 %vm1043_vm5, %v2904_v44  ;;  %vm2875_vm0 = vcmp.gt.f32.partialorder %v2825_v41, 0.0 }
 0xa86   :  { %vm2874_vm6 = vcmp.gt.f32.partialorder %v2820_v43, 0.0  ;;  %v2890_v46 = vmul.f32 0.01, %v2820_v43  ;;  %v6699_v47 = vpop.f32.mrb[46].mxu1  ;;  %6724 = vmatmul.mubr.msk.f32.gmra.mrb[68].mxu0 %vm1043_vm5, %v2905_v19 }
 0xa87   :  { %v2835_v48 = vadd.f32 %v6699_v47, %v8098_v12  ;;  %v2829_v49 = vpop.f32.mrb[47].mxu1  ;;  %v2907_v54 = vsel %vm2875_vm0, %v2825_v41, %v2891_v45 }
 0xa88   :  { %v2830_v50 = vadd.f32 %v8098_v12, %v2829_v49  ;;  %v2906_v51 = vsel %vm2874_vm6, %v2820_v43, %v2890_v46 }
 0xa89   :  { %v2893_v52 = vmul.f32 0.01, %v2835_v48  ;;  %6726 = vmatprep.mubr.msk.f32.mxu0 %vm1043_vm5, %v2906_v51  ;;  %vm2877_vm15 = vcmp.gt.f32.partialorder %v2835_v48, 0.0 }
 0xa8a   :  { %vm2876_vm4 = vcmp.gt.f32.partialorder %v2830_v50, 0.0  ;;  %v2892_v55 = vmul.f32 0.01, %v2830_v50  ;;  %v6702_v56 = vpop.f32.mrb[48].mxu1  ;;  %6727 = vmatmul.mubr.msk.f32.gmra.mrb[70].mxu0 %vm1043_vm5, %v2907_v54 }
 0xa8b   :  { %v2845_v57 = vadd.f32 %v6702_v56, %v8098_v12  ;;  %v2839_v58 = vpop.f32.mrb[49].mxu1  ;;  %v2909_v62 = vsel %vm2877_vm15, %v2835_v48, %v2893_v52 }
 0xa8c   :  { %v2840_v59 = vadd.f32 %v8098_v12, %v2839_v58  ;;  %v2908_v60 = vsel %vm2876_vm4, %v2830_v50, %v2892_v55 }
 0xa8d   :  { %v2895_v61 = vmul.f32 0.01, %v2845_v57  ;;  %6729 = vmatprep.mubr.msk.f32.mxu0 %vm1043_vm5, %v2908_v60  ;;  %vm2879_vm7 = vcmp.gt.f32.partialorder %v2845_v57, 0.0 }
 0xa8e   :  { %vm2878_vm6 = vcmp.gt.f32.partialorder %v2840_v59, 0.0  ;;  %v2894_v18 = vmul.f32 0.01, %v2840_v59  ;;  %v6705_v63 = vpop.f32.mrb[50].mxu1  ;;  %6730 = vmatmul.mubr.msk.f32.gmra.mrb[72].mxu0 %vm1043_vm5, %v2909_v62 }
 0xa8f   :  { %v2855_v53 = vadd.f32 %v6705_v63, %v8098_v12  ;;  %v2849_v1 = vpop.f32.mrb[51].mxu1  ;;  %v2911_v7 = vsel %vm2879_vm7, %v2845_v57, %v2895_v61 }
 0xa90   :  { %v2850_v2 = vadd.f32 %v8098_v12, %v2849_v1  ;;  %v2910_v35 = vsel %vm2878_vm6, %v2840_v59, %v2894_v18 }
 0xa91   :  { %v2897_v6 = vmul.f32 0.01, %v2855_v53  ;;  %6732 = vmatprep.mubr.msk.f32.mxu0 %vm1043_vm5, %v2910_v35  ;;  %vm2881_vm0 = vcmp.gt.f32.partialorder %v2855_v53, 0.0 }
 0xa92   :  { %vm2880_vm4 = vcmp.gt.f32.partialorder %v2850_v2, 0.0  ;;  %v2896_v8 = vmul.f32 0.01, %v2850_v2  ;;  %v6708_v10 = vpop.f32.mrb[52].mxu1  ;;  %6733 = vmatmul.mubr.msk.f32.gmra.mrb[74].mxu0 %vm1043_vm5, %v2911_v7 }
 0xa93   :  { %v2865_v11 = vadd.f32 %v6708_v10, %v8098_v12  ;;  %v2859_v14 = vpop.f32.mrb[53].mxu1  ;;  %v2913_v23 = vsel %vm2881_vm0, %v2855_v53, %v2897_v6 }
 0xa94   :  { %v2860_v16 = vadd.f32 %v8098_v12, %v2859_v14  ;;  %v2912_v40 = vsel %vm2880_vm4, %v2850_v2, %v2896_v8 }
 0xa95   :  { %v2899_v22 = vmul.f32 0.01, %v2865_v11  ;;  %6735 = vmatprep.mubr.msk.f32.mxu0 %vm1043_vm5, %v2912_v40  ;;  %vm2883_vm15 = vcmp.gt.f32.partialorder %v2865_v11, 0.0 }
 0xa96   :  { %vm2882_vm6 = vcmp.gt.f32.partialorder %v2860_v16, 0.0  ;;  %v2898_v24 = vmul.f32 0.01, %v2860_v16  ;;  %6736 = vmatmul.mubr.msk.f32.gmra.mrb[76].mxu0 %vm1043_vm5, %v2913_v23 }
 0xa97   :  { %v2915_v27 = vsel %vm2883_vm15, %v2865_v11, %v2899_v22 }
 0xa98   :  { %v2914_v25 = vsel %vm2882_vm6, %v2860_v16, %v2898_v24 }
 0xa99   :  { %6738 = vmatprep.mubr.msk.f32.mxu0 %vm1043_vm5, %v2914_v25 }
 0xa9a   :  { %6739 = vmatmul.mubr.msk.f32.gmra.mrb[78].mxu0 %vm1043_vm5, %v2915_v27 }
 0xab1   :  { %s7494_s7 = spop %7493 }
 0xb51   :  { %v6719_v12 = vpop.f32.mrb[64].mxu0 }
 0xb52   :  { %v3040_v31 = vadd.f32 %v6719_v12, %v8132_v29  ;;  %v3034_v0 = vpop.f32.mrb[65].mxu0 }
 0xb53   :  { %v3035_v9 = vadd.f32 %v8132_v29, %v3034_v0 }
 0xb54   :  { %vm3114_vm7 = vcmp.gt.f32.partialorder %v3040_v31, 0.0  ;;  %v3130_v32 = vmul.f32 0.01, %v3040_v31 }
 0xb55   :  { %vm3113_vm0 = vcmp.gt.f32.partialorder %v3035_v9, 0.0  ;;  %v3129_v33 = vmul.f32 0.01, %v3035_v9  ;;  %v6722_v34 = vpop.f32.mrb[66].mxu0 }
 0xb56   :  { %v3050_v17 = vadd.f32 %v6722_v34, %v8132_v29  ;;  %v3044_v30 = vpop.f32.mrb[67].mxu0  ;;  %v3146_v15 = vsel %vm3114_vm7, %v3040_v31, %v3130_v32 }
 0xb57   :  { %v3045_v36 = vadd.f32 %v8132_v29, %v3044_v30  ;;  %v3166_v37 = vmul.f32 %v8136_v3, %v3146_v15  ;;  %v3145_v38 = vsel %vm3113_vm0, %v3035_v9, %v3129_v33 }
 0xb58   :  { %vm3116_vm4 = vcmp.gt.f32.partialorder %v3050_v17, 0.0  ;;  %v3132_v39 = vmul.f32 0.01, %v3050_v17  ;;  %v3165_v41 = vmul.f32 %v8136_v3, %v3145_v38 }
 0xb59   :  { %vm3115_vm15 = vcmp.gt.f32.partialorder %v3045_v36, 0.0  ;;  %v3131_v42 = vmul.f32 0.01, %v3045_v36  ;;  %v6725_v43 = vpop.f32.mrb[68].mxu0  ;;  %v3184_v44 = vsel %vm1043_vm5, %v3166_v37, 0.0 }
 0xb5a   :  { %v3060_v45 = vadd.f32 %v6725_v43, %v8132_v29  ;;  %3185 = vadd.xlane.f32.xlu0 %v3184_v44  ;;  %v3054_v19 = vpop.f32.mrb[69].mxu0  ;;  %v3181_v46 = vsel %vm1043_vm5, %v3165_v41, 0.0  ;;  %v3148_v47 = vsel %vm3116_vm4, %v3050_v17, %v3132_v39 }
 0xb5b   :  { %v3055_v48 = vadd.f32 %v8132_v29, %v3054_v19  ;;  %3182 = vadd.xlane.f32.xlu1 %v3181_v46  ;;  %v3147_v49 = vsel %vm3115_vm15, %v3045_v36, %v3131_v42  ;;  %v3168_v50 = vmul.f32 %v8136_v3, %v3148_v47 }
 0xb5c   :  { %vm3118_vm6 = vcmp.gt.f32.partialorder %v3060_v45, 0.0  ;;  %v3134_v51 = vmul.f32 0.01, %v3060_v45  ;;  %v3167_v52 = vmul.f32 %v8136_v3, %v3147_v49 }
 0xb5d   :  { %vm3117_vm7 = vcmp.gt.f32.partialorder %v3055_v48, 0.0  ;;  %v3133_v54 = vmul.f32 0.01, %v3055_v48  ;;  %v6728_v55 = vpop.f32.mrb[70].mxu0  ;;  %v3190_v56 = vsel %vm1043_vm5, %v3168_v50, 0.0 }
 0xb5e   :  { %v3070_v57 = vadd.f32 %v6728_v55, %v8132_v29  ;;  %v3064_v58 = vpop.f32.mrb[71].mxu0  ;;  %v3187_v59 = vsel %vm1043_vm5, %v3167_v52, 0.0  ;;  %v3150_v60 = vsel %vm3118_vm6, %v3060_v45, %v3134_v51 }
 0xb5f   :  { %v3065_v61 = vadd.f32 %v8132_v29, %v3064_v58  ;;  %3188 = vadd.xlane.f32.xlu0 %v3187_v59  ;;  %3191 = vadd.xlane.f32.xlu1 %v3190_v56  ;;  %v3149_v62 = vsel %vm3117_vm7, %v3055_v48, %v3133_v54  ;;  %v3170_v18 = vmul.f32 %v8136_v3, %v3150_v60 }
 0xb60   :  { %vm3120_vm0 = vcmp.gt.f32.partialorder %v3070_v57, 0.0  ;;  %v3136_v63 = vmul.f32 0.01, %v3070_v57  ;;  %v3169_v53 = vmul.f32 %v8136_v3, %v3149_v62 }
 0xb61   :  { %vm3119_vm4 = vcmp.gt.f32.partialorder %v3065_v61, 0.0  ;;  %v3135_v1 = vmul.f32 0.01, %v3065_v61  ;;  %v6731_v2 = vpop.f32.mrb[72].mxu0  ;;  %v3196_v35 = vsel %vm1043_vm5, %v3170_v18, 0.0 }
 0xb62   :  { %v3080_v6 = vadd.f32 %v6731_v2, %v8132_v29  ;;  %v3074_v7 = vpop.f32.mrb[73].mxu0  ;;  %v3193_v8 = vsel %vm1043_vm5, %v3169_v53, 0.0  ;;  %v3152_v10 = vsel %vm3120_vm0, %v3070_v57, %v3136_v63 }
 0xb63   :  { %v3075_v11 = vadd.f32 %v8132_v29, %v3074_v7  ;;  %3194 = vadd.xlane.f32.xlu0 %v3193_v8  ;;  %3197 = vadd.xlane.f32.xlu1 %v3196_v35  ;;  %v3172_v14 = vmul.f32 %v8136_v3, %v3152_v10  ;;  %v3151_v16 = vsel %vm3119_vm4, %v3065_v61, %v3135_v1  ;;  %v8184_v1 = vstv %s7494_s7 }
 0xb64   :  { %vm3122_vm15 = vcmp.gt.f32.partialorder %v3080_v6, 0.0  ;;  %v3138_v40 = vmul.f32 0.01, %v3080_v6  ;;  %v3171_v12 = vmul.f32 %v8136_v3, %v3151_v16 }
 0xb65   :  { %vm3121_vm6 = vcmp.gt.f32.partialorder %v3075_v11, 0.0  ;;  %v3137_v22 = vmul.f32 0.01, %v3075_v11  ;;  %v6734_v23 = vpop.f32.mrb[74].mxu0  ;;  %v3202_v24 = vsel %vm1043_vm5, %v3172_v14, 0.0 }
 0xb66   :  { %v3090_v25 = vadd.f32 %v6734_v23, %v8132_v29  ;;  %v3084_v27 = vpop.f32.mrb[75].mxu0  ;;  %v3154_v28 = vsel %vm3122_vm15, %v3080_v6, %v3138_v40  ;;  %v3199_v36 = vsel %vm1043_vm5, %v3171_v12, 0.0 }
 0xb67   :  { %v3085_v31 = vadd.f32 %v8132_v29, %v3084_v27  ;;  %3203 = vadd.xlane.f32.xlu0 %v3202_v24  ;;  %v3174_v0 = vmul.f32 %v8136_v3, %v3154_v28  ;;  %v3153_v9 = vsel %vm3121_vm6, %v3075_v11, %v3137_v22 }
 0xb68   :  { %vm3124_vm7 = vcmp.gt.f32.partialorder %v3090_v25, 0.0  ;;  %v3140_v32 = vmul.f32 0.01, %v3090_v25  ;;  %v3173_v38 = vmul.f32 %v8136_v3, %v3153_v9 }
 0xb69   :  { %vm3123_vm0 = vcmp.gt.f32.partialorder %v3085_v31, 0.0  ;;  %v3139_v33 = vmul.f32 0.01, %v3085_v31  ;;  %v6737_v34 = vpop.f32.mrb[76].mxu0  ;;  %v3208_v17 = vsel %vm1043_vm5, %v3174_v0, 0.0 }
 0xb6a   :  { %v3100_v30 = vadd.f32 %v6737_v34, %v8132_v29  ;;  %v3094_v15 = vpop.f32.mrb[77].mxu0  ;;  %3209 = vadd.xlane.f32.xlu1 %v3208_v17  ;;  %v3156_v37 = vsel %vm3124_vm7, %v3090_v25, %v3140_v32  ;;  %v3205_v49 = vsel %vm1043_vm5, %v3173_v38, 0.0 }
 0xb6b   :  { %v3095_v39 = vadd.f32 %v8132_v29, %v3094_v15  ;;  %3200 = vadd.xlane.f32.xlu0 %v3199_v36  ;;  %v3176_v41 = vmul.f32 %v8136_v3, %v3156_v37  ;;  %v3155_v42 = vsel %vm3123_vm0, %v3085_v31, %v3139_v33  ;;  %vm8624_vm0 = vcmask 1047559  }
 0xb6c   :  { %vm3126_vm4 = vcmp.gt.f32.partialorder %v3100_v30, 0.0  ;;  %v3142_v43 = vmul.f32 0.01, %v3100_v30  ;;  %v3175_v46 = vmul.f32 %v8136_v3, %v3155_v42 }
 0xb6d   :  { %vm3125_vm15 = vcmp.gt.f32.partialorder %v3095_v39, 0.0  ;;  %v3141_v44 = vmul.f32 0.01, %v3095_v39  ;;  %v6740_v45 = vpop.f32.mrb[78].mxu0  ;;  %v3214_v19 = vsel %vm1043_vm5, %v3176_v41, 0.0 }
 0xb6e   :  { %v3110_v47 = vadd.f32 %v6740_v45, %v8132_v29  ;;  %v3104_v48 = vpop.f32.mrb[79].mxu0  ;;  %3215 = vadd.xlane.f32.xlu1 %v3214_v19  ;;  %v3158_v50 = vsel %vm3126_vm4, %v3100_v30, %v3142_v43  ;;  %v3211_v57 = vsel %vm1043_vm5, %v3175_v46, 0.0  ;;  %vm8625_vm4 = vmmov %vm8624_vm0 }
 0xb6f   :  { %v3105_v51 = vadd.f32 %v8132_v29, %v3104_v48  ;;  %3206 = vadd.xlane.f32.xlu0 %v3205_v49  ;;  %v3157_v52 = vsel %vm3125_vm15, %v3095_v39, %v3141_v44  ;;  %v3178_v58 = vmul.f32 %v8136_v3, %v3158_v50  ;;  %vm8626_vm15 = vcmask 64512  }
 0xb70   :  { %vm3128_vm6 = vcmp.gt.f32.partialorder %v3110_v47, 0.0  ;;  %v3144_v54 = vmul.f32 0.01, %v3110_v47  ;;  %v3177_v55 = vmul.f32 %v8136_v3, %v3157_v52 }
 0xb71   :  { %vm3127_vm7 = vcmp.gt.f32.partialorder %v3105_v51, 0.0  ;;  %v3143_v56 = vmul.f32 0.01, %v3105_v51  ;;  %v3220_v62 = vsel %vm1043_vm5, %v3178_v58, 0.0 }
 0xb72   :  { %3212 = vadd.xlane.f32.xlu1 %v3211_v57  ;;  %v3217_v59 = vsel %vm1043_vm5, %v3177_v55, 0.0  ;;  %v3160_v60 = vsel %vm3128_vm6, %v3110_v47, %v3144_v54  ;;  %vm8627_vm6 = vmmov %vm8624_vm0 }
 0xb73   :  { %3218 = vadd.xlane.f32.xlu0 %v3217_v59  ;;  %v3159_v61 = vsel %vm3127_vm7, %v3105_v51, %v3143_v56  ;;  %v3180_v18 = vmul.f32 %v8136_v3, %v3160_v60  ;;  %vm8628_vm7 = vmmov %vm8624_vm0 }
 0xb74   :  { %v3179_v29 = vmul.f32 %v8136_v3, %v3159_v61 }
 0xb75   :  { %v3226_v53 = vsel %vm1043_vm5, %v3180_v18, 0.0 }
 0xb76   :  { %3221 = vadd.xlane.f32.xlu1 %v3220_v62  ;;  %v3223_v63 = vsel %vm1043_vm5, %v3179_v29, 0.0 }
 0xb77   :  { %3224 = vadd.xlane.f32.xlu0 %v3223_v63 }
 0xb7a   :  { %3227 = vadd.xlane.f32.xlu1 %v3226_v53 }
 0xbe7   :  { %v3186_v2 = vpop.xlane.xlu0 %3185 }
 0xbe8   :  { %v3183_v35 = vpop.xlane.xlu1 %3182  ;;  %v3234_v6 = vadd.f32 %v8184_v1, %v3186_v2 }
 0xbe9   :  { %v3233_v7 = vadd.f32 %v8184_v1, %v3183_v35 }
 0xbea   :  { %v5815_v11 = vadd.f32 -1e+08, %v3234_v6  ;;  %v3384_v22 = vrot.slane %v3234_v6, %v7841_v21 }
 0xbeb   :  { %v5814_v14 = vadd.f32 -1e+08, %v3233_v7  ;;  %v3380_v23 = vrot.slane %v3233_v7, %v7841_v21 }
 0xbec   :  { %v3189_v8 = vpop.xlane.xlu0 %3188  ;;  %v3192_v10 = vpop.xlane.xlu1 %3191  ;;  %v3288_v12 = vrot.slane %v5815_v11, %v7841_v21 }
 0xbed   :  { %v3235_v3 = vadd.f32 %v8184_v1, %v3189_v8  ;;  %v3236_v16 = vadd.f32 %v8184_v1, %v3192_v10  ;;  %v3284_v31 = vrot.slane %v5814_v14, %v7841_v21  ;;  %v3441_v34 = vsel %vm1469_vm8, %v3384_v22, %v3380_v23 }
 0xbef   :  { %v5816_v40 = vadd.f32 -1e+08, %v3235_v3  ;;  %v3388_v27 = vrot.slane %v3235_v3, %v7841_v21  ;;  %v5817_v0 = vadd.f32 -1e+08, %v3236_v16  ;;  %v3392_v17 = vrot.slane %v3236_v16, %v7841_v21 }
 0xbf0   :  { %v3195_v24 = vpop.xlane.xlu0 %3194  ;;  %v3198_v25 = vpop.xlane.xlu1 %3197  ;;  %v3345_v37 = vsel %vm1469_vm8, %v3288_v12, %v3284_v31 }
 0xbf1   :  { %v3237_v28 = vadd.f32 %v8184_v1, %v3195_v24  ;;  %v3238_v9 = vadd.f32 %v8184_v1, %v3198_v25  ;;  %v3292_v32 = vrot.slane %v5816_v40, %v7841_v21  ;;  %v3442_v15 = vsel %vm1471_vm9, %v3388_v27, %v3441_v34 }
 0xbf2   :  { %v3296_v38 = vrot.slane %v5817_v0, %v7841_v21  ;;  %v3443_v45 = vsel %vm1473_vm10, %v3392_v17, %v3442_v15 }
 0xbf3   :  { %v5818_v33 = vadd.f32 -1e+08, %v3237_v28  ;;  %v3396_v36 = vrot.slane %v3237_v28, %v7841_v21  ;;  %v5819_v39 = vadd.f32 -1e+08, %v3238_v9  ;;  %v3346_v42 = vsel %vm1471_vm9, %v3292_v32, %v3345_v37 }
 0xbf4   :  { %v3204_v30 = vpop.xlane.xlu0 %3203  ;;  %v3400_v19 = vrot.slane %v3238_v9, %v7841_v21  ;;  %v3347_v49 = vsel %vm1473_vm10, %v3296_v38, %v3346_v42 }
 0xbf5   :  { %v3240_v41 = vadd.f32 %v8184_v1, %v3204_v30  ;;  %v3300_v43 = vrot.slane %v5818_v33, %v7841_v21  ;;  %v3444_v47 = vsel %vm1475_vm11, %v3396_v36, %v3443_v45  ;;  %v3304_v50 = vrot.slane %v5819_v39, %v7841_v21 }
 0xbf6   :  { %v3445_v58 = vsel %vm1477_vm12, %v3400_v19, %v3444_v47 }
 0xbf7   :  { %v3210_v44 = vpop.xlane.xlu1 %3209  ;;  %v5821_v51 = vadd.f32 -1e+08, %v3240_v41  ;;  %v3348_v54 = vsel %vm1475_vm11, %v3300_v43, %v3347_v49  ;;  %v3408_v63 = vrot.slane %v3240_v41, %v7841_v21 }
 0xbf8   :  { %v3201_v46 = vpop.xlane.xlu0 %3200  ;;  %v3242_v52 = vadd.f32 %v8184_v1, %v3210_v44  ;;  %v3349_v2 = vsel %vm1477_vm12, %v3304_v50, %v3348_v54 }
 0xbf9   :  { %v3239_v48 = vadd.f32 %v8184_v1, %v3201_v46  ;;  %v3312_v18 = vrot.slane %v5821_v51, %v7841_v21 }
 0xbfa   :  { %v5823_v53 = vadd.f32 -1e+08, %v3242_v52  ;;  %v3416_v40 = vrot.slane %v3242_v52, %v7841_v21 }
 0xbfb   :  { %v5820_v55 = vadd.f32 -1e+08, %v3239_v48  ;;  %v3404_v56 = vrot.slane %v3239_v48, %v7841_v21  ;;  %v3216_v57 = vpop.xlane.xlu1 %3215 }
 0xbfc   :  { %v3244_v59 = vadd.f32 %v8184_v1, %v3216_v57  ;;  %v3207_v60 = vpop.xlane.xlu0 %3206  ;;  %v3320_v25 = vrot.slane %v5823_v53, %v7841_v21 }
 0xbfd   :  { %v3308_v61 = vrot.slane %v5820_v55, %v7841_v21  ;;  %v3241_v29 = vadd.f32 %v8184_v1, %v3207_v60  ;;  %v3446_v62 = vsel %vm1479_vm13, %v3404_v56, %v3445_v58 }
 0xbfe   :  { %v5825_v10 = vadd.f32 -1e+08, %v3244_v59  ;;  %v3447_v16 = vsel %vm8625_vm4, %v3408_v63, %v3446_v62  ;;  %v3424_v31 = vrot.slane %v3244_v59, %v7841_v21 }
 0xbff   :  { %v5822_v35 = vadd.f32 -1e+08, %v3241_v29  ;;  %v3412_v6 = vrot.slane %v3241_v29, %v7841_v21  ;;  %v3213_v7 = vpop.xlane.xlu1 %3212  ;;  %v3350_v8 = vsel %vm1479_vm13, %v3308_v61, %v3349_v2 }
 0xc00   :  { %v3243_v3 = vadd.f32 %v8184_v1, %v3213_v7  ;;  %v3219_v11 = vpop.xlane.xlu0 %3218  ;;  %v3351_v14 = vsel %vm8624_vm0, %v3312_v18, %v3350_v8  ;;  %v3328_v34 = vrot.slane %v5825_v10, %v7841_v21  ;;  %vm8629_vm0 = vmmov %vm8626_vm15 }
 0xc01   :  { %v3316_v22 = vrot.slane %v5822_v35, %v7841_v21  ;;  %v3245_v23 = vadd.f32 %v8184_v1, %v3219_v11  ;;  %v3457_v24 = vsel %vm7875_vm14, %v3351_v14, %v3447_v16  ;;  %v3448_v0 = vsel %vm1469_vm8, %v3416_v40, %v3412_v6  ;;  %vm8630_vm4 = vmmov %vm8629_vm0  ;;  %v1998_v11 = vld [vmem:[#allocation3 + $0x428] sm:$0xff]  ;;  %v1999_v14 = vld [vmem:[#allocation3 + $0x430] sm:$0xff] }
 0xc02   :  { %v5824_v27 = vadd.f32 -1e+08, %v3243_v3  ;;  %v3420_v28 = vrot.slane %v3243_v3, %v7841_v21  ;;  %v3459_v12 = vsel %vm8626_vm15, %v3457_v24, -inf  ;;  %vm8631_vm15 = vmmov %vm8629_vm0  ;;  %v2000_v16 = vld [vmem:[#allocation3 + $0x438] sm:$0xff]  ;;  %v7277_v40 = vpack.c.bf16 %v1999_v14, %v1998_v11  ;;  %v1993_v11 = vld [vmem:[#allocation3 + $0x400] sm:$0xff] }
 0xc03   :  { %v5826_v9 = vadd.f32 -1e+08, %v3245_v23  ;;  %v3428_v32 = vrot.slane %v3245_v23, %v7841_v21  ;;  %3460 = vmax.xlane.f32.xlu0 %v3459_v12  ;;  %v3222_v33 = vpop.xlane.xlu1 %3221  ;;  %v3352_v37 = vsel %vm1469_vm8, %v3320_v25, %v3316_v22  ;;  %v2001_v22 = vld [vmem:[#allocation3 + $0x440] sm:$0xff]  ;;  %v2003_v25 = vld [vmem:[#allocation3 + $0x450] sm:$0xff] }
 0xc04   :  { %v3324_v17 = vrot.slane %v5824_v27, %v7841_v21  ;;  %v3449_v30 = vsel %vm1471_vm9, %v3420_v28, %v3448_v0  ;;  %v3246_v15 = vadd.f32 %v8184_v1, %v3222_v33  ;;  %v3225_v36 = vpop.xlane.xlu0 %3224  ;;  %v7281_v23 = vpack.c.bf16 %v2001_v22, %v2000_v16  ;;  %7278 = vmatprep.subr.bf16.mxu0 %v7277_v40  ;;  %v2004_v28 = vld [vmem:[#allocation3 + $0x458] sm:$0xff]  ;;  %v2005_v12 = vld [vmem:[#allocation3 + $0x460] sm:$0xff]  ;;  %v2006_v0 = vld [vmem:[#allocation3 + $0x468] sm:$0xff] }
 0xc05   :  { %v3332_v38 = vrot.slane %v5826_v9, %v7841_v21  ;;  %v3450_v39 = vsel %vm1473_vm10, %v3424_v31, %v3449_v30  ;;  %v3247_v41 = vadd.f32 %v8184_v1, %v3225_v36  ;;  %7280 = vmatpush3.bf16.msra.mxu0 %v7277_v40  ;;  %v7289_v31 = vpack.c.bf16 %v2005_v12, %v2004_v28  ;;  %v2007_v9 = vld [vmem:[#allocation3 + $0x470] sm:$0xff]  ;;  %v1994_v16 = vld [vmem:[#allocation3 + $0x408] sm:$0xff]  ;;  %v3816_v28 = vld [vmem:[#allocation3 + $0x4b8] sm:$0xff] }
 0xc06   :  { %v3353_v42 = vsel %vm1471_vm9, %v3324_v17, %v3352_v37  ;;  %v5827_v43 = vadd.f32 -1e+08, %v3246_v15  ;;  %v3432_v44 = vrot.slane %v3246_v15, %v7841_v21  ;;  %v3451_v19 = vsel %vm1475_vm11, %v3428_v32, %v3450_v39  ;;  %7282 = vmatprep.subr.bf16.mxu0 %v7281_v23  ;;  %v1995_v40 = vld [vmem:[#allocation3 + $0x410] sm:$0xff]  ;;  %v3817_v12 = vld [vmem:[#allocation3 + $0x4c0] sm:$0xff] }
 0xc07   :  { %v3354_v45 = vsel %vm1473_vm10, %v3328_v34, %v3353_v42  ;;  %v5828_v46 = vadd.f32 -1e+08, %v3247_v41  ;;  %v3228_v47 = vpop.xlane.xlu1 %3227  ;;  %v3436_v52 = vrot.slane %v3247_v41, %v7841_v21  ;;  %v7293_v32 = vpack.c.bf16 %v2007_v9, %v2006_v0  ;;  %v3818_v0 = vld [vmem:[#allocation3 + $0x4c8] sm:$0xff] }
 0xc08   :  { %v3355_v48 = vsel %vm1475_vm11, %v3332_v38, %v3354_v45  ;;  %v3336_v49 = vrot.slane %v5827_v43, %v7841_v21  ;;  %v3248_v50 = vadd.f32 %v8184_v1, %v3228_v47  ;;  %v3452_v54 = vsel %vm1477_vm12, %v3432_v44, %v3451_v19  ;;  %v8274_v38 = vld [vmem:[#allocation2 + $0x8] sm:$0xff]  ;;  %v2009_v19 = vld [vmem:[#allocation3 + $0x480] sm:$0xff] }
 0xc09   :  { %v3340_v51 = vrot.slane %v5828_v46, %v7841_v21  ;;  %v3453_v60 = vsel %vm1479_vm13, %v3436_v52, %v3452_v54  ;;  %7284 = vmatpush3.bf16.msra.mxu0 %v7281_v23  ;;  %v2008_v45 = vld [vmem:[#allocation3 + $0x478] sm:$0xff]  ;;  %v2010_v46 = vld [vmem:[#allocation3 + $0x488] sm:$0xff]  ;;  %v7333_v22 = vpack.c.bf16 %v1995_v40, %v1994_v16  ;;  %v7345_v9 = vpack.c.bf16 %v3818_v0, %v3817_v12 }
 0xc0a   :  { %v5829_v55 = vadd.f32 -1e+08, %v3248_v50  ;;  %v3440_v56 = vrot.slane %v3248_v50, %v7841_v21  ;;  %v3356_v57 = vsel %vm1477_vm12, %v3336_v49, %v3355_v48  ;;  %v7297_v47 = vpack.c.bf16 %v2009_v19, %v2008_v45  ;;  %v2011_v48 = vld [vmem:[#allocation3 + $0x490] sm:$0xff]  ;;  %v2012_v50 = vld [vmem:[#allocation3 + $0x498] sm:$0xff]  ;;  %v1982_v54 = vld [vmem:[#allocation3 + $0x3a8] sm:$0xff] }
 0xc0b   :  { %v3357_v59 = vsel %vm1479_vm13, %v3340_v51, %v3356_v57  ;;  %v7301_v49 = vpack.c.bf16 %v2011_v48, %v2010_v46  ;;  %v2013_v51 = vld [vmem:[#allocation3 + $0x4a0] sm:$0xff]  ;;  %v1996_v23 = vld [vmem:[#allocation3 + $0x418] sm:$0xff]  ;;  %v3826_v48 = vld [vmem:[#allocation3 + $0x508] sm:$0xff] }
 0xc0c   :  { %v3344_v58 = vrot.slane %v5829_v55, %v7841_v21  ;;  %v3454_v1 = vsel %vm8628_vm7, %v3440_v56, %v3453_v60  ;;  %vm8633_vm7 = vmmov %vm8629_vm0  ;;  %v7305_v52 = vpack.c.bf16 %v2013_v51, %v2012_v50  ;;  %v1983_v55 = vld [vmem:[#allocation3 + $0x3b0] sm:$0xff]  ;;  %v1985_v60 = vld [vmem:[#allocation3 + $0x3c0] sm:$0xff] }
 0xc0d   :  { %v7309_v56 = vpack.c.bf16 %v1983_v55, %v1982_v54  ;;  %v3824_v45 = vld [vmem:[#allocation3 + $0x4f8] sm:$0xff]  ;;  %v3827_v54 = vld [vmem:[#allocation3 + $0x510] sm:$0xff] }
 0xc0e   :  { %v3358_v61 = vsel %vm8627_vm6, %v3344_v58, %v3357_v59  ;;  %vm8632_vm6 = vmmov %vm8629_vm0  ;;  %v1984_v59 = vld [vmem:[#allocation3 + $0x3b8] sm:$0xff] }
 0xc0f   :  { %v3458_v29 = vsel %vm7924_vm1, %v3358_v61, %v3454_v1  ;;  %v7313_v61 = vpack.c.bf16 %v1985_v60, %v1984_v59  ;;  %v3828_v55 = vld [vmem:[#allocation3 + $0x518] sm:$0xff] }
 0xc10   :  { %v3462_v62 = vsel %vm8629_vm0, %v3458_v29, -inf  ;;  %v3832_v60 = vld [vmem:[#allocation3 + $0x538] sm:$0xff] }
 0xc11   :  { %3463 = vmax.xlane.f32.xlu1 %v3462_v62  ;;  %v1987_v62 = vld [vmem:[#allocation3 + $0x3d0] sm:$0xff] }
 0xc90   :  { %v3461_v18 = vpop.xlane.xlu0 %3460 }
 0xc91   :  { %v3465_v63 = vsub.f32 %v3457_v24, %v3461_v18  ;;  %v2002_v24 = vld [vmem:[#allocation3 + $0x448] sm:$0xff] }
 0xc92   :  { %v7285_v27 = vpack.c.bf16 %v2003_v25, %v2002_v24  ;;  %v1997_v24 = vld [vmem:[#allocation3 + $0x420] sm:$0xff] }
 0xc93   :  { %v3467_v53 = vmul.f32 1.442695, %v3465_v63  ;;  %v7537_v63 = vld [vmem:[#allocation2] sm:$0xff]  ;;  %v7337_v25 = vpack.c.bf16 %v1997_v24, %v1996_v23 }
 0xc94   :  { %7286 = vmatprep.subr.bf16.mxu0 %v7285_v27 }
 0xc95   :  { %7518 = vpow2.f32 %v3467_v53  ;;  %7288 = vmatpush3.bf16.msra.mxu0 %v7285_v27  ;;  %v3815_v27 = vld [vmem:[#allocation3 + $0x4b0] sm:$0xff] }
 0xc96   :  { %7290 = vmatprep.subr.bf16.mxu0 %v7289_v31 }
 0xc99   :  { %7292 = vmatpush3.bf16.msra.mxu0 %v7289_v31  ;;  %v7341_v31 = vpack.c.bf16 %v3816_v28, %v3815_v27  ;;  %v3835_v27 = vld [vmem:[#allocation3 + $0x550] sm:$0xff] }
 0xc9a   :  { %7294 = vmatprep.subr.bf16.mxu0 %v7293_v32 }
 0xc9d   :  { %7296 = vmatpush3.bf16.msra.mxu0 %v7293_v32  ;;  %v3819_v32 = vld [vmem:[#allocation3 + $0x4d0] sm:$0xff] }
 0xc9e   :  { %v3464_v2 = vpop.xlane.xlu1 %3463  ;;  %7298 = vmatprep.subr.bf16.mxu0 %v7297_v47 }
 0xc9f   :  { %v7519_v35 = vpop.eup %7518  ;;  %v3466_v6 = vsub.f32 %v3458_v29, %v3464_v2  ;;  %v1986_v29 = vld [vmem:[#allocation3 + $0x3c8] sm:$0xff]  ;;  %v1988_v2 = vld [vmem:[#allocation3 + $0x3d8] sm:$0xff] }
 0xca0   :  { %v3471_v7 = vsel %vm8630_vm4, %v7519_v35, 0.0  ;;  %v7317_v53 = vpack.c.bf16 %v1987_v62, %v1986_v29 }
 0xca1   :  { %v3469_v8 = vmul.f32 1.442695, %v3466_v6  ;;  %3472 = vadd.xlane.f32.xlu0 %v3471_v7  ;;  %7300 = vmatpush3.bf16.msra.mxu0 %v7297_v47  ;;  %v1990_v7 = vld [vmem:[#allocation3 + $0x3e8] sm:$0xff]  ;;  %v3825_v47 = vld [vmem:[#allocation3 + $0x500] sm:$0xff] }
 0xca2   :  { %7302 = vmatprep.subr.bf16.mxu0 %v7301_v49 }
 0xca3   :  { %7520 = vpow2.f32 %v3469_v8  ;;  %v1991_v8 = vld [vmem:[#allocation3 + $0x3f0] sm:$0xff] }
 0xca5   :  { %7304 = vmatpush3.bf16.msra.mxu0 %v7301_v49 }
 0xca6   :  { %7306 = vmatprep.subr.bf16.mxu0 %v7305_v52 }
 0xca9   :  { %7308 = vmatpush3.bf16.msra.mxu0 %v7305_v52  ;;  %v7361_v52 = vpack.c.bf16 %v3826_v48, %v3825_v47 }
 0xcaa   :  { %7310 = vmatprep.subr.bf16.mxu0 %v7309_v56 }
 0xcad   :  { %v7521_v10 = vpop.eup %7520 }
 0xcae   :  { %v3474_v3 = vsel %vm8631_vm15, %v7521_v10, 0.0  ;;  %vm3812_vm15 = vcmask 392448  }
 0xcaf   :  { %3475 = vadd.xlane.f32.xlu1 %v3474_v3  ;;  %v1992_v3 = vld [vmem:[#allocation3 + $0x3f8] sm:$0xff] }
 0xcb0   :  { %v7329_v14 = vpack.c.bf16 %v1993_v11, %v1992_v3 }
 0xd2e   :  { %v3473_v33 = vpop.xlane.xlu0 %3472 }
 0xd2f   :  { %7522 = vrcp.f32 %v3473_v33 }
 0xd39   :  { %v7523_v34 = vpop.eup %7522 }
 0xd3a   :  { %v3479_v17 = vmul.f32 %v7523_v34, %v3473_v33  ;;  %v3820_v33 = vld [vmem:[#allocation3 + $0x4d8] sm:$0xff] }
 0xd3c   :  { %v3481_v30 = vsub.f32 2.0, %v3479_v17  ;;  %v3476_v15 = vpop.xlane.xlu1 %3475  ;;  %v5832_v17 = vld [vmem:[#allocation3 + $0x4a8] ss:$0 sm:$0xff] }
 0xd3d   :  { %7524 = vrcp.f32 %v3476_v15 }
 0xd3e   :  { %v3483_v36 = vmul.f32 %v7523_v34, %v3481_v30  ;;  %v7349_v34 = vpack.c.bf16 %v3820_v33, %v3819_v32 }
 0xd40   :  { %v8270_v37 = vmul.f32 %v7519_v35, %v3483_v36  ;;  %v1989_v35 = vld [vmem:[#allocation3 + $0x3e0] sm:$0xff] }
 0xd41   :  { %v7321_v6 = vpack.c.bf16 %v1989_v35, %v1988_v2 }
 0xd42   :  { %6744 = vmatmul.mubr.msk.f32.vlgmr.msra.gmra.mrb[54].mxu1 %vm8632_vm6, %v8270_v37 }
 0xd43   :  { %6747 = vmatpush3.msra.mxu1 %v8274_v38  ;;  %6748 = vmatprep.mubr.msk.f32.mxu1 %vm7569_vm3, %v7568_v26 }
 0xd44   :  { %7342 = vmatprep.subr.bf16.mxu1 %v7341_v31 }
 0xd47   :  { %v7525_v39 = vpop.eup %7524 }
 0xd48   :  { %v3480_v41 = vmul.f32 %v7525_v39, %v3476_v15 }
 0xd4a   :  { %v3482_v42 = vsub.f32 2.0, %v3480_v41  ;;  %v3823_v41 = vld [vmem:[#allocation3 + $0x4f0] sm:$0xff] }
 0xd4b   :  { %v7357_v46 = vpack.c.bf16 %v3824_v45, %v3823_v41 }
 0xd4c   :  { %v3484_v43 = vmul.f32 %v7525_v39, %v3482_v42  ;;  %v3822_v39 = vld [vmem:[#allocation3 + $0x4e8] sm:$0xff] }
 0xd4e   :  { %v8279_v44 = vmul.f32 %v7521_v10, %v3484_v43  ;;  %v7325_v10 = vpack.c.bf16 %v1991_v8, %v1990_v7 }
 0xd50   :  { %6749 = vmatmul.mubr.msk.f32.vlgmr.msra.gmra.mrb[56].mxu1 %vm8633_vm7, %v8279_v44 }
 0xd51   :  { %7344 = vmatpush3.bf16.msra.mxu1 %v7341_v31 }
 0xd52   :  { %7346 = vmatprep.subr.bf16.mxu1 %v7345_v9 }
 0xd55   :  { %7348 = vmatpush3.bf16.msra.mxu1 %v7345_v9 }
 0xd56   :  { %7350 = vmatprep.subr.bf16.mxu1 %v7349_v34 }
 0xd59   :  { %7352 = vmatpush3.bf16.msra.mxu1 %v7349_v34 }
 0xe15   :  { %v3566_v57 = vpop.f32.mrb[54].mxu1 }
 0xe16   :  { %v6745_v58 = vpop.f32.mrb[55].mxu1  ;;  %6783 = vmatprep.mubr.f32.mxu0 %v3566_v57  ;;  %v3829_v57 = vld [vmem:[#allocation3 + $0x520] sm:$0xff] }
 0xe17   :  { %v3830_v58 = vld [vmem:[#allocation3 + $0x528] sm:$0xff] }
 0xe18   :  { %v7369_v59 = vpack.c.bf16 %v3830_v58, %v3829_v57 }
 0xe23   :  { %v3638_v1 = vpop.f32.mrb[56].mxu1 }
 0xe24   :  { %v6750_v18 = vpop.f32.mrb[57].mxu1  ;;  %6784 = vmatmul.mubr.f32.vlgmr.msra.gmra.mrb[80].mxu0 %v3638_v1 }
 0xe25   :  { %7312 = vmatpush3.bf16.msra.mxu0 %v7309_v56  ;;  %6818 = vmatprep.mubr.f32.mxu0 %v7537_v63  ;;  %v7365_v56 = vpack.c.bf16 %v3828_v55, %v3827_v54  ;;  %v3838_v54 = vld [vmem:[#allocation3 + $0x568] sm:$0xff]  ;;  %v3839_v55 = vld [vmem:[#allocation3 + $0x570] sm:$0xff] }
 0xe26   :  { %7314 = vmatprep.subr.bf16.mxu0 %v7313_v61 }
 0xe29   :  { %7316 = vmatpush3.bf16.msra.mxu0 %v7313_v61  ;;  %v3833_v61 = vld [vmem:[#allocation3 + $0x540] sm:$0xff] }
 0xe2a   :  { %7318 = vmatprep.subr.bf16.mxu0 %v7317_v53  ;;  %v7373_v1 = vpack.c.bf16 %v3833_v61, %v3832_v60  ;;  %v7385_v61 = vpack.c.bf16 %v3839_v55, %v3838_v54 }
 0xe2d   :  { %7320 = vmatpush3.bf16.msra.mxu0 %v7317_v53 }
 0xe2e   :  { %7322 = vmatprep.subr.bf16.mxu0 %v7321_v6 }
 0xe31   :  { %7324 = vmatpush3.bf16.msra.mxu0 %v7321_v6 }
 0xe32   :  { %7326 = vmatprep.subr.bf16.mxu0 %v7325_v10 }
 0xe35   :  { %7328 = vmatpush3.bf16.msra.mxu0 %v7325_v10 }
 0xe36   :  { %7330 = vmatprep.subr.bf16.mxu0 %v7329_v14 }
 0xe39   :  { %7332 = vmatpush3.bf16.msra.mxu0 %v7329_v14 }
 0xe3a   :  { %7334 = vmatprep.subr.bf16.mxu0 %v7333_v22 }
 0xe3d   :  { %7336 = vmatpush3.bf16.msra.mxu0 %v7333_v22 }
 0xe3e   :  { %7338 = vmatprep.subr.bf16.mxu0 %v7337_v25 }
 0xe41   :  { %7340 = vmatpush3.bf16.msra.mxu0 %v7337_v25  ;;  %v3834_v25 = vld [vmem:[#allocation3 + $0x548] sm:$0xff] }
 0xe44   :  { %6819 = vmatmul.mubr.f32.vlgmr.msra.gmra.mrb[80].mxu0 %v8274_v38  ;;  %v3821_v38 = vld [vmem:[#allocation3 + $0x4e0] sm:$0xff] }
 0xe45   :  { %v7353_v43 = vpack.c.bf16 %v3822_v39, %v3821_v38 }
 0xe47   :  { %7354 = vmatprep.subr.bf16.mxu1 %v7353_v43 }
 0xe48   :  { %7356 = vmatpush3.bf16.msra.mxu1 %v7353_v43  ;;  %v3837_v43 = vld [vmem:[#allocation3 + $0x560] sm:$0xff] }
 0xe49   :  { %7358 = vmatprep.subr.bf16.mxu1 %v7357_v46 }
 0xe4c   :  { %7360 = vmatpush3.bf16.msra.mxu1 %v7357_v46 }
 0xe4d   :  { %7362 = vmatprep.subr.bf16.mxu1 %v7361_v52 }
 0xe50   :  { %7364 = vmatpush3.bf16.msra.mxu1 %v7361_v52 }
 0xe51   :  { %7366 = vmatprep.subr.bf16.mxu1 %v7365_v56 }
 0xe54   :  { %7368 = vmatpush3.bf16.msra.mxu1 %v7365_v56 }
 0xe55   :  { %7370 = vmatprep.subr.bf16.mxu1 %v7369_v59 }
 0xe58   :  { %7372 = vmatpush3.bf16.msra.mxu1 %v7369_v59 }
 0xe59   :  { %7374 = vmatprep.subr.bf16.mxu1 %v7373_v1 }
 0xf17   :  { %v6820_v30 = vpop.f32.mrb[80].mxu0 }
 0xf18   :  { %v3797_v15 = vadd.f32 %v6820_v30, %v5832_v17  ;;  %v3783_v36 = vpop.f32.mrb[81].mxu0 }
 0xf19   :  { %v3796_v42 = vadd.f32 %v5832_v17, %v3783_v36 }
 0xf1a   :  { %v3801_v19 = vmul.f32 0.01, %v3797_v15  ;;  %vm3799_vm0 = vcmp.gt.f32.partialorder %v3797_v15, 0.0 }
 0xf1b   :  { %v3800_v49 = vmul.f32 0.01, %v3796_v42  ;;  %vm3798_vm4 = vcmp.gt.f32.partialorder %v3796_v42, 0.0 }
 0xf1c   :  { %v3803_v50 = vsel %vm3799_vm0, %v3797_v15, %v3801_v19  ;;  %v7377_v15 = vpack.c.bf16 %v3835_v27, %v3834_v25 }
 0xf1d   :  { %3808 = vrot.lane.b32.xlu1 %v3803_v50, %s7571_s8  ;;  %v3802_v51 = vsel %vm3798_vm4, %v3796_v42, %v3800_v49  ;;  %v3836_v42 = vld [vmem:[#allocation3 + $0x558] sm:$0xff] }
 0xf1e   :  { %3806 = vrot.lane.b32.xlu0 %v3802_v51, %s7571_s8  ;;  %v7381_v48 = vpack.c.bf16 %v3837_v43, %v3836_v42  ;;  %v3844_v42 = vld [vmem:[#allocation3 + $0x598] sm:$0xff] }
 0xf8f   :  { %v3809_v29 = vpop.permute.xlu1 %3808 }
 0xf90   :  { %3814 = vst.msk [vmem:[#allocation2 + $0x8] sm:$0xff] %vm3812_vm15, %v3809_v29  ;;  %v3807_v62 = vpop.permute.xlu0 %3806 }
 0xf91   :  { %3813 = vst.msk [vmem:[#allocation2] sm:$0xff] %vm3812_vm15, %v3807_v62 }
 0xf97   :  { %v8290_v2 = vld [vmem:[#allocation2 + $0x8] sm:$0xff] }
 0xf98   :  { %v8284_v18 = vld [vmem:[#allocation2] sm:$0xff]  ;;  %v3950_v16 = vrot.slane %v8290_v2, %v7605_v13  ;;  %v3943_v30 = vcombine.high %v8290_v2, %v8290_v2 }
 0xf99   :  { %v3901_v63 = vrot.slane %v8284_v18, %v7605_v13  ;;  %v3894_v53 = vcombine.high %v8284_v18, %v8284_v18 }
 0xf9a   :  { %v3958_v17 = vcombine.high %v3950_v16, %v3950_v16  ;;  %v3966_v46 = vrot.slane %v3950_v16, %v7605_v13  ;;  %v3957_v52 = vrot.slane %v3943_v30, %v7605_v13 }
 0xf9b   :  { %v3909_v35 = vcombine.high %v3901_v63, %v3901_v63  ;;  %v3917_v6 = vrot.slane %v3901_v63, %v7605_v13  ;;  %v3908_v7 = vrot.slane %v3894_v53, %v7605_v13 }
 0xf9c   :  { %v3980_v47 = vrot.slane %v3958_v17, %v7605_v13  ;;  %v4027_v58 = vrot.slane %v3966_v46, %v7621_v20  ;;  %v3988_v59 = vcombine.high %v3966_v46, %v3966_v46  ;;  %v3959_v63 = vcombine.high %v3957_v52, %v3957_v52 }
 0xf9d   :  { %v3995_v8 = vrot.slane %v3917_v6, %v7621_v20  ;;  %v3931_v10 = vrot.slane %v3909_v35, %v7605_v13  ;;  %v3939_v3 = vcombine.high %v3917_v6, %v3917_v6  ;;  %v3924_v11 = vrot.slane %v3908_v7, %v7605_v13 }
 0xf9e   :  { %v3910_v14 = vcombine.high %v3908_v7, %v3908_v7  ;;  %v4031_v60 = vrot.slane %v3980_v47, %v7621_v20  ;;  %v3990_v62 = vcombine.high %v3980_v47, %v3980_v47  ;;  %v4080_v35 = vsub.f32 %v4027_v58, %v8290_v2 }
 0xf9f   :  { %v4072_v40 = vsub.f32 %v3995_v8, %v8284_v18  ;;  %v3999_v22 = vrot.slane %v3931_v10, %v7621_v20  ;;  %v4003_v23 = vrot.slane %v3939_v3, %v7621_v20  ;;  %v3941_v24 = vcombine.high %v3931_v10, %v3931_v10 }
 0xfa0   :  { %v4011_v28 = vrot.slane %v3924_v11, %v7621_v20  ;;  %v3938_v12 = vrot.slane %v3910_v14, %v7605_v13  ;;  %v3940_v31 = vcombine.high %v3924_v11, %v3924_v11  ;;  %v4035_v6 = vrot.slane %v3988_v59, %v7621_v20 }
 0xfa1   :  { %v4088_v0 = vand.u32 2147483647, %v4072_v40  ;;  %v4073_v9 = vsub.f32 %v3999_v22, %v8284_v18  ;;  %v4074_v32 = vsub.f32 %v4003_v23, %v8284_v18  ;;  %v4007_v33 = vrot.slane %v3941_v24, %v7621_v20 }
 0xfa2   :  { %v4015_v34 = vrot.slane %v3938_v12, %v7621_v20  ;;  %v3942_v41 = vcombine.high %v3938_v12, %v3938_v12  ;;  %v4076_v45 = vsub.f32 %v4011_v28, %v8284_v18  ;;  %v4019_v19 = vrot.slane %v3940_v31, %v7621_v20 }
 0xfa3   :  { %6853 = vmatprep.mubr.f32.mxu1 %v4088_v0  ;;  %v4089_v36 = vand.u32 2147483647, %v4073_v9  ;;  %v4090_v38 = vand.u32 2147483647, %v4074_v32  ;;  %v4075_v39 = vsub.f32 %v4007_v33, %v8284_v18  ;;  %v3973_v7 = vrot.slane %v3957_v52, %v7605_v13 }
 0xfa4   :  { %v4077_v50 = vsub.f32 %v4015_v34, %v8284_v18  ;;  %v4023_v51 = vrot.slane %v3942_v41, %v7621_v20  ;;  %v4092_v56 = vand.u32 2147483647, %v4076_v45  ;;  %v4078_v57 = vsub.f32 %v4019_v19, %v8284_v18  ;;  %v3846_v45 = vld [vmem:[#allocation3 + $0x5a8] sm:$0xff] }
 0xfa5   :  { %6854 = vmatmul.mubr.f32.vlgmr.msra.gmra.mrb[58].mxu1 %v4089_v36  ;;  %v4091_v49 = vand.u32 2147483647, %v4075_v39  ;;  %v4081_v10 = vsub.f32 %v4031_v60, %v8290_v2  ;;  %v4039_v3 = vrot.slane %v3990_v62, %v7621_v20  ;;  %v3987_v11 = vrot.slane %v3959_v63, %v7605_v13  ;;  %v3841_v36 = vld [vmem:[#allocation3 + $0x580] sm:$0xff]  ;;  %v3843_v39 = vld [vmem:[#allocation3 + $0x590] sm:$0xff] }
 0xfa6   :  { %6856 = vmatprep.mubr.f32.mxu1 %v4090_v38  ;;  %7376 = vmatpush3.bf16.msra.mxu1 %v7373_v1  ;;  %v4093_v1 = vand.u32 2147483647, %v4077_v50  ;;  %v4079_v29 = vsub.f32 %v4023_v51, %v8284_v18  ;;  %v4094_v53 = vand.u32 2147483647, %v4078_v57  ;;  %v4096_v14 = vand.u32 2147483647, %v4080_v35 }
 0xfa7   :  { %7378 = vmatprep.subr.bf16.mxu1 %v7377_v15  ;;  %v4082_v16 = vsub.f32 %v4035_v6, %v8290_v2  ;;  %v4043_v40 = vrot.slane %v3973_v7, %v7621_v20  ;;  %v3989_v22 = vcombine.high %v3973_v7, %v3973_v7  ;;  %v4097_v23 = vand.u32 2147483647, %v4081_v10  ;;  %v3842_v38 = vld [vmem:[#allocation3 + $0x588] sm:$0xff] }
 0xfa8   :  { %v4095_v8 = vand.u32 2147483647, %v4079_v29  ;;  %v4083_v24 = vsub.f32 %v4039_v3, %v8290_v2  ;;  %v4047_v25 = vrot.slane %v3987_v11, %v7621_v20  ;;  %v3991_v27 = vcombine.high %v3987_v11, %v3987_v11 }
 0xfa9   :  { %6857 = vmatmul.mubr.f32.gmra.mrb[60].mxu1 %v4091_v49  ;;  %v4098_v28 = vand.u32 2147483647, %v4082_v16  ;;  %v4084_v12 = vsub.f32 %v4043_v40, %v8290_v2  ;;  %v4051_v13 = vrot.slane %v3989_v22, %v7621_v20  ;;  %v7389_v41 = vpack.c.bf16 %v3842_v38, %v3841_v36 }
 0xfaa   :  { %6859 = vmatprep.mubr.f32.mxu1 %v4092_v56  ;;  %7380 = vmatpush3.bf16.msra.mxu1 %v7377_v15  ;;  %v4099_v31 = vand.u32 2147483647, %v4083_v24  ;;  %v4085_v0 = vsub.f32 %v4047_v25, %v8290_v2  ;;  %v4055_v9 = vrot.slane %v3991_v27, %v7621_v20  ;;  %v7393_v43 = vpack.c.bf16 %v3844_v42, %v3843_v39  ;;  %v3845_v20 = vld [vmem:[#allocation3 + $0x5a0] sm:$0xff] }
 0xfab   :  { %7382 = vmatprep.subr.bf16.mxu1 %v7381_v48  ;;  %v4100_v32 = vand.u32 2147483647, %v4084_v12  ;;  %v4086_v33 = vsub.f32 %v4051_v13, %v8290_v2  ;;  %7390 = vmatprep.subr.bf16.mxu0 %v7389_v41  ;;  %v7397_v19 = vpack.c.bf16 %v3846_v45, %v3845_v20 }
 0xfac   :  { %v4101_v34 = vand.u32 2147483647, %v4085_v0  ;;  %v4087_v17 = vsub.f32 %v4055_v9, %v8290_v2  ;;  %7392 = vmatpush3.bf16.msra.mxu0 %v7389_v41  ;;  %v8338_v2 = vld [vmem:[#allocation3 + $0x530] ss:$0 sm:$0xff] }
 0xfad   :  { %6860 = vmatmul.mubr.f32.gmra.mrb[62].mxu1 %v4093_v1  ;;  %v4102_v30 = vand.u32 2147483647, %v4086_v33  ;;  %7394 = vmatprep.subr.bf16.mxu0 %v7393_v43 }
 0xfae   :  { %6862 = vmatprep.mubr.f32.mxu1 %v4094_v53  ;;  %7384 = vmatpush3.bf16.msra.mxu1 %v7381_v48  ;;  %v4103_v15 = vand.u32 2147483647, %v4087_v17 }
 0xfaf   :  { %7386 = vmatprep.subr.bf16.mxu1 %v7385_v61 }
 0xfb0   :  { %7396 = vmatpush3.bf16.msra.mxu0 %v7393_v43 }
 0xfb1   :  { %6863 = vmatmul.mubr.f32.gmra.mrb[64].mxu1 %v4095_v8  ;;  %7398 = vmatprep.subr.bf16.mxu0 %v7397_v19 }
 0xfb2   :  { %6865 = vmatprep.mubr.f32.mxu1 %v4096_v14  ;;  %7388 = vmatpush3.bf16.msra.mxu1 %v7385_v61 }
 0xfb4   :  { %7400 = vmatpush3.bf16.msra.mxu0 %v7397_v19 }
 0xfb5   :  { %6866 = vmatmul.mubr.f32.gmra.mrb[66].mxu1 %v4097_v23 }
 0xfb6   :  { %6868 = vmatprep.mubr.f32.mxu1 %v4098_v28 }
 0xfb9   :  { %6869 = vmatmul.mubr.f32.gmra.mrb[68].mxu1 %v4099_v31 }
 0xfba   :  { %6871 = vmatprep.mubr.f32.mxu1 %v4100_v32 }
 0xfbd   :  { %6872 = vmatmul.mubr.f32.gmra.mrb[70].mxu1 %v4101_v34 }
 0xfbe   :  { %6874 = vmatprep.mubr.f32.mxu1 %v4102_v30 }
 0xfc1   :  { %6875 = vmatmul.mubr.f32.gmra.mrb[72].mxu1 %v4103_v15 }
0x1078   :  { %v6855_v46 = vpop.f32.mrb[58].mxu1 }
0x1079   :  { %v4180_v47 = vadd.f32 %v6855_v46, %v8338_v2  ;;  %v4174_v48 = vpop.f32.mrb[59].mxu1 }
0x107a   :  { %v4175_v49 = vadd.f32 %v8338_v2, %v4174_v48 }
0x107b   :  { %v4270_v50 = vmul.f32 0.01, %v4180_v47  ;;  %vm4254_vm6 = vcmp.gt.f32.partialorder %v4180_v47, 0.0 }
0x107c   :  { %vm4253_vm7 = vcmp.gt.f32.partialorder %v4175_v49, 0.0  ;;  %v4269_v51 = vmul.f32 0.01, %v4175_v49  ;;  %v6858_v52 = vpop.f32.mrb[60].mxu1 }
0x107d   :  { %v4190_v54 = vadd.f32 %v6858_v52, %v8338_v2  ;;  %v4184_v55 = vpop.f32.mrb[61].mxu1  ;;  %v4286_v58 = vsel %vm4254_vm6, %v4180_v47, %v4270_v50 }
0x107e   :  { %v4185_v56 = vadd.f32 %v8338_v2, %v4184_v55  ;;  %v4285_v57 = vsel %vm4253_vm7, %v4175_v49, %v4269_v51  ;;  %v3847_v55 = vld [vmem:[#allocation3 + $0x5b0] sm:$0xff] }
0x107f   :  { %v4272_v59 = vmul.f32 0.01, %v4190_v54  ;;  %6893 = vmatprep.mubr.msk.f32.mxu1 %vm552_vm2, %v4285_v57  ;;  %vm4256_vm0 = vcmp.gt.f32.partialorder %v4190_v54, 0.0 }
0x1080   :  { %vm4255_vm4 = vcmp.gt.f32.partialorder %v4185_v56, 0.0  ;;  %v4271_v60 = vmul.f32 0.01, %v4185_v56  ;;  %v6861_v61 = vpop.f32.mrb[62].mxu1  ;;  %6894 = vmatmul.mubr.msk.f32.vlgmr.msra.gmra.mrb[74].mxu1 %vm552_vm2, %v4286_v58  ;;  %v3851_v58 = vld [vmem:[#allocation3 + $0x5d0] sm:$0xff] }
0x1081   :  { %v4200_v1 = vadd.f32 %v6861_v61, %v8338_v2  ;;  %v4194_v29 = vpop.f32.mrb[63].mxu1  ;;  %v4288_v35 = vsel %vm4256_vm0, %v4190_v54, %v4272_v59  ;;  %v3852_v59 = vld [vmem:[#allocation3 + $0x5d8] sm:$0xff]  ;;  %v3853_v61 = vld [vmem:[#allocation3 + $0x5e0] sm:$0xff] }
0x1082   :  { %v4195_v62 = vadd.f32 %v8338_v2, %v4194_v29  ;;  %v4287_v63 = vsel %vm4255_vm4, %v4185_v56, %v4271_v60  ;;  %v3848_v56 = vld [vmem:[#allocation3 + $0x5b8] sm:$0xff] }
0x1083   :  { %v4274_v53 = vmul.f32 0.01, %v4200_v1  ;;  %6896 = vmatprep.mubr.msk.f32.mxu1 %vm552_vm2, %v4287_v63  ;;  %vm4258_vm15 = vcmp.gt.f32.partialorder %v4200_v1, 0.0  ;;  %v7401_v57 = vpack.c.bf16 %v3848_v56, %v3847_v55  ;;  %v8373_v29 = vld [vmem:[#allocation3 + $0x578] ss:$0 sm:$0xff] }
0x1084   :  { %vm4257_vm6 = vcmp.gt.f32.partialorder %v4195_v62, 0.0  ;;  %v4273_v6 = vmul.f32 0.01, %v4195_v62  ;;  %v6864_v7 = vpop.f32.mrb[64].mxu1  ;;  %6897 = vmatmul.mubr.msk.f32.gmra.mrb[76].mxu1 %vm552_vm2, %v4288_v35 }
0x1085   :  { %v4210_v8 = vadd.f32 %v6864_v7, %v8338_v2  ;;  %v4204_v10 = vpop.f32.mrb[65].mxu1  ;;  %v4290_v16 = vsel %vm4258_vm15, %v4200_v1, %v4274_v53  ;;  %7402 = vmatprep.subr.bf16.mxu0 %v7401_v57  ;;  %v7409_v1 = vpack.c.bf16 %v3853_v61, %v3852_v59 }
0x1086   :  { %v4205_v3 = vadd.f32 %v8338_v2, %v4204_v10  ;;  %v4289_v11 = vsel %vm4257_vm6, %v4195_v62, %v4273_v6  ;;  %7404 = vmatpush3.bf16.msra.mxu0 %v7401_v57 }
0x1087   :  { %v4276_v14 = vmul.f32 0.01, %v4210_v8  ;;  %6899 = vmatprep.mubr.msk.f32.mxu1 %vm552_vm2, %v4289_v11  ;;  %vm4260_vm7 = vcmp.gt.f32.partialorder %v4210_v8, 0.0  ;;  %6989 = vmatprep.subr.mxu0 %v7568_v26 }
0x1088   :  { %vm4259_vm4 = vcmp.gt.f32.partialorder %v4205_v3, 0.0  ;;  %v4275_v40 = vmul.f32 0.01, %v4205_v3  ;;  %v6867_v22 = vpop.f32.mrb[66].mxu1  ;;  %6900 = vmatmul.mubr.msk.f32.gmra.mrb[78].mxu1 %vm552_vm2, %v4290_v16 }
0x1089   :  { %v4220_v23 = vadd.f32 %v6867_v22, %v8338_v2  ;;  %v4214_v24 = vpop.f32.mrb[67].mxu1  ;;  %v4292_v12 = vsel %vm4260_vm7, %v4210_v8, %v4276_v14 }
0x108a   :  { %v4215_v25 = vadd.f32 %v8338_v2, %v4214_v24  ;;  %v4291_v27 = vsel %vm4259_vm4, %v4205_v3, %v4275_v40 }
0x108b   :  { %v4278_v28 = vmul.f32 0.01, %v4220_v23  ;;  %6902 = vmatprep.mubr.msk.f32.mxu1 %vm552_vm2, %v4291_v27  ;;  %vm4262_vm0 = vcmp.gt.f32.partialorder %v4220_v23, 0.0 }
0x108c   :  { %vm4261_vm6 = vcmp.gt.f32.partialorder %v4215_v25, 0.0  ;;  %v4277_v13 = vmul.f32 0.01, %v4215_v25  ;;  %v6870_v31 = vpop.f32.mrb[68].mxu1  ;;  %6903 = vmatmul.mubr.msk.f32.gmra.mrb[80].mxu1 %vm552_vm2, %v4292_v12 }
0x108d   :  { %v4230_v0 = vadd.f32 %v6870_v31, %v8338_v2  ;;  %v4224_v9 = vpop.f32.mrb[69].mxu1  ;;  %v4294_v17 = vsel %vm4262_vm0, %v4220_v23, %v4278_v28 }
0x108e   :  { %v4225_v32 = vadd.f32 %v8338_v2, %v4224_v9  ;;  %v4293_v33 = vsel %vm4261_vm6, %v4215_v25, %v4277_v13 }
0x108f   :  { %v4280_v34 = vmul.f32 0.01, %v4230_v0  ;;  %6905 = vmatprep.mubr.msk.f32.mxu1 %vm552_vm2, %v4293_v33  ;;  %vm4264_vm15 = vcmp.gt.f32.partialorder %v4230_v0, 0.0 }
0x1090   :  { %vm4263_vm4 = vcmp.gt.f32.partialorder %v4225_v32, 0.0  ;;  %v4279_v30 = vmul.f32 0.01, %v4225_v32  ;;  %v6873_v15 = vpop.f32.mrb[70].mxu1  ;;  %6906 = vmatmul.mubr.msk.f32.gmra.mrb[82].mxu1 %vm552_vm2, %v4294_v17 }
0x1091   :  { %v4240_v36 = vadd.f32 %v6873_v15, %v8338_v2  ;;  %v4234_v38 = vpop.f32.mrb[71].mxu1  ;;  %v4296_v43 = vsel %vm4264_vm15, %v4230_v0, %v4280_v34 }
0x1092   :  { %v4235_v39 = vadd.f32 %v8338_v2, %v4234_v38  ;;  %v4295_v41 = vsel %vm4263_vm4, %v4225_v32, %v4279_v30 }
0x1093   :  { %v4282_v42 = vmul.f32 0.01, %v4240_v36  ;;  %6908 = vmatprep.mubr.msk.f32.mxu1 %vm552_vm2, %v4295_v41  ;;  %vm4266_vm7 = vcmp.gt.f32.partialorder %v4240_v36, 0.0 }
0x1094   :  { %vm4265_vm6 = vcmp.gt.f32.partialorder %v4235_v39, 0.0  ;;  %v4281_v20 = vmul.f32 0.01, %v4235_v39  ;;  %v6876_v45 = vpop.f32.mrb[72].mxu1  ;;  %6909 = vmatmul.mubr.msk.f32.gmra.mrb[84].mxu1 %vm552_vm2, %v4296_v43 }
0x1095   :  { %v4250_v19 = vadd.f32 %v6876_v45, %v8338_v2  ;;  %v4244_v46 = vpop.f32.mrb[73].mxu1  ;;  %v4298_v50 = vsel %vm4266_vm7, %v4240_v36, %v4282_v42 }
0x1096   :  { %v4245_v47 = vadd.f32 %v8338_v2, %v4244_v46  ;;  %v4297_v48 = vsel %vm4265_vm6, %v4235_v39, %v4281_v20  ;;  %v3850_v2 = vld [vmem:[#allocation3 + $0x5c8] sm:$0xff] }
0x1097   :  { %v4284_v49 = vmul.f32 0.01, %v4250_v19  ;;  %6911 = vmatprep.mubr.msk.f32.mxu1 %vm552_vm2, %v4297_v48  ;;  %vm4268_vm0 = vcmp.gt.f32.partialorder %v4250_v19, 0.0  ;;  %v7405_v60 = vpack.c.bf16 %v3851_v58, %v3850_v2 }
0x1098   :  { %vm4267_vm4 = vcmp.gt.f32.partialorder %v4245_v47, 0.0  ;;  %v4283_v51 = vmul.f32 0.01, %v4245_v47  ;;  %6912 = vmatmul.mubr.msk.f32.gmra.mrb[86].mxu1 %vm552_vm2, %v4298_v50 }
0x1099   :  { %v4300_v54 = vsel %vm4268_vm0, %v4250_v19, %v4284_v49  ;;  %7406 = vmatprep.subr.bf16.mxu1 %v7405_v60 }
0x109a   :  { %v4299_v52 = vsel %vm4267_vm4, %v4245_v47, %v4283_v51  ;;  %7408 = vmatpush3.bf16.msra.mxu1 %v7405_v60 }
0x109b   :  { %6914 = vmatprep.mubr.msk.f32.mxu1 %vm552_vm2, %v4299_v52  ;;  %7410 = vmatprep.subr.bf16.mxu1 %v7409_v1 }
0x109c   :  { %6915 = vmatmul.mubr.msk.f32.gmra.mrb[88].mxu1 %vm552_vm2, %v4300_v54 }
0x109e   :  { %7412 = vmatpush3.bf16.msra.mxu1 %v7409_v1 }
0x1153   :  { %v6895_v62 = vpop.f32.mrb[74].mxu1 }
0x1154   :  { %v4425_v63 = vadd.f32 %v6895_v62, %v8373_v29  ;;  %v4419_v53 = vpop.f32.mrb[75].mxu1 }
0x1155   :  { %v4420_v35 = vadd.f32 %v8373_v29, %v4419_v53 }
0x1156   :  { %v4515_v6 = vmul.f32 0.01, %v4425_v63  ;;  %vm4499_vm15 = vcmp.gt.f32.partialorder %v4425_v63, 0.0 }
0x1157   :  { %vm4498_vm7 = vcmp.gt.f32.partialorder %v4420_v35, 0.0  ;;  %v4514_v7 = vmul.f32 0.01, %v4420_v35  ;;  %v6898_v8 = vpop.f32.mrb[76].mxu1 }
0x1158   :  { %v4435_v10 = vadd.f32 %v6898_v8, %v8373_v29  ;;  %v4429_v3 = vpop.f32.mrb[77].mxu1  ;;  %v4531_v16 = vsel %vm4499_vm15, %v4425_v63, %v4515_v6 }
0x1159   :  { %v4430_v11 = vadd.f32 %v8373_v29, %v4429_v3  ;;  %v4530_v14 = vsel %vm4498_vm7, %v4420_v35, %v4514_v7 }
0x115a   :  { %v4517_v40 = vmul.f32 0.01, %v4435_v10  ;;  %6933 = vmatprep.mubr.msk.f32.mxu0 %vm552_vm2, %v4530_v14  ;;  %vm4501_vm6 = vcmp.gt.f32.partialorder %v4435_v10, 0.0 }
0x115b   :  { %vm4500_vm0 = vcmp.gt.f32.partialorder %v4430_v11, 0.0  ;;  %v4516_v22 = vmul.f32 0.01, %v4430_v11  ;;  %v6901_v23 = vpop.f32.mrb[78].mxu1  ;;  %6934 = vmatmul.mubr.msk.f32.vlgmr.msra.gmra.mrb[82].mxu0 %vm552_vm2, %v4531_v16 }
0x115c   :  { %v4445_v24 = vadd.f32 %v6901_v23, %v8373_v29  ;;  %6990 = vmatpush3.msra.mxu0 %v8284_v18  ;;  %v4439_v25 = vpop.f32.mrb[79].mxu1  ;;  %v4533_v13 = vsel %vm4501_vm6, %v4435_v10, %v4517_v40 }
0x115d   :  { %v4440_v27 = vadd.f32 %v8373_v29, %v4439_v25  ;;  %v4532_v28 = vsel %vm4500_vm0, %v4430_v11, %v4516_v22  ;;  %6994 = vmatprep.subr.mxu0 %v7568_v26 }
0x115e   :  { %v4519_v12 = vmul.f32 0.01, %v4445_v24  ;;  %6936 = vmatprep.mubr.msk.f32.mxu0 %vm552_vm2, %v4532_v28  ;;  %vm4503_vm4 = vcmp.gt.f32.partialorder %v4445_v24, 0.0 }
0x115f   :  { %vm4502_vm15 = vcmp.gt.f32.partialorder %v4440_v27, 0.0  ;;  %v4518_v31 = vmul.f32 0.01, %v4440_v27  ;;  %v6904_v0 = vpop.f32.mrb[80].mxu1  ;;  %6937 = vmatmul.mubr.msk.f32.gmra.mrb[84].mxu0 %vm552_vm2, %v4533_v13 }
0x1160   :  { %v4455_v9 = vadd.f32 %v6904_v0, %v8373_v29  ;;  %v4449_v32 = vpop.f32.mrb[81].mxu1  ;;  %v4535_v17 = vsel %vm4503_vm4, %v4445_v24, %v4519_v12 }
0x1161   :  { %v4450_v18 = vadd.f32 %v8373_v29, %v4449_v32  ;;  %v4534_v33 = vsel %vm4502_vm15, %v4440_v27, %v4518_v31 }
0x1162   :  { %v4521_v34 = vmul.f32 0.01, %v4455_v9  ;;  %6939 = vmatprep.mubr.msk.f32.mxu0 %vm552_vm2, %v4534_v33  ;;  %vm4505_vm7 = vcmp.gt.f32.partialorder %v4455_v9, 0.0 }
0x1163   :  { %vm4504_vm0 = vcmp.gt.f32.partialorder %v4450_v18, 0.0  ;;  %v4520_v30 = vmul.f32 0.01, %v4450_v18  ;;  %v6907_v15 = vpop.f32.mrb[82].mxu1  ;;  %6940 = vmatmul.mubr.msk.f32.gmra.mrb[86].mxu0 %vm552_vm2, %v4535_v17 }
0x1164   :  { %v4465_v36 = vadd.f32 %v6907_v15, %v8373_v29  ;;  %v4459_v38 = vpop.f32.mrb[83].mxu1  ;;  %v4537_v43 = vsel %vm4505_vm7, %v4455_v9, %v4521_v34 }
0x1165   :  { %v4460_v39 = vadd.f32 %v8373_v29, %v4459_v38  ;;  %v4536_v41 = vsel %vm4504_vm0, %v4450_v18, %v4520_v30 }
0x1166   :  { %v4523_v42 = vmul.f32 0.01, %v4465_v36  ;;  %6942 = vmatprep.mubr.msk.f32.mxu0 %vm552_vm2, %v4536_v41  ;;  %vm4507_vm6 = vcmp.gt.f32.partialorder %v4465_v36, 0.0 }
0x1167   :  { %vm4506_vm15 = vcmp.gt.f32.partialorder %v4460_v39, 0.0  ;;  %v4522_v20 = vmul.f32 0.01, %v4460_v39  ;;  %v6910_v45 = vpop.f32.mrb[84].mxu1  ;;  %6943 = vmatmul.mubr.msk.f32.gmra.mrb[88].mxu0 %vm552_vm2, %v4537_v43 }
0x1168   :  { %v4475_v19 = vadd.f32 %v6910_v45, %v8373_v29  ;;  %v4469_v46 = vpop.f32.mrb[85].mxu1  ;;  %v4539_v50 = vsel %vm4507_vm6, %v4465_v36, %v4523_v42 }
0x1169   :  { %v4470_v47 = vadd.f32 %v8373_v29, %v4469_v46  ;;  %v4538_v48 = vsel %vm4506_vm15, %v4460_v39, %v4522_v20 }
0x116a   :  { %v4525_v49 = vmul.f32 0.01, %v4475_v19  ;;  %6945 = vmatprep.mubr.msk.f32.mxu0 %vm552_vm2, %v4538_v48  ;;  %vm4509_vm4 = vcmp.gt.f32.partialorder %v4475_v19, 0.0 }
0x116b   :  { %vm4508_vm0 = vcmp.gt.f32.partialorder %v4470_v47, 0.0  ;;  %v4524_v51 = vmul.f32 0.01, %v4470_v47  ;;  %v6913_v52 = vpop.f32.mrb[86].mxu1  ;;  %6946 = vmatmul.mubr.msk.f32.gmra.mrb[90].mxu0 %vm552_vm2, %v4539_v50 }
0x116c   :  { %v4485_v54 = vadd.f32 %v6913_v52, %v8373_v29  ;;  %v4479_v55 = vpop.f32.mrb[87].mxu1  ;;  %v4541_v58 = vsel %vm4509_vm4, %v4475_v19, %v4525_v49 }
0x116d   :  { %v4480_v56 = vadd.f32 %v8373_v29, %v4479_v55  ;;  %v4540_v57 = vsel %vm4508_vm0, %v4470_v47, %v4524_v51 }
0x116e   :  { %v4527_v2 = vmul.f32 0.01, %v4485_v54  ;;  %6948 = vmatprep.mubr.msk.f32.mxu0 %vm552_vm2, %v4540_v57  ;;  %vm4511_vm7 = vcmp.gt.f32.partialorder %v4485_v54, 0.0 }
0x116f   :  { %vm4510_vm15 = vcmp.gt.f32.partialorder %v4480_v56, 0.0  ;;  %v4526_v59 = vmul.f32 0.01, %v4480_v56  ;;  %v6916_v60 = vpop.f32.mrb[88].mxu1  ;;  %6949 = vmatmul.mubr.msk.f32.gmra.mrb[92].mxu0 %vm552_vm2, %v4541_v58 }
0x1170   :  { %v4495_v61 = vadd.f32 %v6916_v60, %v8373_v29  ;;  %v4489_v1 = vpop.f32.mrb[89].mxu1  ;;  %v4543_v35 = vsel %vm4511_vm7, %v4485_v54, %v4527_v2 }
0x1171   :  { %v4490_v62 = vadd.f32 %v8373_v29, %v4489_v1  ;;  %v4542_v63 = vsel %vm4510_vm15, %v4480_v56, %v4526_v59  ;;  %v8411_v29 = vld [vmem:[#allocation3 + $0x5c0] ss:$0 sm:$0xff] }
0x1172   :  { %v4529_v53 = vmul.f32 0.01, %v4495_v61  ;;  %6951 = vmatprep.mubr.msk.f32.mxu0 %vm552_vm2, %v4542_v63  ;;  %vm4513_vm6 = vcmp.gt.f32.partialorder %v4495_v61, 0.0 }
0x1173   :  { %vm4512_vm0 = vcmp.gt.f32.partialorder %v4490_v62, 0.0  ;;  %v4528_v6 = vmul.f32 0.01, %v4490_v62  ;;  %6952 = vmatmul.mubr.msk.f32.gmra.mrb[94].mxu0 %vm552_vm2, %v4543_v35 }
0x1174   :  { %v4545_v8 = vsel %vm4513_vm6, %v4495_v61, %v4529_v53 }
0x1175   :  { %v4544_v7 = vsel %vm4512_vm0, %v4490_v62, %v4528_v6 }
0x1176   :  { %6954 = vmatprep.mubr.msk.f32.mxu0 %vm552_vm2, %v4544_v7 }
0x1177   :  { %6955 = vmatmul.mubr.msk.f32.gmra.mrb[96].mxu0 %vm552_vm2, %v4545_v8 }
0x1178   :  { %6991 = vmatprep.mubr.msk.f32.mxu0 %vm7569_vm3, %v7568_v26 }
0x122e   :  { %v6935_v10 = vpop.f32.mrb[82].mxu0 }
0x122f   :  { %v4670_v3 = vadd.f32 %v6935_v10, %v8411_v29  ;;  %v4664_v11 = vpop.f32.mrb[83].mxu0 }
0x1230   :  { %v4665_v14 = vadd.f32 %v8411_v29, %v4664_v11 }
0x1231   :  { %v4760_v16 = vmul.f32 0.01, %v4670_v3  ;;  %vm4744_vm4 = vcmp.gt.f32.partialorder %v4670_v3, 0.0 }
0x1232   :  { %vm4743_vm7 = vcmp.gt.f32.partialorder %v4665_v14, 0.0  ;;  %v4759_v40 = vmul.f32 0.01, %v4665_v14  ;;  %v6938_v22 = vpop.f32.mrb[84].mxu0 }
0x1233   :  { %v4680_v23 = vadd.f32 %v6938_v22, %v8411_v29  ;;  %v4674_v24 = vpop.f32.mrb[85].mxu0  ;;  %v4776_v28 = vsel %vm4744_vm4, %v4670_v3, %v4760_v16 }
0x1234   :  { %v4675_v25 = vadd.f32 %v8411_v29, %v4674_v24  ;;  %v4775_v27 = vsel %vm4743_vm7, %v4665_v14, %v4759_v40  ;;  %v8445_v24 = vld [vmem:[#allocation3 + $0x5e8] ss:$0 sm:$0xff] }
0x1235   :  { %v4762_v12 = vmul.f32 0.01, %v4680_v23  ;;  %6965 = vmatprep.mubr.msk.f32.mxu1 %vm1043_vm5, %v4775_v27  ;;  %vm4746_vm2 = vcmp.gt.f32.partialorder %v4680_v23, 0.0 }
0x1236   :  { %vm4745_vm15 = vcmp.gt.f32.partialorder %v4675_v25, 0.0  ;;  %v4761_v13 = vmul.f32 0.01, %v4675_v25  ;;  %v6941_v31 = vpop.f32.mrb[86].mxu0  ;;  %6966 = vmatmul.mubr.msk.f32.vlgmr.msra.gmra.mrb[90].mxu1 %vm1043_vm5, %v4776_v28 }
0x1237   :  { %v4690_v0 = vadd.f32 %v6941_v31, %v8411_v29  ;;  %v4684_v9 = vpop.f32.mrb[87].mxu0  ;;  %v4778_v34 = vsel %vm4746_vm2, %v4680_v23, %v4762_v12  ;;  %v3856_v23 = vld [vmem:[#allocation3 + $0x5f8] sm:$0x1] }
0x1238   :  { %v4685_v32 = vadd.f32 %v8411_v29, %v4684_v9  ;;  %v4777_v18 = vsel %vm4745_vm15, %v4675_v25, %v4761_v13  ;;  %7495 = vpush %v3856_v23  ;;  %v8449_v13 = vld [vmem:[#allocation3 + $0x5f0] ss:$0 sm:$0xff] }
0x1239   :  { %v4764_v33 = vmul.f32 0.01, %v4690_v0  ;;  %6968 = vmatprep.mubr.msk.f32.mxu1 %vm1043_vm5, %v4777_v18  ;;  %vm4748_vm6 = vcmp.gt.f32.partialorder %v4690_v0, 0.0 }
0x123a   :  { %vm4747_vm0 = vcmp.gt.f32.partialorder %v4685_v32, 0.0  ;;  %v4763_v17 = vmul.f32 0.01, %v4685_v32  ;;  %v6944_v30 = vpop.f32.mrb[88].mxu0  ;;  %6969 = vmatmul.mubr.msk.f32.gmra.mrb[92].mxu1 %vm1043_vm5, %v4778_v34 }
0x123b   :  { %v4700_v15 = vadd.f32 %v6944_v30, %v8411_v29  ;;  %v4694_v36 = vpop.f32.mrb[89].mxu0  ;;  %v4780_v42 = vsel %vm4748_vm6, %v4690_v0, %v4764_v33 }
0x123c   :  { %v4695_v38 = vadd.f32 %v8411_v29, %v4694_v36  ;;  %v4779_v39 = vsel %vm4747_vm0, %v4685_v32, %v4763_v17 }
0x123d   :  { %v4766_v41 = vmul.f32 0.01, %v4700_v15  ;;  %6971 = vmatprep.mubr.msk.f32.mxu1 %vm1043_vm5, %v4779_v39  ;;  %vm4750_vm4 = vcmp.gt.f32.partialorder %v4700_v15, 0.0 }
0x123e   :  { %vm4749_vm7 = vcmp.gt.f32.partialorder %v4695_v38, 0.0  ;;  %v4765_v43 = vmul.f32 0.01, %v4695_v38  ;;  %v6947_v20 = vpop.f32.mrb[90].mxu0  ;;  %6972 = vmatmul.mubr.msk.f32.gmra.mrb[94].mxu1 %vm1043_vm5, %v4780_v42 }
0x123f   :  { %v4710_v45 = vadd.f32 %v6947_v20, %v8411_v29  ;;  %v4704_v19 = vpop.f32.mrb[91].mxu0  ;;  %v4782_v49 = vsel %vm4750_vm4, %v4700_v15, %v4766_v41 }
0x1240   :  { %v4705_v46 = vadd.f32 %v8411_v29, %v4704_v19  ;;  %v4781_v47 = vsel %vm4749_vm7, %v4695_v38, %v4765_v43 }
0x1241   :  { %v4768_v48 = vmul.f32 0.01, %v4710_v45  ;;  %6974 = vmatprep.mubr.msk.f32.mxu1 %vm1043_vm5, %v4781_v47  ;;  %vm4752_vm2 = vcmp.gt.f32.partialorder %v4710_v45, 0.0 }
0x1242   :  { %vm4751_vm15 = vcmp.gt.f32.partialorder %v4705_v46, 0.0  ;;  %v4767_v50 = vmul.f32 0.01, %v4705_v46  ;;  %v6950_v51 = vpop.f32.mrb[92].mxu0  ;;  %6975 = vmatmul.mubr.msk.f32.gmra.mrb[96].mxu1 %vm1043_vm5, %v4782_v49 }
0x1243   :  { %v4720_v52 = vadd.f32 %v6950_v51, %v8411_v29  ;;  %v4714_v54 = vpop.f32.mrb[93].mxu0  ;;  %v4784_v2 = vsel %vm4752_vm2, %v4710_v45, %v4768_v48 }
0x1244   :  { %v4715_v55 = vadd.f32 %v8411_v29, %v4714_v54  ;;  %v4783_v56 = vsel %vm4751_vm15, %v4705_v46, %v4767_v50 }
0x1245   :  { %v4770_v57 = vmul.f32 0.01, %v4720_v52  ;;  %6977 = vmatprep.mubr.msk.f32.mxu1 %vm1043_vm5, %v4783_v56  ;;  %vm4754_vm6 = vcmp.gt.f32.partialorder %v4720_v52, 0.0 }
0x1246   :  { %vm4753_vm0 = vcmp.gt.f32.partialorder %v4715_v55, 0.0  ;;  %v4769_v58 = vmul.f32 0.01, %v4715_v55  ;;  %v6953_v59 = vpop.f32.mrb[94].mxu0  ;;  %6978 = vmatmul.mubr.msk.f32.gmra.mrb[98].mxu1 %vm1043_vm5, %v4784_v2 }
0x1247   :  { %v4730_v60 = vadd.f32 %v6953_v59, %v8411_v29  ;;  %v4724_v61 = vpop.f32.mrb[95].mxu0  ;;  %v4786_v53 = vsel %vm4754_vm6, %v4720_v52, %v4770_v57 }
0x1248   :  { %v4725_v1 = vadd.f32 %v8411_v29, %v4724_v61  ;;  %v4785_v62 = vsel %vm4753_vm0, %v4715_v55, %v4769_v58 }
0x1249   :  { %v4772_v63 = vmul.f32 0.01, %v4730_v60  ;;  %6980 = vmatprep.mubr.msk.f32.mxu1 %vm1043_vm5, %v4785_v62  ;;  %vm4756_vm4 = vcmp.gt.f32.partialorder %v4730_v60, 0.0 }
0x124a   :  { %vm4755_vm7 = vcmp.gt.f32.partialorder %v4725_v1, 0.0  ;;  %v4771_v35 = vmul.f32 0.01, %v4725_v1  ;;  %v6956_v6 = vpop.f32.mrb[96].mxu0  ;;  %6981 = vmatmul.mubr.msk.f32.gmra.mrb[100].mxu1 %vm1043_vm5, %v4786_v53 }
0x124b   :  { %v4740_v7 = vadd.f32 %v6956_v6, %v8411_v29  ;;  %v4734_v8 = vpop.f32.mrb[97].mxu0  ;;  %v4788_v14 = vsel %vm4756_vm4, %v4730_v60, %v4772_v63 }
0x124c   :  { %v4735_v10 = vadd.f32 %v8411_v29, %v4734_v8  ;;  %v4787_v3 = vsel %vm4755_vm7, %v4725_v1, %v4771_v35 }
0x124d   :  { %v4774_v11 = vmul.f32 0.01, %v4740_v7  ;;  %6983 = vmatprep.mubr.msk.f32.mxu1 %vm1043_vm5, %v4787_v3  ;;  %vm4758_vm2 = vcmp.gt.f32.partialorder %v4740_v7, 0.0 }
0x124e   :  { %vm4757_vm15 = vcmp.gt.f32.partialorder %v4735_v10, 0.0  ;;  %v4773_v16 = vmul.f32 0.01, %v4735_v10  ;;  %6984 = vmatmul.mubr.msk.f32.gmra.mrb[102].mxu1 %vm1043_vm5, %v4788_v14 }
0x124f   :  { %v4790_v22 = vsel %vm4758_vm2, %v4740_v7, %v4774_v11 }
0x1250   :  { %v4789_v40 = vsel %vm4757_vm15, %v4735_v10, %v4773_v16 }
0x1251   :  { %6986 = vmatprep.mubr.msk.f32.mxu1 %vm1043_vm5, %v4789_v40 }
0x1252   :  { %6987 = vmatmul.mubr.msk.f32.gmra.mrb[104].mxu1 %vm1043_vm5, %v4790_v22 }
0x1269   :  { %s7496_s9 = spop %7495 }
0x1309   :  { %v6967_v29 = vpop.f32.mrb[90].mxu1 }
0x130a   :  { %v4915_v25 = vadd.f32 %v6967_v29, %v8445_v24  ;;  %v4909_v27 = vpop.f32.mrb[91].mxu1 }
0x130b   :  { %v4910_v28 = vadd.f32 %v8445_v24, %v4909_v27 }
0x130c   :  { %vm4989_vm6 = vcmp.gt.f32.partialorder %v4915_v25, 0.0  ;;  %v5005_v12 = vmul.f32 0.01, %v4915_v25 }
0x130d   :  { %vm4988_vm0 = vcmp.gt.f32.partialorder %v4910_v28, 0.0  ;;  %v5004_v31 = vmul.f32 0.01, %v4910_v28  ;;  %v6970_v0 = vpop.f32.mrb[92].mxu1 }
0x130e   :  { %v4925_v9 = vadd.f32 %v6970_v0, %v8445_v24  ;;  %v4919_v32 = vpop.f32.mrb[93].mxu1  ;;  %v5021_v18 = vsel %vm4989_vm6, %v4915_v25, %v5005_v12 }
0x130f   :  { %v4920_v33 = vadd.f32 %v8445_v24, %v4919_v32  ;;  %v5041_v34 = vmul.f32 %v8449_v13, %v5021_v18  ;;  %v5020_v17 = vsel %vm4988_vm0, %v4910_v28, %v5004_v31 }
0x1310   :  { %vm4991_vm4 = vcmp.gt.f32.partialorder %v4925_v9, 0.0  ;;  %v5007_v30 = vmul.f32 0.01, %v4925_v9  ;;  %v5040_v15 = vmul.f32 %v8449_v13, %v5020_v17 }
0x1311   :  { %vm4990_vm7 = vcmp.gt.f32.partialorder %v4920_v33, 0.0  ;;  %v5006_v36 = vmul.f32 0.01, %v4920_v33  ;;  %v6973_v38 = vpop.f32.mrb[94].mxu1  ;;  %v5059_v39 = vsel %vm1043_vm5, %v5041_v34, 0.0 }
0x1312   :  { %v4935_v41 = vadd.f32 %v6973_v38, %v8445_v24  ;;  %5060 = vadd.xlane.f32.xlu0 %v5059_v39  ;;  %v4929_v42 = vpop.f32.mrb[95].mxu1  ;;  %v5056_v43 = vsel %vm1043_vm5, %v5040_v15, 0.0  ;;  %v5023_v20 = vsel %vm4991_vm4, %v4925_v9, %v5007_v30 }
0x1313   :  { %v4930_v45 = vadd.f32 %v8445_v24, %v4929_v42  ;;  %5057 = vadd.xlane.f32.xlu1 %v5056_v43  ;;  %v5022_v19 = vsel %vm4990_vm7, %v4920_v33, %v5006_v36  ;;  %v5043_v46 = vmul.f32 %v8449_v13, %v5023_v20 }
0x1314   :  { %vm4993_vm2 = vcmp.gt.f32.partialorder %v4935_v41, 0.0  ;;  %v5009_v47 = vmul.f32 0.01, %v4935_v41  ;;  %v5042_v48 = vmul.f32 %v8449_v13, %v5022_v19 }
0x1315   :  { %vm4992_vm15 = vcmp.gt.f32.partialorder %v4930_v45, 0.0  ;;  %v5008_v49 = vmul.f32 0.01, %v4930_v45  ;;  %v6976_v50 = vpop.f32.mrb[96].mxu1  ;;  %v5065_v51 = vsel %vm1043_vm5, %v5043_v46, 0.0 }
0x1316   :  { %v4945_v52 = vadd.f32 %v6976_v50, %v8445_v24  ;;  %v4939_v54 = vpop.f32.mrb[97].mxu1  ;;  %v5062_v55 = vsel %vm1043_vm5, %v5042_v48, 0.0  ;;  %v5025_v56 = vsel %vm4993_vm2, %v4935_v41, %v5009_v47 }
0x1317   :  { %v4940_v57 = vadd.f32 %v8445_v24, %v4939_v54  ;;  %5063 = vadd.xlane.f32.xlu0 %v5062_v55  ;;  %5066 = vadd.xlane.f32.xlu1 %v5065_v51  ;;  %v5024_v2 = vsel %vm4992_vm15, %v4930_v45, %v5008_v49  ;;  %v5045_v58 = vmul.f32 %v8449_v13, %v5025_v56 }
0x1318   :  { %vm4995_vm6 = vcmp.gt.f32.partialorder %v4945_v52, 0.0  ;;  %v5011_v59 = vmul.f32 0.01, %v4945_v52  ;;  %v5044_v60 = vmul.f32 %v8449_v13, %v5024_v2 }
0x1319   :  { %vm4994_vm0 = vcmp.gt.f32.partialorder %v4940_v57, 0.0  ;;  %v5010_v61 = vmul.f32 0.01, %v4940_v57  ;;  %v6979_v1 = vpop.f32.mrb[98].mxu1  ;;  %v5071_v62 = vsel %vm1043_vm5, %v5045_v58, 0.0 }
0x131a   :  { %v4955_v63 = vadd.f32 %v6979_v1, %v8445_v24  ;;  %v4949_v53 = vpop.f32.mrb[99].mxu1  ;;  %v5068_v35 = vsel %vm1043_vm5, %v5044_v60, 0.0  ;;  %v5027_v6 = vsel %vm4995_vm6, %v4945_v52, %v5011_v59 }
0x131b   :  { %v4950_v7 = vadd.f32 %v8445_v24, %v4949_v53  ;;  %5069 = vadd.xlane.f32.xlu0 %v5068_v35  ;;  %5072 = vadd.xlane.f32.xlu1 %v5071_v62  ;;  %v5047_v8 = vmul.f32 %v8449_v13, %v5027_v6  ;;  %v5026_v10 = vsel %vm4994_vm0, %v4940_v57, %v5010_v61  ;;  %v8497_v61 = vstv %s7496_s9 }
0x131c   :  { %vm4997_vm4 = vcmp.gt.f32.partialorder %v4955_v63, 0.0  ;;  %v5013_v3 = vmul.f32 0.01, %v4955_v63  ;;  %v5046_v29 = vmul.f32 %v8449_v13, %v5026_v10 }
0x131d   :  { %vm4996_vm7 = vcmp.gt.f32.partialorder %v4950_v7, 0.0  ;;  %v5012_v11 = vmul.f32 0.01, %v4950_v7  ;;  %v6982_v14 = vpop.f32.mrb[100].mxu1  ;;  %v5077_v16 = vsel %vm1043_vm5, %v5047_v8, 0.0 }
0x131e   :  { %v4965_v40 = vadd.f32 %v6982_v14, %v8445_v24  ;;  %v4959_v22 = vpop.f32.mrb[101].mxu1  ;;  %v5029_v23 = vsel %vm4997_vm4, %v4955_v63, %v5013_v3  ;;  %v5074_v33 = vsel %vm1043_vm5, %v5046_v29, 0.0 }
0x131f   :  { %v4960_v25 = vadd.f32 %v8445_v24, %v4959_v22  ;;  %5078 = vadd.xlane.f32.xlu0 %v5077_v16  ;;  %v5049_v27 = vmul.f32 %v8449_v13, %v5029_v23  ;;  %v5028_v28 = vsel %vm4996_vm7, %v4950_v7, %v5012_v11 }
0x1320   :  { %vm4999_vm2 = vcmp.gt.f32.partialorder %v4965_v40, 0.0  ;;  %v5015_v12 = vmul.f32 0.01, %v4965_v40  ;;  %v5048_v17 = vmul.f32 %v8449_v13, %v5028_v28 }
0x1321   :  { %vm4998_vm15 = vcmp.gt.f32.partialorder %v4960_v25, 0.0  ;;  %v5014_v31 = vmul.f32 0.01, %v4960_v25  ;;  %v6985_v0 = vpop.f32.mrb[102].mxu1  ;;  %v5083_v9 = vsel %vm1043_vm5, %v5049_v27, 0.0 }
0x1322   :  { %v4975_v32 = vadd.f32 %v6985_v0, %v8445_v24  ;;  %v4969_v18 = vpop.f32.mrb[103].mxu1  ;;  %5084 = vadd.xlane.f32.xlu1 %v5083_v9  ;;  %v5031_v34 = vsel %vm4999_vm2, %v4965_v40, %v5015_v12  ;;  %v5080_v19 = vsel %vm1043_vm5, %v5048_v17, 0.0 }
0x1323   :  { %v4970_v30 = vadd.f32 %v8445_v24, %v4969_v18  ;;  %5075 = vadd.xlane.f32.xlu0 %v5074_v33  ;;  %v5051_v15 = vmul.f32 %v8449_v13, %v5031_v34  ;;  %v5030_v36 = vsel %vm4998_vm15, %v4960_v25, %v5014_v31  ;;  %vm8636_vm15 = vcmask 64512  }
0x1324   :  { %vm5001_vm6 = vcmp.gt.f32.partialorder %v4975_v32, 0.0  ;;  %v5017_v38 = vmul.f32 0.01, %v4975_v32  ;;  %v5050_v43 = vmul.f32 %v8449_v13, %v5030_v36 }
0x1325   :  { %vm5000_vm0 = vcmp.gt.f32.partialorder %v4970_v30, 0.0  ;;  %v5016_v39 = vmul.f32 0.01, %v4970_v30  ;;  %v6988_v41 = vpop.f32.mrb[104].mxu1  ;;  %v5089_v42 = vsel %vm1043_vm5, %v5051_v15, 0.0 }
0x1326   :  { %v4985_v20 = vadd.f32 %v6988_v41, %v8445_v24  ;;  %v4979_v45 = vpop.f32.mrb[105].mxu1  ;;  %5090 = vadd.xlane.f32.xlu1 %v5089_v42  ;;  %v5033_v46 = vsel %vm5001_vm6, %v4975_v32, %v5017_v38  ;;  %v5086_v52 = vsel %vm1043_vm5, %v5050_v43, 0.0  ;;  %vm5681_vm6 = vcmask 236736  }
0x1327   :  { %v4980_v47 = vadd.f32 %v8445_v24, %v4979_v45  ;;  %5081 = vadd.xlane.f32.xlu0 %v5080_v19  ;;  %v5032_v48 = vsel %vm5000_vm0, %v4970_v30, %v5016_v39  ;;  %v5053_v54 = vmul.f32 %v8449_v13, %v5033_v46 }
0x1328   :  { %vm5003_vm4 = vcmp.gt.f32.partialorder %v4985_v20, 0.0  ;;  %v5019_v49 = vmul.f32 0.01, %v4985_v20  ;;  %v5052_v50 = vmul.f32 %v8449_v13, %v5032_v48 }
0x1329   :  { %vm5002_vm7 = vcmp.gt.f32.partialorder %v4980_v47, 0.0  ;;  %v5018_v51 = vmul.f32 0.01, %v4980_v47  ;;  %v5095_v2 = vsel %vm1043_vm5, %v5053_v54, 0.0 }
0x132a   :  { %5087 = vadd.xlane.f32.xlu1 %v5086_v52  ;;  %v5092_v55 = vsel %vm1043_vm5, %v5052_v50, 0.0  ;;  %v5035_v56 = vsel %vm5003_vm4, %v4985_v20, %v5019_v49 }
0x132b   :  { %5093 = vadd.xlane.f32.xlu0 %v5092_v55  ;;  %v5034_v57 = vsel %vm5002_vm7, %v4980_v47, %v5018_v51  ;;  %v5055_v58 = vmul.f32 %v8449_v13, %v5035_v56 }
0x132c   :  { %v5054_v24 = vmul.f32 %v8449_v13, %v5034_v57 }
0x132d   :  { %v5101_v60 = vsel %vm1043_vm5, %v5055_v58, 0.0 }
0x132e   :  { %5096 = vadd.xlane.f32.xlu1 %v5095_v2  ;;  %v5098_v59 = vsel %vm1043_vm5, %v5054_v24, 0.0  ;;  %vm8634_vm5 = vcmask 1047559  }
0x132f   :  { %5099 = vadd.xlane.f32.xlu0 %v5098_v59  ;;  %vm8635_vm2 = vmmov %vm8634_vm5 }
0x1332   :  { %5102 = vadd.xlane.f32.xlu1 %v5101_v60 }
0x139f   :  { %v5061_v1 = vpop.xlane.xlu0 %5060 }
0x13a0   :  { %v5058_v62 = vpop.xlane.xlu1 %5057  ;;  %v5109_v63 = vadd.f32 %v8497_v61, %v5061_v1 }
0x13a1   :  { %v5108_v53 = vadd.f32 %v8497_v61, %v5058_v62 }
0x13a2   :  { %v5887_v7 = vadd.f32 -1e+08, %v5109_v63  ;;  %v5259_v11 = vrot.slane %v5109_v63, %v7841_v21 }
0x13a3   :  { %v5886_v8 = vadd.f32 -1e+08, %v5108_v53  ;;  %v5255_v14 = vrot.slane %v5108_v53, %v7841_v21 }
0x13a4   :  { %v5064_v35 = vpop.xlane.xlu0 %5063  ;;  %v5067_v6 = vpop.xlane.xlu1 %5066  ;;  %v5163_v29 = vrot.slane %v5887_v7, %v7841_v21 }
0x13a5   :  { %v5110_v13 = vadd.f32 %v8497_v61, %v5064_v35  ;;  %v5111_v10 = vadd.f32 %v8497_v61, %v5067_v6  ;;  %v5159_v25 = vrot.slane %v5886_v8, %v7841_v21  ;;  %v5316_v0 = vsel %vm1469_vm8, %v5259_v11, %v5255_v14 }
0x13a7   :  { %v5888_v3 = vadd.f32 -1e+08, %v5110_v13  ;;  %v5263_v22 = vrot.slane %v5110_v13, %v7841_v21  ;;  %v5889_v27 = vadd.f32 -1e+08, %v5111_v10  ;;  %v5267_v9 = vrot.slane %v5111_v10, %v7841_v21 }
0x13a8   :  { %v5070_v16 = vpop.xlane.xlu0 %5069  ;;  %v5073_v40 = vpop.xlane.xlu1 %5072  ;;  %v5220_v34 = vsel %vm1469_vm8, %v5163_v29, %v5159_v25 }
0x13a9   :  { %v5112_v23 = vadd.f32 %v8497_v61, %v5070_v16  ;;  %v5113_v28 = vadd.f32 %v8497_v61, %v5073_v40  ;;  %v5167_v12 = vrot.slane %v5888_v3, %v7841_v21  ;;  %v5317_v18 = vsel %vm1471_vm9, %v5263_v22, %v5316_v0 }
0x13aa   :  { %v5171_v17 = vrot.slane %v5889_v27, %v7841_v21  ;;  %v5318_v41 = vsel %vm1473_vm10, %v5267_v9, %v5317_v18 }
0x13ab   :  { %v5890_v31 = vadd.f32 -1e+08, %v5112_v23  ;;  %v5271_v33 = vrot.slane %v5112_v23, %v7841_v21  ;;  %v5891_v30 = vadd.f32 -1e+08, %v5113_v28  ;;  %v5221_v36 = vsel %vm1471_vm9, %v5167_v12, %v5220_v34 }
0x13ac   :  { %v5079_v32 = vpop.xlane.xlu0 %5078  ;;  %v5275_v42 = vrot.slane %v5113_v28, %v7841_v21  ;;  %v5222_v19 = vsel %vm1473_vm10, %v5171_v17, %v5221_v36 }
0x13ad   :  { %v5115_v15 = vadd.f32 %v8497_v61, %v5079_v32  ;;  %v5175_v38 = vrot.slane %v5890_v31, %v7841_v21  ;;  %v5319_v20 = vsel %vm1475_vm11, %v5271_v33, %v5318_v41  ;;  %v5179_v46 = vrot.slane %v5891_v30, %v7841_v21 }
0x13ae   :  { %v5320_v54 = vsel %vm1477_vm12, %v5275_v42, %v5319_v20 }
0x13af   :  { %v5085_v39 = vpop.xlane.xlu1 %5084  ;;  %v5893_v47 = vadd.f32 -1e+08, %v5115_v15  ;;  %v5223_v49 = vsel %vm1475_vm11, %v5175_v38, %v5222_v19  ;;  %v5283_v59 = vrot.slane %v5115_v15, %v7841_v21 }
0x13b0   :  { %v5076_v43 = vpop.xlane.xlu0 %5075  ;;  %v5117_v48 = vadd.f32 %v8497_v61, %v5085_v39  ;;  %v5224_v1 = vsel %vm1477_vm12, %v5179_v46, %v5223_v49 }
0x13b1   :  { %v5114_v45 = vadd.f32 %v8497_v61, %v5076_v43  ;;  %v5187_v58 = vrot.slane %v5893_v47, %v7841_v21 }
0x13b2   :  { %v5895_v60 = vadd.f32 -1e+08, %v5117_v48  ;;  %v5291_v3 = vrot.slane %v5117_v48, %v7841_v21 }
0x13b3   :  { %v5892_v50 = vadd.f32 -1e+08, %v5114_v45  ;;  %v5279_v51 = vrot.slane %v5114_v45, %v7841_v21  ;;  %v5091_v52 = vpop.xlane.xlu1 %5090 }
0x13b4   :  { %v5119_v55 = vadd.f32 %v8497_v61, %v5091_v52  ;;  %v5082_v56 = vpop.xlane.xlu0 %5081  ;;  %v5195_v40 = vrot.slane %v5895_v60, %v7841_v21 }
0x13b5   :  { %v5183_v57 = vrot.slane %v5892_v50, %v7841_v21  ;;  %v5116_v24 = vadd.f32 %v8497_v61, %v5082_v56  ;;  %v5321_v2 = vsel %vm1479_vm13, %v5279_v51, %v5320_v54 }
0x13b6   :  { %v5897_v6 = vadd.f32 -1e+08, %v5119_v55  ;;  %v5322_v10 = vsel %vm8635_vm2, %v5283_v59, %v5321_v2  ;;  %v5299_v25 = vrot.slane %v5119_v55, %v7841_v21 }
0x13b7   :  { %v5894_v62 = vadd.f32 -1e+08, %v5116_v24  ;;  %v5287_v63 = vrot.slane %v5116_v24, %v7841_v21  ;;  %v5088_v53 = vpop.xlane.xlu1 %5087  ;;  %v5225_v35 = vsel %vm1479_vm13, %v5183_v57, %v5224_v1 }
0x13b8   :  { %v5118_v13 = vadd.f32 %v8497_v61, %v5088_v53  ;;  %v5094_v7 = vpop.xlane.xlu0 %5093  ;;  %v5226_v8 = vsel %vm8634_vm5, %v5187_v58, %v5225_v35  ;;  %v5203_v0 = vrot.slane %v5897_v6, %v7841_v21 }
0x13b9   :  { %v5191_v11 = vrot.slane %v5894_v62, %v7841_v21  ;;  %v5120_v14 = vadd.f32 %v8497_v61, %v5094_v7  ;;  %v5332_v16 = vsel %vm7875_vm14, %v5226_v8, %v5322_v10  ;;  %v5323_v27 = vsel %vm1469_vm8, %v5291_v3, %v5287_v63 }
0x13ba   :  { %v5896_v22 = vadd.f32 -1e+08, %v5118_v13  ;;  %v5295_v23 = vrot.slane %v5118_v13, %v7841_v21  ;;  %v5334_v29 = vsel %vm8636_vm15, %v5332_v16, -inf }
0x13bb   :  { %v5898_v28 = vadd.f32 -1e+08, %v5120_v14  ;;  %v5303_v12 = vrot.slane %v5120_v14, %v7841_v21  ;;  %5335 = vmax.xlane.f32.xlu0 %v5334_v29  ;;  %v5097_v31 = vpop.xlane.xlu1 %5096  ;;  %v5227_v33 = vsel %vm1469_vm8, %v5195_v40, %v5191_v11  ;;  %vm8637_vm8 = vmmov %vm8635_vm2  ;;  %v3875_v40 = vld [vmem:[#allocation3 + $0x690] sm:$0xff] }
0x13bc   :  { %v5199_v5 = vrot.slane %v5896_v22, %v7841_v21  ;;  %v5324_v9 = vsel %vm1471_vm9, %v5295_v23, %v5323_v27  ;;  %v5121_v32 = vadd.f32 %v8497_v61, %v5097_v31  ;;  %v5100_v18 = vpop.xlane.xlu0 %5099  ;;  %v3876_v23 = vld [vmem:[#allocation3 + $0x698] sm:$0xff]  ;;  %v3878_v27 = vld [vmem:[#allocation3 + $0x6a8] sm:$0xff] }
0x13bd   :  { %v5207_v34 = vrot.slane %v5898_v28, %v7841_v21  ;;  %v5325_v17 = vsel %vm1473_vm10, %v5299_v25, %v5324_v9  ;;  %v5122_v30 = vadd.f32 %v8497_v61, %v5100_v18  ;;  %v7417_v29 = vpack.c.bf16 %v3876_v23, %v3875_v40  ;;  %v3877_v25 = vld [vmem:[#allocation3 + $0x6a0] sm:$0xff]  ;;  %v3880_v9 = vld [vmem:[#allocation3 + $0x6b8] sm:$0xff] }
0x13be   :  { %v5228_v15 = vsel %vm1471_vm9, %v5199_v5, %v5227_v33  ;;  %v5899_v36 = vadd.f32 -1e+08, %v5121_v32  ;;  %v5307_v38 = vrot.slane %v5121_v32, %v7841_v21  ;;  %v5326_v41 = vsel %vm1475_vm11, %v5303_v12, %v5325_v17  ;;  %vm8638_vm9 = vmmov %vm8635_vm2  ;;  %v3879_v5 = vld [vmem:[#allocation3 + $0x6b0] sm:$0xff]  ;;  %v3881_v18 = vld [vmem:[#allocation3 + $0x6c0] sm:$0xff] }
0x13bf   :  { %v5229_v39 = vsel %vm1473_vm10, %v5203_v0, %v5228_v15  ;;  %v5900_v42 = vadd.f32 -1e+08, %v5122_v30  ;;  %v5103_v43 = vpop.xlane.xlu1 %5102  ;;  %v5311_v47 = vrot.slane %v5122_v30, %v7841_v21  ;;  %vm8639_vm10 = vmmov %vm8636_vm15  ;;  %v7421_v31 = vpack.c.bf16 %v3878_v27, %v3877_v25  ;;  %v3882_v33 = vld [vmem:[#allocation3 + $0x6c8] sm:$0xff]  ;;  %v3883_v30 = vld [vmem:[#allocation3 + $0x6d0] sm:$0xff] }
0x13c0   :  { %v5230_v20 = vsel %vm1475_vm11, %v5207_v34, %v5229_v39  ;;  %v5211_v45 = vrot.slane %v5899_v36, %v7841_v21  ;;  %v5123_v19 = vadd.f32 %v8497_v61, %v5103_v43  ;;  %v5327_v48 = vsel %vm1477_vm12, %v5307_v38, %v5326_v41  ;;  %vm8640_vm11 = vmmov %vm8639_vm10  ;;  %v3884_v15 = vld [vmem:[#allocation3 + $0x6d8] sm:$0xff]  ;;  %v3885_v36 = vld [vmem:[#allocation3 + $0x6e0] sm:$0xff] }
0x13c1   :  { %v5215_v46 = vrot.slane %v5900_v42, %v7841_v21  ;;  %v5328_v55 = vsel %vm1479_vm13, %v5311_v47, %v5327_v48  ;;  %vm8642_vm14 = vmmov %vm8639_vm10  ;;  %v7429_v17 = vpack.c.bf16 %v3882_v33, %v3881_v18  ;;  %v7433_v38 = vpack.c.bf16 %v3884_v15, %v3883_v30  ;;  %v3886_v39 = vld [vmem:[#allocation3 + $0x6e8] sm:$0xff]  ;;  %v3887_v42 = vld [vmem:[#allocation3 + $0x6f0] sm:$0xff] }
0x13c2   :  { %v5901_v49 = vadd.f32 -1e+08, %v5123_v19  ;;  %v5315_v50 = vrot.slane %v5123_v19, %v7841_v21  ;;  %v5231_v51 = vsel %vm1477_vm12, %v5211_v45, %v5230_v20  ;;  %vm8641_vm12 = vmmov %vm8639_vm10  ;;  %v7437_v41 = vpack.c.bf16 %v3886_v39, %v3885_v36  ;;  %v3888_v43 = vld [vmem:[#allocation3 + $0x6f8] sm:$0xff]  ;;  %v3857_v45 = vld [vmem:[#allocation3 + $0x600] sm:$0xff] }
0x13c3   :  { %v5232_v54 = vsel %vm1479_vm13, %v5215_v46, %v5231_v51  ;;  %vm3495_vm13 = vcmask 130112   ;;  %v7441_v20 = vpack.c.bf16 %v3888_v43, %v3887_v42  ;;  %v3858_v19 = vld [vmem:[#allocation3 + $0x608] sm:$0xff]  ;;  %v3859_v51 = vld [vmem:[#allocation3 + $0x610] sm:$0xff] }
0x13c4   :  { %v5219_v52 = vrot.slane %v5901_v49, %v7841_v21  ;;  %v5329_v61 = vsel %vm8638_vm9, %v5315_v50, %v5328_v55  ;;  %v7445_v46 = vpack.c.bf16 %v3858_v19, %v3857_v45 }
0x13c6   :  { %v5233_v56 = vsel %vm8637_vm8, %v5219_v52, %v5232_v54  ;;  %v3860_v52 = vld [vmem:[#allocation3 + $0x618] sm:$0xff] }
0x13c7   :  { %v5333_v57 = vsel %vm7924_vm1, %v5233_v56, %v5329_v61  ;;  %vm8643_vm1 = vmmov %vm8639_vm10  ;;  %v7449_v54 = vpack.c.bf16 %v3860_v52, %v3859_v51  ;;  %v3861_v56 = vld [vmem:[#allocation3 + $0x620] sm:$0xff]  ;;  %v3862_v61 = vld [vmem:[#allocation3 + $0x628] sm:$0xff] }
0x13c8   :  { %v5337_v24 = vsel %vm8639_vm10, %v5333_v57, -inf }
0x13c9   :  { %5338 = vmax.xlane.f32.xlu1 %v5337_v24  ;;  %v7539_v24 = vld [vmem:[#allocation2] sm:$0xff] }
0x1448   :  { %v5336_v2 = vpop.xlane.xlu0 %5335 }
0x1449   :  { %v5340_v58 = vsub.f32 %v5332_v16, %v5336_v2  ;;  %v3874_v16 = vld [vmem:[#allocation3 + $0x688] sm:$0xff]  ;;  %v7453_v2 = vpack.c.bf16 %v3862_v61, %v3861_v56 }
0x144b   :  { %v5342_v59 = vmul.f32 1.442695, %v5340_v58  ;;  %v3863_v58 = vld [vmem:[#allocation3 + $0x630] sm:$0xff] }
0x144d   :  { %7526 = vpow2.f32 %v5342_v59  ;;  %v3864_v59 = vld [vmem:[#allocation3 + $0x638] sm:$0xff] }
0x1456   :  { %v5339_v60 = vpop.xlane.xlu1 %5338 }
0x1457   :  { %v7527_v21 = vpop.eup %7526  ;;  %v5341_v1 = vsub.f32 %v5333_v57, %v5339_v60  ;;  %v7457_v60 = vpack.c.bf16 %v3864_v59, %v3863_v58 }
0x1458   :  { %v5346_v62 = vsel %vm8640_vm11, %v7527_v21, 0.0 }
0x1459   :  { %v5344_v63 = vmul.f32 1.442695, %v5341_v1  ;;  %5347 = vadd.xlane.f32.xlu0 %v5346_v62  ;;  %v3866_v1 = vld [vmem:[#allocation3 + $0x648] sm:$0xff] }
0x145b   :  { %7528 = vpow2.f32 %v5344_v63  ;;  %v3867_v63 = vld [vmem:[#allocation3 + $0x650] sm:$0xff] }
0x1465   :  { %v7529_v53 = vpop.eup %7528 }
0x1466   :  { %v5349_v35 = vsel %vm8641_vm12, %v7529_v53, 0.0 }
0x1467   :  { %5350 = vadd.xlane.f32.xlu1 %v5349_v35 }
0x146f   :  { %3489 = vrot.lane.b32.xlu0 %v8270_v37, %s7566_s20  ;;  %v8595_v37 = vld [vmem:[#allocation2 + $0x8] sm:$0xff] }
0x1478   :  { %3491 = vrot.lane.b32.xlu1 %v8279_v44, %s7566_s20  ;;  %v3873_v44 = vld [vmem:[#allocation3 + $0x680] sm:$0xff] }
0x1479   :  { %v7413_v22 = vpack.c.bf16 %v3874_v16, %v3873_v44 }
0x147b   :  { %7414 = vmatprep.subr.bf16.mxu1 %v7413_v22 }
0x147c   :  { %7416 = vmatpush3.bf16.msra.mxu1 %v7413_v22 }
0x147d   :  { %7418 = vmatprep.subr.bf16.mxu1 %v7417_v29 }
0x1480   :  { %7420 = vmatpush3.bf16.msra.mxu1 %v7417_v29 }
0x1481   :  { %7422 = vmatprep.subr.bf16.mxu1 %v7421_v31 }
0x1484   :  { %7424 = vmatpush3.bf16.msra.mxu1 %v7421_v31 }
0x14e6   :  { %v5348_v4 = vpop.xlane.xlu0 %5347 }
0x14e7   :  { %7530 = vrcp.f32 %v5348_v4 }
0x14ea   :  { %v3490_v6 = vpop.permute.xlu0 %3489 }
0x14eb   :  { %3496 = vst.msk [vmem:[%s8617_s2] sm:$0xff] %vm3495_vm13, %v3490_v6  ;;  %v3870_v6 = vld [vmem:[#allocation3 + $0x668] sm:$0xff] }
0x14f1   :  { %v7531_v13 = vpop.eup %7530 }
0x14f2   :  { %v5354_v7 = vmul.f32 %v7531_v13, %v5348_v4  ;;  %v3869_v4 = vld [vmem:[#allocation3 + $0x660] sm:$0xff] }
0x14f4   :  { %v5356_v8 = vsub.f32 2.0, %v5354_v7  ;;  %v5351_v10 = vpop.xlane.xlu1 %5350  ;;  %v3871_v7 = vld [vmem:[#allocation3 + $0x670] sm:$0xff] }
0x14f5   :  { %7532 = vrcp.f32 %v5351_v10 }
0x14f6   :  { %v5358_v3 = vmul.f32 %v7531_v13, %v5356_v8  ;;  %v7469_v13 = vpack.c.bf16 %v3870_v6, %v3869_v4  ;;  %v3872_v8 = vld [vmem:[#allocation3 + $0x678] sm:$0xff] }
0x14f8   :  { %v5360_v11 = vmul.f32 %v7527_v21, %v5358_v3  ;;  %v3492_v14 = vpop.permute.xlu1 %3491  ;;  %v3865_v21 = vld [vmem:[#allocation3 + $0x640] sm:$0xff] }
0x14f9   :  { %3497 = vst.msk [vmem:[%s8617_s2 + $0x8] sm:$0xff] %vm3495_vm13, %v3492_v14  ;;  %v7461_v62 = vpack.c.bf16 %v3866_v1, %v3865_v21  ;;  %v5904_v3 = vld [vmem:[#allocation3 + $0x700] ss:$0 sm:$0xff] }
0x14fa   :  { %6992 = vmatmul.mubr.msk.f32.vlgmr.msra.gmra.mrb[98].mxu0 %vm8642_vm14, %v5360_v11  ;;  %5364 = vrot.lane.b32.xlu1 %v5360_v11, %s7570_s6 }
0x14fb   :  { %6995 = vmatpush3.msra.mxu0 %v8595_v37  ;;  %6996 = vmatprep.mubr.msk.f32.mxu0 %vm7569_vm3, %v7568_v26  ;;  %v7425_v26 = vpack.c.bf16 %v3880_v9, %v3879_v5  ;;  %vm5370_vm3 = vcmask 195712  }
0x14fd   :  { %7426 = vmatprep.subr.bf16.mxu1 %v7425_v26 }
0x14fe   :  { %7428 = vmatpush3.bf16.msra.mxu1 %v7425_v26 }
0x14ff   :  { %v7533_v28 = vpop.eup %7532  ;;  %7430 = vmatprep.subr.bf16.mxu1 %v7429_v17 }
0x1500   :  { %v5355_v12 = vmul.f32 %v7533_v28, %v5351_v10  ;;  %v7473_v10 = vpack.c.bf16 %v3872_v8, %v3871_v7 }
0x1502   :  { %v5357_v0 = vsub.f32 2.0, %v5355_v12  ;;  %7432 = vmatpush3.bf16.msra.mxu1 %v7429_v17 }
0x1503   :  { %7434 = vmatprep.subr.bf16.mxu1 %v7433_v38 }
0x1504   :  { %v5359_v32 = vmul.f32 %v7533_v28, %v5357_v0 }
0x1506   :  { %v5361_v34 = vmul.f32 %v7529_v53, %v5359_v32  ;;  %7436 = vmatpush3.bf16.msra.mxu1 %v7433_v38  ;;  %v3868_v53 = vld [vmem:[#allocation3 + $0x658] sm:$0xff] }
0x1507   :  { %7438 = vmatprep.subr.bf16.mxu1 %v7437_v41  ;;  %v7465_v35 = vpack.c.bf16 %v3868_v53, %v3867_v63 }
0x1508   :  { %5366 = vrot.lane.b32.xlu1 %v5361_v34, %s7570_s6  ;;  %6997 = vmatmul.mubr.msk.f32.vlgmr.msra.gmra.mrb[100].mxu0 %vm8643_vm1, %v5361_v34 }
0x150a   :  { %7440 = vmatpush3.bf16.msra.mxu1 %v7437_v41 }
0x150b   :  { %7442 = vmatprep.subr.bf16.mxu1 %v7441_v20 }
0x150e   :  { %7444 = vmatpush3.bf16.msra.mxu1 %v7441_v20 }
0x150f   :  { %7446 = vmatprep.subr.bf16.mxu1 %v7445_v46 }
0x156c   :  { %v5365_v47 = vpop.permute.xlu1 %5364 }
0x156d   :  { %5371 = vst.msk [vmem:[%s8617_s2] sm:$0xff] %vm5370_vm3, %v5365_v47 }
0x157a   :  { %v5367_v48 = vpop.permute.xlu1 %5366 }
0x157b   :  { %5372 = vst.msk [vmem:[%s8617_s2 + $0x8] sm:$0xff] %vm5370_vm3, %v5367_v48 }
0x15cd   :  { %v5441_v49 = vpop.f32.mrb[98].mxu0 }
0x15ce   :  { %v6993_v50 = vpop.f32.mrb[99].mxu0  ;;  %7031 = vmatprep.mubr.f32.mxu1 %v5441_v49 }
0x15db   :  { %v5513_v55 = vpop.f32.mrb[100].mxu0 }
0x15dc   :  { %v6998_v57 = vpop.f32.mrb[101].mxu0  ;;  %7032 = vmatmul.mubr.f32.vlgmr.msra.gmra.mrb[106].mxu1 %v5513_v55 }
0x15dd   :  { %7448 = vmatpush3.bf16.msra.mxu1 %v7445_v46  ;;  %7066 = vmatprep.mubr.f32.mxu1 %v7539_v24 }
0x15de   :  { %7450 = vmatprep.subr.bf16.mxu1 %v7449_v54 }
0x15e1   :  { %7452 = vmatpush3.bf16.msra.mxu1 %v7449_v54 }
0x15e2   :  { %7454 = vmatprep.subr.bf16.mxu1 %v7453_v2 }
0x15e5   :  { %7456 = vmatpush3.bf16.msra.mxu1 %v7453_v2 }
0x15e6   :  { %7458 = vmatprep.subr.bf16.mxu1 %v7457_v60 }
0x15e9   :  { %7460 = vmatpush3.bf16.msra.mxu1 %v7457_v60 }
0x15ea   :  { %7462 = vmatprep.subr.bf16.mxu1 %v7461_v62 }
0x15ed   :  { %7464 = vmatpush3.bf16.msra.mxu1 %v7461_v62 }
0x15ee   :  { %7466 = vmatprep.subr.bf16.mxu1 %v7465_v35 }
0x15f1   :  { %7468 = vmatpush3.bf16.msra.mxu1 %v7465_v35 }
0x15f2   :  { %7470 = vmatprep.subr.bf16.mxu1 %v7469_v13 }
0x15f5   :  { %7472 = vmatpush3.bf16.msra.mxu1 %v7469_v13 }
0x15f6   :  { %7474 = vmatprep.subr.bf16.mxu1 %v7473_v10 }
0x15f9   :  { %7476 = vmatpush3.bf16.msra.mxu1 %v7473_v10 }
0x15fc   :  { %7067 = vmatmul.mubr.f32.vlgmr.msra.gmra.mrb[106].mxu1 %v8595_v37 }
0x16cf   :  { %v7068_v11 = vpop.f32.mrb[106].mxu1 }
0x16d0   :  { %v5672_v14 = vadd.f32 %v7068_v11, %v5904_v3  ;;  %v5658_v44 = vpop.f32.mrb[107].mxu1 }
0x16d1   :  { %v5671_v16 = vadd.f32 %v5904_v3, %v5658_v44 }
0x16d2   :  { %5677 = vrot.lane.b32.xlu1 %v5672_v14, %s7572_s18 }
0x16d3   :  { %5675 = vrot.lane.b32.xlu0 %v5671_v16, %s7572_s18 }
0x1744   :  { %v5678_v40 = vpop.permute.xlu1 %5677 }
0x1745   :  { %5683 = vst.msk [vmem:[%s8617_s2 + $0x8] sm:$0xff] %vm5681_vm6, %v5678_v40  ;;  %v5676_v22 = vpop.permute.xlu0 %5675 }
0x1746   :  { %5682 = vst.msk [vmem:[%s8617_s2] sm:$0xff] %vm5681_vm6, %v5676_v22 }
0x1747   :  { %5688 = vsyncpa [#allocation4], 1 }

</bundles_post_ra>
